<compile_context>
chip_gen: v7x
topology: tpu7x:2x2x1
jax: 0.10.0
libtpu: 0.0.40
codegen_flags: <defaults>
</compile_context>

<pallas_src>
import functools

import jax
import jax.numpy as jnp
import numpy as np
from jax import lax
from jax.experimental import pallas as pl
from jax.experimental.pallas import tpu as pltpu


def _sigmoid(x):
    # One EUP tanh instead of exp + reciprocal (perf feedback #2).
    return 0.5 * jnp.tanh(0.5 * x) + 0.5


# -----------------------------------------------------------------------------
# Kernel 1: hoisted layer-0 input projection  gx = x @ W_ih0.T + (b_ih0 + b_hh0)
# -----------------------------------------------------------------------------
def _input_proj_kernel(x_ref, w_ref, b_ref, o_ref):
    o_ref[...] = (
        jnp.dot(x_ref[...], w_ref[...], preferred_element_type=jnp.float32)
        + b_ref[...]
    )


# -----------------------------------------------------------------------------
# Kernel 2: 2-layer LSTM recurrence (+ classifier at the last grid step)
# -----------------------------------------------------------------------------
def _lstm_recurrence_kernel(gx_ref, whh0_ref, wih1_ref, whh1_ref, b1_ref,
                            wc_ref, bc_ref, logits_ref, h0, c0, h1, c1):
    g = pl.program_id(0)
    n_chunks = pl.num_programs(0)
    U = gx_ref.shape[0]          # timesteps handled by this grid step (static)
    H = h0.shape[-1]

    @pl.when(g == 0)
    def _():
        h0[...] = jnp.zeros_like(h0)
        c0[...] = jnp.zeros_like(c0)
        h1[...] = jnp.zeros_like(h1)
        c1[...] = jnp.zeros_like(c1)

    whh0 = whh0_ref[...]          # (H, 4H)  bf16
    wih1 = wih1_ref[...]          # (H, 4H)  bf16
    whh1 = whh1_ref[...]          # (H, 4H)  bf16
    b1 = b1_ref[...]              # (1, 4H)  f32, b_ih1 + b_hh1

    def step(u, carry):
        h0v, c0v, h1v, c1v = carry

        # ---- layer 1 recurrent half FIRST: depends only on the previous carry,
        # so the MXU can overlap it with layer 0's VPU/EUP work (feedback #1).
        r1 = jnp.dot(h1v.astype(jnp.bfloat16), whh1,
                     preferred_element_type=jnp.float32)

        # ---- layer 0: input projection already precomputed (includes biases).
        gates0 = gx_ref[u] + jnp.dot(
            h0v.astype(jnp.bfloat16), whh0, preferred_element_type=jnp.float32)
        i0 = _sigmoid(gates0[:, 0 * H:1 * H])
        f0 = _sigmoid(gates0[:, 1 * H:2 * H])
        g0 = jnp.tanh(gates0[:, 2 * H:3 * H])
        o0 = _sigmoid(gates0[:, 3 * H:4 * H])
        c0n = f0 * c0v + i0 * g0
        h0n = o0 * jnp.tanh(c0n)

        # ---- layer 1 input half (no concat, no fused copy).
        gates1 = (
            jnp.dot(h0n.astype(jnp.bfloat16), wih1,
                    preferred_element_type=jnp.float32)
            + r1 + b1
        )
        i1 = _sigmoid(gates1[:, 0 * H:1 * H])
        f1 = _sigmoid(gates1[:, 1 * H:2 * H])
        g1 = jnp.tanh(gates1[:, 2 * H:3 * H])
        o1 = _sigmoid(gates1[:, 3 * H:4 * H])
        c1n = f1 * c1v + i1 * g1
        h1n = o1 * jnp.tanh(c1n)
        return (h0n, c0n, h1n, c1n)

    carry = (h0[...], c0[...], h1[...], c1[...])
    # TODO(synk): if the bundle dump shows spill vst/vld at real H=512, drop U
    # to 4 (wrapper) and deepen gx buffering instead (feedback #8).
    carry = lax.fori_loop(0, U, step, carry, unroll=True)
    h0n, c0n, h1n, c1n = carry
    h0[...] = h0n
    c0[...] = c0n
    h1[...] = h1n
    c1[...] = c1n

    # Time axis is "arbitrary" (strictly sequential), so the last write wins.
    @pl.when(g == n_chunks - 1)
    def _():
        # final_hidden = h_n[-1]; Dropout(p=0.5) is identity at inference.
        logits_ref[...] = (
            jnp.dot(h1n.astype(jnp.bfloat16), wc_ref[...],
                    preferred_element_type=jnp.float32)
            + bc_ref[...]
        )


# -----------------------------------------------------------------------------
# Wrapper
# -----------------------------------------------------------------------------
@functools.partial(jax.jit, static_argnames=("num_labels",))
def lstm2layer_classifier(sequence_output, kparams, *, num_labels):
    """sequence_output: (B, T, D) f32 (bert last_hidden_state stand-in).

    Returns logits: (B, num_labels) f32.
    """
    B, T, D = sequence_output.shape
    H = kparams["whh0_t"].shape[0]
    G4 = kparams["whh0_t"].shape[1]          # 4 * H
    Lp = kparams["wc_t"].shape[1]            # padded label dim (multiple of 128)
    assert D % 128 == 0 and H % 128 == 0, "D and H must be lane-aligned (768/512 are)"

    # Sublane-pad the batch: 8 rows for tiny batches, multiple of 16 past that
    # so bf16 MXU operands are not half-packed (feedback #9).
    Bp = 8 if B <= 8 else ((B + 15) // 16) * 16
    U = next(u for u in (8, 4, 2, 1) if T % u == 0)   # timesteps per grid step
    n_chunks = T // U

    # time-major, batch-padded, bf16 for the MXU
    x_tm = jnp.transpose(sequence_output, (1, 0, 2))          # (T, B, D)
    if Bp != B:
        x_tm = jnp.pad(x_tm, ((0, 0), (0, Bp - B), (0, 0)))
    x2 = x_tm.astype(jnp.bfloat16).reshape(T * Bp, D)

    # ---- Stage 1: hoisted input projection (one big MXU-friendly matmul).
    # Row tile decoupled from the recurrence chunking (feedback #3): TM1=256
    # fills the MXU and keeps stage-1 VMEM inside v5e's default scoped limit.
    rows = T * Bp
    TM1 = min(256, rows)
    grid1 = pl.cdiv(rows, TM1)
    gx2 = pl.pallas_call(
        _input_proj_kernel,
        out_shape=jax.ShapeDtypeStruct((rows, G4), jnp.float32),
        grid_spec=pltpu.PrefetchScalarGridSpec(
            num_scalar_prefetch=0,
            grid=(grid1,),
            in_specs=[
                pl.BlockSpec((TM1, D), lambda m: (m, 0)),      # x rows (bf16)
                pl.BlockSpec((D, G4), lambda m: (0, 0)),       # W_ih0.T (bf16)
                pl.BlockSpec((1, G4), lambda m: (0, 0)),       # b_ih0 + b_hh0
            ],
            out_specs=pl.BlockSpec((TM1, G4), lambda m: (m, 0)),
        ),
        compiler_params=pltpu.CompilerParams(
            dimension_semantics=("parallel",)),
    )(x2, kparams["wih0_t"], kparams["b0"])
    gx = gx2.reshape(T, Bp, G4)

    # ---- Stage 2: sequential 2-layer recurrence, U timesteps per grid step.
    logits_p = pl.pallas_call(
        _lstm_recurrence_kernel,
        out_shape=jax.ShapeDtypeStruct((Bp, Lp), jnp.float32),
        grid_spec=pltpu.PrefetchScalarGridSpec(
            num_scalar_prefetch=0,
            grid=(n_chunks,),
            in_specs=[
                pl.BlockSpec((U, Bp, G4), lambda t: (t, 0, 0)),   # precomputed gates_x
                pl.BlockSpec((H, G4), lambda t: (0, 0)),          # W_hh0.T   (bf16)
                pl.BlockSpec((H, G4), lambda t: (0, 0)),          # W_ih1.T   (bf16)
                pl.BlockSpec((H, G4), lambda t: (0, 0)),          # W_hh1.T   (bf16)
                pl.BlockSpec((1, G4), lambda t: (0, 0)),          # b1
                pl.BlockSpec((H, Lp), lambda t: (0, 0)),          # classifier W.T
                pl.BlockSpec((1, Lp), lambda t: (0, 0)),          # classifier b
            ],
            out_specs=pl.BlockSpec((Bp, Lp), lambda t: (0, 0)),
            scratch_shapes=[
                pltpu.VMEM((Bp, H), jnp.float32),   # h0
                pltpu.VMEM((Bp, H), jnp.float32),   # c0
                pltpu.VMEM((Bp, H), jnp.float32),   # h1
                pltpu.VMEM((Bp, H), jnp.float32),   # c1
            ],
        ),
        compiler_params=pltpu.CompilerParams(
            dimension_semantics=("arbitrary",)),     # time recurrence is sequential
    )(gx, kparams["whh0_t"], kparams["wih1_t"], kparams["whh1_t"],
      kparams["b1"], kparams["wc_t"], kparams["bc"])

    return logits_p[:B, :num_labels]


# -----------------------------------------------------------------------------
# Parameters
# -----------------------------------------------------------------------------
def make_raw_params(key, input_size, hidden_size, num_labels):
    """PyTorch-layout f32 parameters, uniform(-k, k) init."""
    H, D, L = hidden_size, input_size, num_labels
    k = 1.0 / np.sqrt(H)
    keys = jax.random.split(key, 10)

    def u(k_, shape, scale):
        return jax.random.uniform(k_, shape, jnp.float32, minval=-scale, maxval=scale)

    kc = 1.0 / np.sqrt(H)
    return {
        "wih0": u(keys[0], (4 * H, D), k), "whh0": u(keys[1], (4 * H, H), k),
        "bih0": u(keys[2], (4 * H,), k), "bhh0": u(keys[3], (4 * H,), k),
        "wih1": u(keys[4], (4 * H, H), k), "whh1": u(keys[5], (4 * H, H), k),
        "bih1": u(keys[6], (4 * H,), k), "bhh1": u(keys[7], (4 * H,), k),
        "wc": u(keys[8], (L, H), kc), "bc": u(keys[9], (L,), kc),
    }


def to_kernel_params(raw, lane=128):
    """Transpose / fuse / pad / cast raw PyTorch-layout params for the kernels."""
    H = raw["whh0"].shape[1]
    L = raw["wc"].shape[0]
    Lp = ((L + lane - 1) // lane) * lane
    wc_t = jnp.zeros((H, Lp), jnp.float32).at[:, :L].set(raw["wc"].T)
    bc = jnp.zeros((1, Lp), jnp.float32).at[:, :L].set(raw["bc"][None, :])
    return {
        "wih0_t": raw["wih0"].T.astype(jnp.bfloat16),
        "b0": (raw["bih0"] + raw["bhh0"])[None, :].astype(jnp.float32),
        "whh0_t": raw["whh0"].T.astype(jnp.bfloat16),
        "wih1_t": raw["wih1"].T.astype(jnp.bfloat16),
        "whh1_t": raw["whh1"].T.astype(jnp.bfloat16),
        "b1": (raw["bih1"] + raw["bhh1"])[None, :].astype(jnp.float32),
        "wc_t": wc_t.astype(jnp.bfloat16),
        "bc": bc,
    }


# -----------------------------------------------------------------------------
# Pure-JAX reference (mimics the kernel's bf16-matmul / f32-accumulate numerics)
# -----------------------------------------------------------------------------
def reference_forward(x, raw, num_labels):
    B, T, D = x.shape
    H = raw["whh0"].shape[1]

    def dot_bf16(a, b):
        return jnp.dot(a.astype(jnp.bfloat16), b.astype(jnp.bfloat16),
                       preferred_element_type=jnp.float32)

    def cell(inp, h, c, wih, whh, bih, bhh):
        gates = dot_bf16(inp, wih.T) + dot_bf16(h, whh.T) + bih + bhh
        i = jax.nn.sigmoid(gates[:, 0 * H:1 * H])
        f = jax.nn.sigmoid(gates[:, 1 * H:2 * H])
        g = jnp.tanh(gates[:, 2 * H:3 * H])
        o = jax.nn.sigmoid(gates[:, 3 * H:4 * H])
        c = f * c + i * g
        h = o * jnp.tanh(c)
        return h, c

    h0 = c0 = h1 = c1 = jnp.zeros((B, H), jnp.float32)
    for t in range(T):
        h0, c0 = cell(x[:, t, :], h0, c0, raw["wih0"], raw["whh0"],
                      raw["bih0"], raw["bhh0"])
        h1, c1 = cell(h0, h1, c1, raw["wih1"], raw["whh1"],
                      raw["bih1"], raw["bhh1"])
    return dot_bf16(h1, raw["wc"].T) + raw["bc"]


if __name__ == "__main__":
    # Small lane-aligned stand-ins: D=256 (for 768), H=128 (for 512), L=5 labels.
    B, T, D, H, L = 2, 16, 256, 128, 5

    key = jax.random.PRNGKey(0)
    k_x, k_p = jax.random.split(key)
    # Stand-in for bert(...).last_hidden_state
    sequence_output = jax.random.normal(k_x, (B, T, D), jnp.float32)
    raw = make_raw_params(k_p, D, H, L)
    kparams = to_kernel_params(raw)

    logits = lstm2layer_classifier(sequence_output, kparams, num_labels=L)
    logits = jax.block_until_ready(logits)

    ref = reference_forward(sequence_output, raw, L)
    np.testing.assert_allclose(np.asarray(logits), np.asarray(ref),
                               rtol=2e-2, atol=2e-2)
    print("KERNEL_OK")
</pallas_src>

<mosaic_0001>
module attributes {stable_mosaic.version = 11 : i64} {
  func.func @_input_proj_kernel(%arg0: i32, %arg1: memref<128x256xbf16, #tpu.memory_space<vmem>>, %arg2: memref<256x512xbf16, #tpu.memory_space<vmem>>, %arg3: memref<1x512xf32, #tpu.memory_space<vmem>>, %arg4: memref<128x512xf32, #tpu.memory_space<vmem>>) attributes {dimension_semantics = [#tpu.dimension_semantics<parallel>], iteration_bounds = array<i64: 1>, scalar_prefetch = 0 : i64, scratch_operands = 0 : i64, tpu.core_type = #tpu.core_type<tc>, window_params = [{transform_indices = @transform_0, window_bounds = array<i64: 128, 256>}, {pipeline_mode = #tpu.pipeline_mode<synchronous>, transform_indices = @transform_1, window_bounds = array<i64: 256, 512>}, {pipeline_mode = #tpu.pipeline_mode<synchronous>, transform_indices = @transform_2, window_bounds = array<i64: 1, 512>}, {transform_indices = @transform_3, window_bounds = array<i64: 128, 512>}]} {
    %c0 = arith.constant 0 : index
    %c0_0 = arith.constant 0 : index
    %0 = vector.load %arg1[%c0, %c0_0] : memref<128x256xbf16, #tpu.memory_space<vmem>>, vector<128x256xbf16>
    %c0_1 = arith.constant 0 : index
    %c0_2 = arith.constant 0 : index
    %1 = vector.load %arg2[%c0_1, %c0_2] : memref<256x512xbf16, #tpu.memory_space<vmem>>, vector<256x512xbf16>
    %cst = arith.constant dense<0.000000e+00> : vector<128x512xf32>
    %2 = tpu.matmul %0, %1, %cst {dimension_numbers = #tpu.dot_dimension_numbers<[1], [0], [0], [1], [0, 0, 1, 1], [], []>} : vector<128x256xbf16>, vector<256x512xbf16>, vector<128x512xf32> -> vector<128x512xf32>
    %c0_3 = arith.constant 0 : index
    %c0_4 = arith.constant 0 : index
    %3 = vector.load %arg3[%c0_3, %c0_4] : memref<1x512xf32, #tpu.memory_space<vmem>>, vector<1x512xf32>
    %4 = vector.broadcast %3 : vector<1x512xf32> to vector<128x512xf32>
    %5 = arith.addf %2, %4 : vector<128x512xf32>
    %c0_5 = arith.constant 0 : index
    %c0_6 = arith.constant 0 : index
    %6 = vector.load %arg4[%c0_5, %c0_6] : memref<128x512xf32, #tpu.memory_space<vmem>>, vector<128x512xf32>
    tpu.vector_store %arg4[%c0_5, %c0_6], %5 {strides = array<i32>} : memref<128x512xf32, #tpu.memory_space<vmem>>, vector<128x512xf32>,
    return
  }
  func.func @transform_0(%arg0: i32) -> (i32, i32) {
    %c0_i32 = arith.constant 0 : i32
    %c0_i32_0 = arith.constant 0 : i32
    return %arg0, %c0_i32 : i32, i32
  }
  func.func @transform_1(%arg0: i32) -> (i32, i32) {
    %c0_i32 = arith.constant 0 : i32
    %c0_i32_0 = arith.constant 0 : i32
    %c0_i32_1 = arith.constant 0 : i32
    return %c0_i32, %c0_i32_0 : i32, i32
  }
  func.func @transform_2(%arg0: i32) -> (i32, i32) {
    %c0_i32 = arith.constant 0 : i32
    %c0_i32_0 = arith.constant 0 : i32
    %c0_i32_1 = arith.constant 0 : i32
    return %c0_i32, %c0_i32_0 : i32, i32
  }
  func.func @transform_3(%arg0: i32) -> (i32, i32) {
    %c0_i32 = arith.constant 0 : i32
    %c0_i32_0 = arith.constant 0 : i32
    return %arg0, %c0_i32 : i32, i32
  }
}

module attributes {stable_mosaic.version = 11 : i64} {
  func.func @_lstm_recurrence_kernel(%arg0: i32, %arg1: memref<8x8x512xf32, #tpu.memory_space<vmem>>, %arg2: memref<128x512xbf16, #tpu.memory_space<vmem>>, %arg3: memref<128x512xbf16, #tpu.memory_space<vmem>>, %arg4: memref<128x512xbf16, #tpu.memory_space<vmem>>, %arg5: memref<1x512xf32, #tpu.memory_space<vmem>>, %arg6: memref<128x128xbf16, #tpu.memory_space<vmem>>, %arg7: memref<1x128xf32, #tpu.memory_space<vmem>>, %arg8: memref<8x128xf32, #tpu.memory_space<vmem>>, %arg9: memref<8x128xf32, #tpu.memory_space<vmem>>, %arg10: memref<8x128xf32, #tpu.memory_space<vmem>>, %arg11: memref<8x128xf32, #tpu.memory_space<vmem>>, %arg12: memref<8x128xf32, #tpu.memory_space<vmem>>) attributes {dimension_semantics = [#tpu.dimension_semantics<arbitrary>], iteration_bounds = array<i64: 2>, scalar_prefetch = 0 : i64, scratch_operands = 4 : i64, tpu.core_type = #tpu.core_type<tc>, window_params = [{transform_indices = @transform_0, window_bounds = array<i64: 8, 8, 512>}, {pipeline_mode = #tpu.pipeline_mode<synchronous>, transform_indices = @transform_1, window_bounds = array<i64: 128, 512>}, {pipeline_mode = #tpu.pipeline_mode<synchronous>, transform_indices = @transform_2, window_bounds = array<i64: 128, 512>}, {pipeline_mode = #tpu.pipeline_mode<synchronous>, transform_indices = @transform_3, window_bounds = array<i64: 128, 512>}, {pipeline_mode = #tpu.pipeline_mode<synchronous>, transform_indices = @transform_4, window_bounds = array<i64: 1, 512>}, {pipeline_mode = #tpu.pipeline_mode<synchronous>, transform_indices = @transform_5, window_bounds = array<i64: 128, 128>}, {pipeline_mode = #tpu.pipeline_mode<synchronous>, transform_indices = @transform_6, window_bounds = array<i64: 1, 128>}, {pipeline_mode = #tpu.pipeline_mode<synchronous>, transform_indices = @transform_7, window_bounds = array<i64: 8, 128>}]} {
    %c0_i32 = arith.constant 0 : i32
    %0 = arith.cmpi eq, %arg0, %c0_i32 : i32
    %1 = arith.extui %0 : i1 to i32
    %c0_i32_0 = arith.constant 0 : i32
    %2 = arith.cmpi ne, %1, %c0_i32_0 : i32
    scf.if %2 {
      %cst_210 = arith.constant 0.000000e+00 : f32
      %618 = vector.broadcast %cst_210 : f32 to vector<8x128xf32>
      %c0_211 = arith.constant 0 : index
      %c0_212 = arith.constant 0 : index
      %619 = vector.load %arg9[%c0_211, %c0_212] : memref<8x128xf32, #tpu.memory_space<vmem>>, vector<8x128xf32>
      tpu.vector_store %arg9[%c0_211, %c0_212], %618 {strides = array<i32>} : memref<8x128xf32, #tpu.memory_space<vmem>>, vector<8x128xf32>,
      %cst_213 = arith.constant 0.000000e+00 : f32
      %620 = vector.broadcast %cst_213 : f32 to vector<8x128xf32>
      %c0_214 = arith.constant 0 : index
      %c0_215 = arith.constant 0 : index
      %621 = vector.load %arg10[%c0_214, %c0_215] : memref<8x128xf32, #tpu.memory_space<vmem>>, vector<8x128xf32>
      tpu.vector_store %arg10[%c0_214, %c0_215], %620 {strides = array<i32>} : memref<8x128xf32, #tpu.memory_space<vmem>>, vector<8x128xf32>,
      %cst_216 = arith.constant 0.000000e+00 : f32
      %622 = vector.broadcast %cst_216 : f32 to vector<8x128xf32>
      %c0_217 = arith.constant 0 : index
      %c0_218 = arith.constant 0 : index
      %623 = vector.load %arg11[%c0_217, %c0_218] : memref<8x128xf32, #tpu.memory_space<vmem>>, vector<8x128xf32>
      tpu.vector_store %arg11[%c0_217, %c0_218], %622 {strides = array<i32>} : memref<8x128xf32, #tpu.memory_space<vmem>>, vector<8x128xf32>,
      %cst_219 = arith.constant 0.000000e+00 : f32
      %624 = vector.broadcast %cst_219 : f32 to vector<8x128xf32>
      %c0_220 = arith.constant 0 : index
      %c0_221 = arith.constant 0 : index
      %625 = vector.load %arg12[%c0_220, %c0_221] : memref<8x128xf32, #tpu.memory_space<vmem>>, vector<8x128xf32>
      tpu.vector_store %arg12[%c0_220, %c0_221], %624 {strides = array<i32>} : memref<8x128xf32, #tpu.memory_space<vmem>>, vector<8x128xf32>,
    } else {
    }
    %c0 = arith.constant 0 : index
    %c0_1 = arith.constant 0 : index
    %3 = vector.load %arg2[%c0, %c0_1] : memref<128x512xbf16, #tpu.memory_space<vmem>>, vector<128x512xbf16>
    %c0_2 = arith.constant 0 : index
    %c0_3 = arith.constant 0 : index
    %4 = vector.load %arg3[%c0_2, %c0_3] : memref<128x512xbf16, #tpu.memory_space<vmem>>, vector<128x512xbf16>
    %c0_4 = arith.constant 0 : index
    %c0_5 = arith.constant 0 : index
    %5 = vector.load %arg4[%c0_4, %c0_5] : memref<128x512xbf16, #tpu.memory_space<vmem>>, vector<128x512xbf16>
    %c0_6 = arith.constant 0 : index
    %c0_7 = arith.constant 0 : index
    %6 = vector.load %arg5[%c0_6, %c0_7] : memref<1x512xf32, #tpu.memory_space<vmem>>, vector<1x512xf32>
    %c0_8 = arith.constant 0 : index
    %c0_9 = arith.constant 0 : index
    %7 = vector.load %arg9[%c0_8, %c0_9] : memref<8x128xf32, #tpu.memory_space<vmem>>, vector<8x128xf32>
    %c0_10 = arith.constant 0 : index
    %c0_11 = arith.constant 0 : index
    %8 = vector.load %arg10[%c0_10, %c0_11] : memref<8x128xf32, #tpu.memory_space<vmem>>, vector<8x128xf32>
    %c0_12 = arith.constant 0 : index
    %c0_13 = arith.constant 0 : index
    %9 = vector.load %arg11[%c0_12, %c0_13] : memref<8x128xf32, #tpu.memory_space<vmem>>, vector<8x128xf32>
    %c0_14 = arith.constant 0 : index
    %c0_15 = arith.constant 0 : index
    %10 = vector.load %arg12[%c0_14, %c0_15] : memref<8x128xf32, #tpu.memory_space<vmem>>, vector<8x128xf32>
    %c0_i32_16 = arith.constant 0 : i32
    %11 = arith.truncf %9 : vector<8x128xf32> to vector<8x128xbf16>
    %cst = arith.constant dense<0.000000e+00> : vector<8x512xf32>
    %12 = tpu.matmul %11, %5, %cst {dimension_numbers = #tpu.dot_dimension_numbers<[1], [0], [0], [1], [0, 0, 1, 1], [], []>} : vector<8x128xbf16>, vector<128x512xbf16>, vector<8x512xf32> -> vector<8x512xf32>
    %13 = arith.index_cast %c0_i32_16 : i32 to index
    %c0_17 = arith.constant 0 : index
    %c0_18 = arith.constant 0 : index
    %14 = vector.load %arg1[%13, %c0_17, %c0_18] : memref<8x8x512xf32, #tpu.memory_space<vmem>>, vector<1x8x512xf32>
    %15 = vector.shape_cast %14 : vector<1x8x512xf32> to vector<8x512xf32>
    %16 = arith.truncf %7 : vector<8x128xf32> to vector<8x128xbf16>
    %cst_19 = arith.constant dense<0.000000e+00> : vector<8x512xf32>
    %17 = tpu.matmul %16, %3, %cst_19 {dimension_numbers = #tpu.dot_dimension_numbers<[1], [0], [0], [1], [0, 0, 1, 1], [], []>} : vector<8x128xbf16>, vector<128x512xbf16>, vector<8x512xf32> -> vector<8x512xf32>
    %18 = arith.addf %15, %17 : vector<8x512xf32>
    %19 = vector.extract_strided_slice %18 {offsets = [0, 0], sizes = [8, 128], strides = [1, 1]} : vector<8x512xf32> to vector<8x128xf32>
    %cst_20 = arith.constant 5.000000e-01 : f32
    %20 = vector.broadcast %cst_20 : f32 to vector<8x128xf32>
    %21 = arith.mulf %20, %19 : vector<8x128xf32>
    %22 = math.tanh %21 : vector<8x128xf32>
    %cst_21 = arith.constant 5.000000e-01 : f32
    %23 = vector.broadcast %cst_21 : f32 to vector<8x128xf32>
    %24 = arith.mulf %23, %22 : vector<8x128xf32>
    %cst_22 = arith.constant 5.000000e-01 : f32
    %25 = vector.broadcast %cst_22 : f32 to vector<8x128xf32>
    %26 = arith.addf %24, %25 : vector<8x128xf32>
    %27 = vector.extract_strided_slice %18 {offsets = [0, 128], sizes = [8, 128], strides = [1, 1]} : vector<8x512xf32> to vector<8x128xf32>
    %cst_23 = arith.constant 5.000000e-01 : f32
    %28 = vector.broadcast %cst_23 : f32 to vector<8x128xf32>
    %29 = arith.mulf %28, %27 : vector<8x128xf32>
    %30 = math.tanh %29 : vector<8x128xf32>
    %cst_24 = arith.constant 5.000000e-01 : f32
    %31 = vector.broadcast %cst_24 : f32 to vector<8x128xf32>
    %32 = arith.mulf %31, %30 : vector<8x128xf32>
    %cst_25 = arith.constant 5.000000e-01 : f32
    %33 = vector.broadcast %cst_25 : f32 to vector<8x128xf32>
    %34 = arith.addf %32, %33 : vector<8x128xf32>
    %35 = vector.extract_strided_slice %18 {offsets = [0, 256], sizes = [8, 128], strides = [1, 1]} : vector<8x512xf32> to vector<8x128xf32>
    %36 = math.tanh %35 : vector<8x128xf32>
    %37 = vector.extract_strided_slice %18 {offsets = [0, 384], sizes = [8, 128], strides = [1, 1]} : vector<8x512xf32> to vector<8x128xf32>
    %cst_26 = arith.constant 5.000000e-01 : f32
    %38 = vector.broadcast %cst_26 : f32 to vector<8x128xf32>
    %39 = arith.mulf %38, %37 : vector<8x128xf32>
    %40 = math.tanh %39 : vector<8x128xf32>
    %cst_27 = arith.constant 5.000000e-01 : f32
    %41 = vector.broadcast %cst_27 : f32 to vector<8x128xf32>
    %42 = arith.mulf %41, %40 : vector<8x128xf32>
    %cst_28 = arith.constant 5.000000e-01 : f32
    %43 = vector.broadcast %cst_28 : f32 to vector<8x128xf32>
    %44 = arith.addf %42, %43 : vector<8x128xf32>
    %45 = arith.mulf %34, %8 : vector<8x128xf32>
    %46 = arith.mulf %26, %36 : vector<8x128xf32>
    %47 = arith.addf %45, %46 : vector<8x128xf32>
    %48 = math.tanh %47 : vector<8x128xf32>
    %49 = arith.mulf %44, %48 : vector<8x128xf32>
    %50 = arith.truncf %49 : vector<8x128xf32> to vector<8x128xbf16>
    %cst_29 = arith.constant dense<0.000000e+00> : vector<8x512xf32>
    %51 = tpu.matmul %50, %4, %cst_29 {dimension_numbers = #tpu.dot_dimension_numbers<[1], [0], [0], [1], [0, 0, 1, 1], [], []>} : vector<8x128xbf16>, vector<128x512xbf16>, vector<8x512xf32> -> vector<8x512xf32>
    %52 = arith.addf %51, %12 : vector<8x512xf32>
    %53 = vector.broadcast %6 : vector<1x512xf32> to vector<8x512xf32>
    %54 = arith.addf %52, %53 : vector<8x512xf32>
    %55 = vector.extract_strided_slice %54 {offsets = [0, 0], sizes = [8, 128], strides = [1, 1]} : vector<8x512xf32> to vector<8x128xf32>
    %cst_30 = arith.constant 5.000000e-01 : f32
    %56 = vector.broadcast %cst_30 : f32 to vector<8x128xf32>
    %57 = arith.mulf %56, %55 : vector<8x128xf32>
    %58 = math.tanh %57 : vector<8x128xf32>
    %cst_31 = arith.constant 5.000000e-01 : f32
    %59 = vector.broadcast %cst_31 : f32 to vector<8x128xf32>
    %60 = arith.mulf %59, %58 : vector<8x128xf32>
    %cst_32 = arith.constant 5.000000e-01 : f32
    %61 = vector.broadcast %cst_32 : f32 to vector<8x128xf32>
    %62 = arith.addf %60, %61 : vector<8x128xf32>
    %63 = vector.extract_strided_slice %54 {offsets = [0, 128], sizes = [8, 128], strides = [1, 1]} : vector<8x512xf32> to vector<8x128xf32>
    %cst_33 = arith.constant 5.000000e-01 : f32
    %64 = vector.broadcast %cst_33 : f32 to vector<8x128xf32>
    %65 = arith.mulf %64, %63 : vector<8x128xf32>
    %66 = math.tanh %65 : vector<8x128xf32>
    %cst_34 = arith.constant 5.000000e-01 : f32
    %67 = vector.broadcast %cst_34 : f32 to vector<8x128xf32>
    %68 = arith.mulf %67, %66 : vector<8x128xf32>
    %cst_35 = arith.constant 5.000000e-01 : f32
    %69 = vector.broadcast %cst_35 : f32 to vector<8x128xf32>
    %70 = arith.addf %68, %69 : vector<8x128xf32>
    %71 = vector.extract_strided_slice %54 {offsets = [0, 256], sizes = [8, 128], strides = [1, 1]} : vector<8x512xf32> to vector<8x128xf32>
    %72 = math.tanh %71 : vector<8x128xf32>
    %73 = vector.extract_strided_slice %54 {offsets = [0, 384], sizes = [8, 128], strides = [1, 1]} : vector<8x512xf32> to vector<8x128xf32>
    %cst_36 = arith.constant 5.000000e-01 : f32
    %74 = vector.broadcast %cst_36 : f32 to vector<8x128xf32>
    %75 = arith.mulf %74, %73 : vector<8x128xf32>
    %76 = math.tanh %75 : vector<8x128xf32>
    %cst_37 = arith.constant 5.000000e-01 : f32
    %77 = vector.broadcast %cst_37 : f32 to vector<8x128xf32>
    %78 = arith.mulf %77, %76 : vector<8x128xf32>
    %cst_38 = arith.constant 5.000000e-01 : f32
    %79 = vector.broadcast %cst_38 : f32 to vector<8x128xf32>
    %80 = arith.addf %78, %79 : vector<8x128xf32>
    %81 = arith.mulf %70, %10 : vector<8x128xf32>
    %82 = arith.mulf %62, %72 : vector<8x128xf32>
    %83 = arith.addf %81, %82 : vector<8x128xf32>
    %84 = math.tanh %83 : vector<8x128xf32>
    %85 = arith.mulf %80, %84 : vector<8x128xf32>
    %c1_i32 = arith.constant 1 : i32
    %86 = arith.truncf %85 : vector<8x128xf32> to vector<8x128xbf16>
    %cst_39 = arith.constant dense<0.000000e+00> : vector<8x512xf32>
    %87 = tpu.matmul %86, %5, %cst_39 {dimension_numbers = #tpu.dot_dimension_numbers<[1], [0], [0], [1], [0, 0, 1, 1], [], []>} : vector<8x128xbf16>, vector<128x512xbf16>, vector<8x512xf32> -> vector<8x512xf32>
    %88 = arith.index_cast %c1_i32 : i32 to index
    %c0_40 = arith.constant 0 : index
    %c0_41 = arith.constant 0 : index
    %89 = vector.load %arg1[%88, %c0_40, %c0_41] : memref<8x8x512xf32, #tpu.memory_space<vmem>>, vector<1x8x512xf32>
    %90 = vector.shape_cast %89 : vector<1x8x512xf32> to vector<8x512xf32>
    %91 = arith.truncf %49 : vector<8x128xf32> to vector<8x128xbf16>
    %cst_42 = arith.constant dense<0.000000e+00> : vector<8x512xf32>
    %92 = tpu.matmul %91, %3, %cst_42 {dimension_numbers = #tpu.dot_dimension_numbers<[1], [0], [0], [1], [0, 0, 1, 1], [], []>} : vector<8x128xbf16>, vector<128x512xbf16>, vector<8x512xf32> -> vector<8x512xf32>
    %93 = arith.addf %90, %92 : vector<8x512xf32>
    %94 = vector.extract_strided_slice %93 {offsets = [0, 0], sizes = [8, 128], strides = [1, 1]} : vector<8x512xf32> to vector<8x128xf32>
    %cst_43 = arith.constant 5.000000e-01 : f32
    %95 = vector.broadcast %cst_43 : f32 to vector<8x128xf32>
    %96 = arith.mulf %95, %94 : vector<8x128xf32>
    %97 = math.tanh %96 : vector<8x128xf32>
    %cst_44 = arith.constant 5.000000e-01 : f32
    %98 = vector.broadcast %cst_44 : f32 to vector<8x128xf32>
    %99 = arith.mulf %98, %97 : vector<8x128xf32>
    %cst_45 = arith.constant 5.000000e-01 : f32
    %100 = vector.broadcast %cst_45 : f32 to vector<8x128xf32>
    %101 = arith.addf %99, %100 : vector<8x128xf32>
    %102 = vector.extract_strided_slice %93 {offsets = [0, 128], sizes = [8, 128], strides = [1, 1]} : vector<8x512xf32> to vector<8x128xf32>
    %cst_46 = arith.constant 5.000000e-01 : f32
    %103 = vector.broadcast %cst_46 : f32 to vector<8x128xf32>
    %104 = arith.mulf %103, %102 : vector<8x128xf32>
    %105 = math.tanh %104 : vector<8x128xf32>
    %cst_47 = arith.constant 5.000000e-01 : f32
    %106 = vector.broadcast %cst_47 : f32 to vector<8x128xf32>
    %107 = arith.mulf %106, %105 : vector<8x128xf32>
    %cst_48 = arith.constant 5.000000e-01 : f32
    %108 = vector.broadcast %cst_48 : f32 to vector<8x128xf32>
    %109 = arith.addf %107, %108 : vector<8x128xf32>
    %110 = vector.extract_strided_slice %93 {offsets = [0, 256], sizes = [8, 128], strides = [1, 1]} : vector<8x512xf32> to vector<8x128xf32>
    %111 = math.tanh %110 : vector<8x128xf32>
    %112 = vector.extract_strided_slice %93 {offsets = [0, 384], sizes = [8, 128], strides = [1, 1]} : vector<8x512xf32> to vector<8x128xf32>
    %cst_49 = arith.constant 5.000000e-01 : f32
    %113 = vector.broadcast %cst_49 : f32 to vector<8x128xf32>
    %114 = arith.mulf %113, %112 : vector<8x128xf32>
    %115 = math.tanh %114 : vector<8x128xf32>
    %cst_50 = arith.constant 5.000000e-01 : f32
    %116 = vector.broadcast %cst_50 : f32 to vector<8x128xf32>
    %117 = arith.mulf %116, %115 : vector<8x128xf32>
    %cst_51 = arith.constant 5.000000e-01 : f32
    %118 = vector.broadcast %cst_51 : f32 to vector<8x128xf32>
    %119 = arith.addf %117, %118 : vector<8x128xf32>
    %120 = arith.mulf %109, %47 : vector<8x128xf32>
    %121 = arith.mulf %101, %111 : vector<8x128xf32>
    %122 = arith.addf %120, %121 : vector<8x128xf32>
    %123 = math.tanh %122 : vector<8x128xf32>
    %124 = arith.mulf %119, %123 : vector<8x128xf32>
    %125 = arith.truncf %124 : vector<8x128xf32> to vector<8x128xbf16>
    %cst_52 = arith.constant dense<0.000000e+00> : vector<8x512xf32>
    %126 = tpu.matmul %125, %4, %cst_52 {dimension_numbers = #tpu.dot_dimension_numbers<[1], [0], [0], [1], [0, 0, 1, 1], [], []>} : vector<8x128xbf16>, vector<128x512xbf16>, vector<8x512xf32> -> vector<8x512xf32>
    %127 = arith.addf %126, %87 : vector<8x512xf32>
    %128 = vector.broadcast %6 : vector<1x512xf32> to vector<8x512xf32>
    %129 = arith.addf %127, %128 : vector<8x512xf32>
    %130 = vector.extract_strided_slice %129 {offsets = [0, 0], sizes = [8, 128], strides = [1, 1]} : vector<8x512xf32> to vector<8x128xf32>
    %cst_53 = arith.constant 5.000000e-01 : f32
    %131 = vector.broadcast %cst_53 : f32 to vector<8x128xf32>
    %132 = arith.mulf %131, %130 : vector<8x128xf32>
    %133 = math.tanh %132 : vector<8x128xf32>
    %cst_54 = arith.constant 5.000000e-01 : f32
    %134 = vector.broadcast %cst_54 : f32 to vector<8x128xf32>
    %135 = arith.mulf %134, %133 : vector<8x128xf32>
    %cst_55 = arith.constant 5.000000e-01 : f32
    %136 = vector.broadcast %cst_55 : f32 to vector<8x128xf32>
    %137 = arith.addf %135, %136 : vector<8x128xf32>
    %138 = vector.extract_strided_slice %129 {offsets = [0, 128], sizes = [8, 128], strides = [1, 1]} : vector<8x512xf32> to vector<8x128xf32>
    %cst_56 = arith.constant 5.000000e-01 : f32
    %139 = vector.broadcast %cst_56 : f32 to vector<8x128xf32>
    %140 = arith.mulf %139, %138 : vector<8x128xf32>
    %141 = math.tanh %140 : vector<8x128xf32>
    %cst_57 = arith.constant 5.000000e-01 : f32
    %142 = vector.broadcast %cst_57 : f32 to vector<8x128xf32>
    %143 = arith.mulf %142, %141 : vector<8x128xf32>
    %cst_58 = arith.constant 5.000000e-01 : f32
    %144 = vector.broadcast %cst_58 : f32 to vector<8x128xf32>
    %145 = arith.addf %143, %144 : vector<8x128xf32>
    %146 = vector.extract_strided_slice %129 {offsets = [0, 256], sizes = [8, 128], strides = [1, 1]} : vector<8x512xf32> to vector<8x128xf32>
    %147 = math.tanh %146 : vector<8x128xf32>
    %148 = vector.extract_strided_slice %129 {offsets = [0, 384], sizes = [8, 128], strides = [1, 1]} : vector<8x512xf32> to vector<8x128xf32>
    %cst_59 = arith.constant 5.000000e-01 : f32
    %149 = vector.broadcast %cst_59 : f32 to vector<8x128xf32>
    %150 = arith.mulf %149, %148 : vector<8x128xf32>
    %151 = math.tanh %150 : vector<8x128xf32>
    %cst_60 = arith.constant 5.000000e-01 : f32
    %152 = vector.broadcast %cst_60 : f32 to vector<8x128xf32>
    %153 = arith.mulf %152, %151 : vector<8x128xf32>
    %cst_61 = arith.constant 5.000000e-01 : f32
    %154 = vector.broadcast %cst_61 : f32 to vector<8x128xf32>
    %155 = arith.addf %153, %154 : vector<8x128xf32>
    %156 = arith.mulf %145, %83 : vector<8x128xf32>
    %157 = arith.mulf %137, %147 : vector<8x128xf32>
    %158 = arith.addf %156, %157 : vector<8x128xf32>
    %159 = math.tanh %158 : vector<8x128xf32>
    %160 = arith.mulf %155, %159 : vector<8x128xf32>
    %c2_i32 = arith.constant 2 : i32
    %161 = arith.truncf %160 : vector<8x128xf32> to vector<8x128xbf16>
    %cst_62 = arith.constant dense<0.000000e+00> : vector<8x512xf32>
    %162 = tpu.matmul %161, %5, %cst_62 {dimension_numbers = #tpu.dot_dimension_numbers<[1], [0], [0], [1], [0, 0, 1, 1], [], []>} : vector<8x128xbf16>, vector<128x512xbf16>, vector<8x512xf32> -> vector<8x512xf32>
    %163 = arith.index_cast %c2_i32 : i32 to index
    %c0_63 = arith.constant 0 : index
    %c0_64 = arith.constant 0 : index
    %164 = vector.load %arg1[%163, %c0_63, %c0_64] : memref<8x8x512xf32, #tpu.memory_space<vmem>>, vector<1x8x512xf32>
    %165 = vector.shape_cast %164 : vector<1x8x512xf32> to vector<8x512xf32>
    %166 = arith.truncf %124 : vector<8x128xf32> to vector<8x128xbf16>
    %cst_65 = arith.constant dense<0.000000e+00> : vector<8x512xf32>
    %167 = tpu.matmul %166, %3, %cst_65 {dimension_numbers = #tpu.dot_dimension_numbers<[1], [0], [0], [1], [0, 0, 1, 1], [], []>} : vector<8x128xbf16>, vector<128x512xbf16>, vector<8x512xf32> -> vector<8x512xf32>
    %168 = arith.addf %165, %167 : vector<8x512xf32>
    %169 = vector.extract_strided_slice %168 {offsets = [0, 0], sizes = [8, 128], strides = [1, 1]} : vector<8x512xf32> to vector<8x128xf32>
    %cst_66 = arith.constant 5.000000e-01 : f32
    %170 = vector.broadcast %cst_66 : f32 to vector<8x128xf32>
    %171 = arith.mulf %170, %169 : vector<8x128xf32>
    %172 = math.tanh %171 : vector<8x128xf32>
    %cst_67 = arith.constant 5.000000e-01 : f32
    %173 = vector.broadcast %cst_67 : f32 to vector<8x128xf32>
    %174 = arith.mulf %173, %172 : vector<8x128xf32>
    %cst_68 = arith.constant 5.000000e-01 : f32
    %175 = vector.broadcast %cst_68 : f32 to vector<8x128xf32>
    %176 = arith.addf %174, %175 : vector<8x128xf32>
    %177 = vector.extract_strided_slice %168 {offsets = [0, 128], sizes = [8, 128], strides = [1, 1]} : vector<8x512xf32> to vector<8x128xf32>
    %cst_69 = arith.constant 5.000000e-01 : f32
    %178 = vector.broadcast %cst_69 : f32 to vector<8x128xf32>
    %179 = arith.mulf %178, %177 : vector<8x128xf32>
    %180 = math.tanh %179 : vector<8x128xf32>
    %cst_70 = arith.constant 5.000000e-01 : f32
    %181 = vector.broadcast %cst_70 : f32 to vector<8x128xf32>
    %182 = arith.mulf %181, %180 : vector<8x128xf32>
    %cst_71 = arith.constant 5.000000e-01 : f32
    %183 = vector.broadcast %cst_71 : f32 to vector<8x128xf32>
    %184 = arith.addf %182, %183 : vector<8x128xf32>
    %185 = vector.extract_strided_slice %168 {offsets = [0, 256], sizes = [8, 128], strides = [1, 1]} : vector<8x512xf32> to vector<8x128xf32>
    %186 = math.tanh %185 : vector<8x128xf32>
    %187 = vector.extract_strided_slice %168 {offsets = [0, 384], sizes = [8, 128], strides = [1, 1]} : vector<8x512xf32> to vector<8x128xf32>
    %cst_72 = arith.constant 5.000000e-01 : f32
    %188 = vector.broadcast %cst_72 : f32 to vector<8x128xf32>
    %189 = arith.mulf %188, %187 : vector<8x128xf32>
    %190 = math.tanh %189 : vector<8x128xf32>
    %cst_73 = arith.constant 5.000000e-01 : f32
    %191 = vector.broadcast %cst_73 : f32 to vector<8x128xf32>
    %192 = arith.mulf %191, %190 : vector<8x128xf32>
    %cst_74 = arith.constant 5.000000e-01 : f32
    %193 = vector.broadcast %cst_74 : f32 to vector<8x128xf32>
    %194 = arith.addf %192, %193 : vector<8x128xf32>
    %195 = arith.mulf %184, %122 : vector<8x128xf32>
    %196 = arith.mulf %176, %186 : vector<8x128xf32>
    %197 = arith.addf %195, %196 : vector<8x128xf32>
    %198 = math.tanh %197 : vector<8x128xf32>
    %199 = arith.mulf %194, %198 : vector<8x128xf32>
    %200 = arith.truncf %199 : vector<8x128xf32> to vector<8x128xbf16>
    %cst_75 = arith.constant dense<0.000000e+00> : vector<8x512xf32>
    %201 = tpu.matmul %200, %4, %cst_75 {dimension_numbers = #tpu.dot_dimension_numbers<[1], [0], [0], [1], [0, 0, 1, 1], [], []>} : vector<8x128xbf16>, vector<128x512xbf16>, vector<8x512xf32> -> vector<8x512xf32>
    %202 = arith.addf %201, %162 : vector<8x512xf32>
    %203 = vector.broadcast %6 : vector<1x512xf32> to vector<8x512xf32>
    %204 = arith.addf %202, %203 : vector<8x512xf32>
    %205 = vector.extract_strided_slice %204 {offsets = [0, 0], sizes = [8, 128], strides = [1, 1]} : vector<8x512xf32> to vector<8x128xf32>
    %cst_76 = arith.constant 5.000000e-01 : f32
    %206 = vector.broadcast %cst_76 : f32 to vector<8x128xf32>
    %207 = arith.mulf %206, %205 : vector<8x128xf32>
    %208 = math.tanh %207 : vector<8x128xf32>
    %cst_77 = arith.constant 5.000000e-01 : f32
    %209 = vector.broadcast %cst_77 : f32 to vector<8x128xf32>
    %210 = arith.mulf %209, %208 : vector<8x128xf32>
    %cst_78 = arith.constant 5.000000e-01 : f32
    %211 = vector.broadcast %cst_78 : f32 to vector<8x128xf32>
    %212 = arith.addf %210, %211 : vector<8x128xf32>
    %213 = vector.extract_strided_slice %204 {offsets = [0, 128], sizes = [8, 128], strides = [1, 1]} : vector<8x512xf32> to vector<8x128xf32>
    %cst_79 = arith.constant 5.000000e-01 : f32
    %214 = vector.broadcast %cst_79 : f32 to vector<8x128xf32>
    %215 = arith.mulf %214, %213 : vector<8x128xf32>
    %216 = math.tanh %215 : vector<8x128xf32>
    %cst_80 = arith.constant 5.000000e-01 : f32
    %217 = vector.broadcast %cst_80 : f32 to vector<8x128xf32>
    %218 = arith.mulf %217, %216 : vector<8x128xf32>
    %cst_81 = arith.constant 5.000000e-01 : f32
    %219 = vector.broadcast %cst_81 : f32 to vector<8x128xf32>
    %220 = arith.addf %218, %219 : vector<8x128xf32>
    %221 = vector.extract_strided_slice %204 {offsets = [0, 256], sizes = [8, 128], strides = [1, 1]} : vector<8x512xf32> to vector<8x128xf32>
    %222 = math.tanh %221 : vector<8x128xf32>
    %223 = vector.extract_strided_slice %204 {offsets = [0, 384], sizes = [8, 128], strides = [1, 1]} : vector<8x512xf32> to vector<8x128xf32>
    %cst_82 = arith.constant 5.000000e-01 : f32
    %224 = vector.broadcast %cst_82 : f32 to vector<8x128xf32>
    %225 = arith.mulf %224, %223 : vector<8x128xf32>
    %226 = math.tanh %225 : vector<8x128xf32>
    %cst_83 = arith.constant 5.000000e-01 : f32
    %227 = vector.broadcast %cst_83 : f32 to vector<8x128xf32>
    %228 = arith.mulf %227, %226 : vector<8x128xf32>
    %cst_84 = arith.constant 5.000000e-01 : f32
    %229 = vector.broadcast %cst_84 : f32 to vector<8x128xf32>
    %230 = arith.addf %228, %229 : vector<8x128xf32>
    %231 = arith.mulf %220, %158 : vector<8x128xf32>
    %232 = arith.mulf %212, %222 : vector<8x128xf32>
    %233 = arith.addf %231, %232 : vector<8x128xf32>
    %234 = math.tanh %233 : vector<8x128xf32>
    %235 = arith.mulf %230, %234 : vector<8x128xf32>
    %c3_i32 = arith.constant 3 : i32
    %236 = arith.truncf %235 : vector<8x128xf32> to vector<8x128xbf16>
    %cst_85 = arith.constant dense<0.000000e+00> : vector<8x512xf32>
    %237 = tpu.matmul %236, %5, %cst_85 {dimension_numbers = #tpu.dot_dimension_numbers<[1], [0], [0], [1], [0, 0, 1, 1], [], []>} : vector<8x128xbf16>, vector<128x512xbf16>, vector<8x512xf32> -> vector<8x512xf32>
    %238 = arith.index_cast %c3_i32 : i32 to index
    %c0_86 = arith.constant 0 : index
    %c0_87 = arith.constant 0 : index
    %239 = vector.load %arg1[%238, %c0_86, %c0_87] : memref<8x8x512xf32, #tpu.memory_space<vmem>>, vector<1x8x512xf32>
    %240 = vector.shape_cast %239 : vector<1x8x512xf32> to vector<8x512xf32>
    %241 = arith.truncf %199 : vector<8x128xf32> to vector<8x128xbf16>
    %cst_88 = arith.constant dense<0.000000e+00> : vector<8x512xf32>
    %242 = tpu.matmul %241, %3, %cst_88 {dimension_numbers = #tpu.dot_dimension_numbers<[1], [0], [0], [1], [0, 0, 1, 1], [], []>} : vector<8x128xbf16>, vector<128x512xbf16>, vector<8x512xf32> -> vector<8x512xf32>
    %243 = arith.addf %240, %242 : vector<8x512xf32>
    %244 = vector.extract_strided_slice %243 {offsets = [0, 0], sizes = [8, 128], strides = [1, 1]} : vector<8x512xf32> to vector<8x128xf32>
    %cst_89 = arith.constant 5.000000e-01 : f32
    %245 = vector.broadcast %cst_89 : f32 to vector<8x128xf32>
    %246 = arith.mulf %245, %244 : vector<8x128xf32>
    %247 = math.tanh %246 : vector<8x128xf32>
    %cst_90 = arith.constant 5.000000e-01 : f32
    %248 = vector.broadcast %cst_90 : f32 to vector<8x128xf32>
    %249 = arith.mulf %248, %247 : vector<8x128xf32>
    %cst_91 = arith.constant 5.000000e-01 : f32
    %250 = vector.broadcast %cst_91 : f32 to vector<8x128xf32>
    %251 = arith.addf %249, %250 : vector<8x128xf32>
    %252 = vector.extract_strided_slice %243 {offsets = [0, 128], sizes = [8, 128], strides = [1, 1]} : vector<8x512xf32> to vector<8x128xf32>
    %cst_92 = arith.constant 5.000000e-01 : f32
    %253 = vector.broadcast %cst_92 : f32 to vector<8x128xf32>
    %254 = arith.mulf %253, %252 : vector<8x128xf32>
    %255 = math.tanh %254 : vector<8x128xf32>
    %cst_93 = arith.constant 5.000000e-01 : f32
    %256 = vector.broadcast %cst_93 : f32 to vector<8x128xf32>
    %257 = arith.mulf %256, %255 : vector<8x128xf32>
    %cst_94 = arith.constant 5.000000e-01 : f32
    %258 = vector.broadcast %cst_94 : f32 to vector<8x128xf32>
    %259 = arith.addf %257, %258 : vector<8x128xf32>
    %260 = vector.extract_strided_slice %243 {offsets = [0, 256], sizes = [8, 128], strides = [1, 1]} : vector<8x512xf32> to vector<8x128xf32>
    %261 = math.tanh %260 : vector<8x128xf32>
    %262 = vector.extract_strided_slice %243 {offsets = [0, 384], sizes = [8, 128], strides = [1, 1]} : vector<8x512xf32> to vector<8x128xf32>
    %cst_95 = arith.constant 5.000000e-01 : f32
    %263 = vector.broadcast %cst_95 : f32 to vector<8x128xf32>
    %264 = arith.mulf %263, %262 : vector<8x128xf32>
    %265 = math.tanh %264 : vector<8x128xf32>
    %cst_96 = arith.constant 5.000000e-01 : f32
    %266 = vector.broadcast %cst_96 : f32 to vector<8x128xf32>
    %267 = arith.mulf %266, %265 : vector<8x128xf32>
    %cst_97 = arith.constant 5.000000e-01 : f32
    %268 = vector.broadcast %cst_97 : f32 to vector<8x128xf32>
    %269 = arith.addf %267, %268 : vector<8x128xf32>
    %270 = arith.mulf %259, %197 : vector<8x128xf32>
    %271 = arith.mulf %251, %261 : vector<8x128xf32>
    %272 = arith.addf %270, %271 : vector<8x128xf32>
    %273 = math.tanh %272 : vector<8x128xf32>
    %274 = arith.mulf %269, %273 : vector<8x128xf32>
    %275 = arith.truncf %274 : vector<8x128xf32> to vector<8x128xbf16>
    %cst_98 = arith.constant dense<0.000000e+00> : vector<8x512xf32>
    %276 = tpu.matmul %275, %4, %cst_98 {dimension_numbers = #tpu.dot_dimension_numbers<[1], [0], [0], [1], [0, 0, 1, 1], [], []>} : vector<8x128xbf16>, vector<128x512xbf16>, vector<8x512xf32> -> vector<8x512xf32>
    %277 = arith.addf %276, %237 : vector<8x512xf32>
    %278 = vector.broadcast %6 : vector<1x512xf32> to vector<8x512xf32>
    %279 = arith.addf %277, %278 : vector<8x512xf32>
    %280 = vector.extract_strided_slice %279 {offsets = [0, 0], sizes = [8, 128], strides = [1, 1]} : vector<8x512xf32> to vector<8x128xf32>
    %cst_99 = arith.constant 5.000000e-01 : f32
    %281 = vector.broadcast %cst_99 : f32 to vector<8x128xf32>
    %282 = arith.mulf %281, %280 : vector<8x128xf32>
    %283 = math.tanh %282 : vector<8x128xf32>
    %cst_100 = arith.constant 5.000000e-01 : f32
    %284 = vector.broadcast %cst_100 : f32 to vector<8x128xf32>
    %285 = arith.mulf %284, %283 : vector<8x128xf32>
    %cst_101 = arith.constant 5.000000e-01 : f32
    %286 = vector.broadcast %cst_101 : f32 to vector<8x128xf32>
    %287 = arith.addf %285, %286 : vector<8x128xf32>
    %288 = vector.extract_strided_slice %279 {offsets = [0, 128], sizes = [8, 128], strides = [1, 1]} : vector<8x512xf32> to vector<8x128xf32>
    %cst_102 = arith.constant 5.000000e-01 : f32
    %289 = vector.broadcast %cst_102 : f32 to vector<8x128xf32>
    %290 = arith.mulf %289, %288 : vector<8x128xf32>
    %291 = math.tanh %290 : vector<8x128xf32>
    %cst_103 = arith.constant 5.000000e-01 : f32
    %292 = vector.broadcast %cst_103 : f32 to vector<8x128xf32>
    %293 = arith.mulf %292, %291 : vector<8x128xf32>
    %cst_104 = arith.constant 5.000000e-01 : f32
    %294 = vector.broadcast %cst_104 : f32 to vector<8x128xf32>
    %295 = arith.addf %293, %294 : vector<8x128xf32>
    %296 = vector.extract_strided_slice %279 {offsets = [0, 256], sizes = [8, 128], strides = [1, 1]} : vector<8x512xf32> to vector<8x128xf32>
    %297 = math.tanh %296 : vector<8x128xf32>
    %298 = vector.extract_strided_slice %279 {offsets = [0, 384], sizes = [8, 128], strides = [1, 1]} : vector<8x512xf32> to vector<8x128xf32>
    %cst_105 = arith.constant 5.000000e-01 : f32
    %299 = vector.broadcast %cst_105 : f32 to vector<8x128xf32>
    %300 = arith.mulf %299, %298 : vector<8x128xf32>
    %301 = math.tanh %300 : vector<8x128xf32>
    %cst_106 = arith.constant 5.000000e-01 : f32
    %302 = vector.broadcast %cst_106 : f32 to vector<8x128xf32>
    %303 = arith.mulf %302, %301 : vector<8x128xf32>
    %cst_107 = arith.constant 5.000000e-01 : f32
    %304 = vector.broadcast %cst_107 : f32 to vector<8x128xf32>
    %305 = arith.addf %303, %304 : vector<8x128xf32>
    %306 = arith.mulf %295, %233 : vector<8x128xf32>
    %307 = arith.mulf %287, %297 : vector<8x128xf32>
    %308 = arith.addf %306, %307 : vector<8x128xf32>
    %309 = math.tanh %308 : vector<8x128xf32>
    %310 = arith.mulf %305, %309 : vector<8x128xf32>
    %c4_i32 = arith.constant 4 : i32
    %311 = arith.truncf %310 : vector<8x128xf32> to vector<8x128xbf16>
    %cst_108 = arith.constant dense<0.000000e+00> : vector<8x512xf32>
    %312 = tpu.matmul %311, %5, %cst_108 {dimension_numbers = #tpu.dot_dimension_numbers<[1], [0], [0], [1], [0, 0, 1, 1], [], []>} : vector<8x128xbf16>, vector<128x512xbf16>, vector<8x512xf32> -> vector<8x512xf32>
    %313 = arith.index_cast %c4_i32 : i32 to index
    %c0_109 = arith.constant 0 : index
    %c0_110 = arith.constant 0 : index
    %314 = vector.load %arg1[%313, %c0_109, %c0_110] : memref<8x8x512xf32, #tpu.memory_space<vmem>>, vector<1x8x512xf32>
    %315 = vector.shape_cast %314 : vector<1x8x512xf32> to vector<8x512xf32>
    %316 = arith.truncf %274 : vector<8x128xf32> to vector<8x128xbf16>
    %cst_111 = arith.constant dense<0.000000e+00> : vector<8x512xf32>
    %317 = tpu.matmul %316, %3, %cst_111 {dimension_numbers = #tpu.dot_dimension_numbers<[1], [0], [0], [1], [0, 0, 1, 1], [], []>} : vector<8x128xbf16>, vector<128x512xbf16>, vector<8x512xf32> -> vector<8x512xf32>
    %318 = arith.addf %315, %317 : vector<8x512xf32>
    %319 = vector.extract_strided_slice %318 {offsets = [0, 0], sizes = [8, 128], strides = [1, 1]} : vector<8x512xf32> to vector<8x128xf32>
    %cst_112 = arith.constant 5.000000e-01 : f32
    %320 = vector.broadcast %cst_112 : f32 to vector<8x128xf32>
    %321 = arith.mulf %320, %319 : vector<8x128xf32>
    %322 = math.tanh %321 : vector<8x128xf32>
    %cst_113 = arith.constant 5.000000e-01 : f32
    %323 = vector.broadcast %cst_113 : f32 to vector<8x128xf32>
    %324 = arith.mulf %323, %322 : vector<8x128xf32>
    %cst_114 = arith.constant 5.000000e-01 : f32
    %325 = vector.broadcast %cst_114 : f32 to vector<8x128xf32>
    %326 = arith.addf %324, %325 : vector<8x128xf32>
    %327 = vector.extract_strided_slice %318 {offsets = [0, 128], sizes = [8, 128], strides = [1, 1]} : vector<8x512xf32> to vector<8x128xf32>
    %cst_115 = arith.constant 5.000000e-01 : f32
    %328 = vector.broadcast %cst_115 : f32 to vector<8x128xf32>
    %329 = arith.mulf %328, %327 : vector<8x128xf32>
    %330 = math.tanh %329 : vector<8x128xf32>
    %cst_116 = arith.constant 5.000000e-01 : f32
    %331 = vector.broadcast %cst_116 : f32 to vector<8x128xf32>
    %332 = arith.mulf %331, %330 : vector<8x128xf32>
    %cst_117 = arith.constant 5.000000e-01 : f32
    %333 = vector.broadcast %cst_117 : f32 to vector<8x128xf32>
    %334 = arith.addf %332, %333 : vector<8x128xf32>
    %335 = vector.extract_strided_slice %318 {offsets = [0, 256], sizes = [8, 128], strides = [1, 1]} : vector<8x512xf32> to vector<8x128xf32>
    %336 = math.tanh %335 : vector<8x128xf32>
    %337 = vector.extract_strided_slice %318 {offsets = [0, 384], sizes = [8, 128], strides = [1, 1]} : vector<8x512xf32> to vector<8x128xf32>
    %cst_118 = arith.constant 5.000000e-01 : f32
    %338 = vector.broadcast %cst_118 : f32 to vector<8x128xf32>
    %339 = arith.mulf %338, %337 : vector<8x128xf32>
    %340 = math.tanh %339 : vector<8x128xf32>
    %cst_119 = arith.constant 5.000000e-01 : f32
    %341 = vector.broadcast %cst_119 : f32 to vector<8x128xf32>
    %342 = arith.mulf %341, %340 : vector<8x128xf32>
    %cst_120 = arith.constant 5.000000e-01 : f32
    %343 = vector.broadcast %cst_120 : f32 to vector<8x128xf32>
    %344 = arith.addf %342, %343 : vector<8x128xf32>
    %345 = arith.mulf %334, %272 : vector<8x128xf32>
    %346 = arith.mulf %326, %336 : vector<8x128xf32>
    %347 = arith.addf %345, %346 : vector<8x128xf32>
    %348 = math.tanh %347 : vector<8x128xf32>
    %349 = arith.mulf %344, %348 : vector<8x128xf32>
    %350 = arith.truncf %349 : vector<8x128xf32> to vector<8x128xbf16>
    %cst_121 = arith.constant dense<0.000000e+00> : vector<8x512xf32>
    %351 = tpu.matmul %350, %4, %cst_121 {dimension_numbers = #tpu.dot_dimension_numbers<[1], [0], [0], [1], [0, 0, 1, 1], [], []>} : vector<8x128xbf16>, vector<128x512xbf16>, vector<8x512xf32> -> vector<8x512xf32>
    %352 = arith.addf %351, %312 : vector<8x512xf32>
    %353 = vector.broadcast %6 : vector<1x512xf32> to vector<8x512xf32>
    %354 = arith.addf %352, %353 : vector<8x512xf32>
    %355 = vector.extract_strided_slice %354 {offsets = [0, 0], sizes = [8, 128], strides = [1, 1]} : vector<8x512xf32> to vector<8x128xf32>
    %cst_122 = arith.constant 5.000000e-01 : f32
    %356 = vector.broadcast %cst_122 : f32 to vector<8x128xf32>
    %357 = arith.mulf %356, %355 : vector<8x128xf32>
    %358 = math.tanh %357 : vector<8x128xf32>
    %cst_123 = arith.constant 5.000000e-01 : f32
    %359 = vector.broadcast %cst_123 : f32 to vector<8x128xf32>
    %360 = arith.mulf %359, %358 : vector<8x128xf32>
    %cst_124 = arith.constant 5.000000e-01 : f32
    %361 = vector.broadcast %cst_124 : f32 to vector<8x128xf32>
    %362 = arith.addf %360, %361 : vector<8x128xf32>
    %363 = vector.extract_strided_slice %354 {offsets = [0, 128], sizes = [8, 128], strides = [1, 1]} : vector<8x512xf32> to vector<8x128xf32>
    %cst_125 = arith.constant 5.000000e-01 : f32
    %364 = vector.broadcast %cst_125 : f32 to vector<8x128xf32>
    %365 = arith.mulf %364, %363 : vector<8x128xf32>
    %366 = math.tanh %365 : vector<8x128xf32>
    %cst_126 = arith.constant 5.000000e-01 : f32
    %367 = vector.broadcast %cst_126 : f32 to vector<8x128xf32>
    %368 = arith.mulf %367, %366 : vector<8x128xf32>
    %cst_127 = arith.constant 5.000000e-01 : f32
    %369 = vector.broadcast %cst_127 : f32 to vector<8x128xf32>
    %370 = arith.addf %368, %369 : vector<8x128xf32>
    %371 = vector.extract_strided_slice %354 {offsets = [0, 256], sizes = [8, 128], strides = [1, 1]} : vector<8x512xf32> to vector<8x128xf32>
    %372 = math.tanh %371 : vector<8x128xf32>
    %373 = vector.extract_strided_slice %354 {offsets = [0, 384], sizes = [8, 128], strides = [1, 1]} : vector<8x512xf32> to vector<8x128xf32>
    %cst_128 = arith.constant 5.000000e-01 : f32
    %374 = vector.broadcast %cst_128 : f32 to vector<8x128xf32>
    %375 = arith.mulf %374, %373 : vector<8x128xf32>
    %376 = math.tanh %375 : vector<8x128xf32>
    %cst_129 = arith.constant 5.000000e-01 : f32
    %377 = vector.broadcast %cst_129 : f32 to vector<8x128xf32>
    %378 = arith.mulf %377, %376 : vector<8x128xf32>
    %cst_130 = arith.constant 5.000000e-01 : f32
    %379 = vector.broadcast %cst_130 : f32 to vector<8x128xf32>
    %380 = arith.addf %378, %379 : vector<8x128xf32>
    %381 = arith.mulf %370, %308 : vector<8x128xf32>
    %382 = arith.mulf %362, %372 : vector<8x128xf32>
    %383 = arith.addf %381, %382 : vector<8x128xf32>
    %384 = math.tanh %383 : vector<8x128xf32>
    %385 = arith.mulf %380, %384 : vector<8x128xf32>
    %c5_i32 = arith.constant 5 : i32
    %386 = arith.truncf %385 : vector<8x128xf32> to vector<8x128xbf16>
    %cst_131 = arith.constant dense<0.000000e+00> : vector<8x512xf32>
    %387 = tpu.matmul %386, %5, %cst_131 {dimension_numbers = #tpu.dot_dimension_numbers<[1], [0], [0], [1], [0, 0, 1, 1], [], []>} : vector<8x128xbf16>, vector<128x512xbf16>, vector<8x512xf32> -> vector<8x512xf32>
    %388 = arith.index_cast %c5_i32 : i32 to index
    %c0_132 = arith.constant 0 : index
    %c0_133 = arith.constant 0 : index
    %389 = vector.load %arg1[%388, %c0_132, %c0_133] : memref<8x8x512xf32, #tpu.memory_space<vmem>>, vector<1x8x512xf32>
    %390 = vector.shape_cast %389 : vector<1x8x512xf32> to vector<8x512xf32>
    %391 = arith.truncf %349 : vector<8x128xf32> to vector<8x128xbf16>
    %cst_134 = arith.constant dense<0.000000e+00> : vector<8x512xf32>
    %392 = tpu.matmul %391, %3, %cst_134 {dimension_numbers = #tpu.dot_dimension_numbers<[1], [0], [0], [1], [0, 0, 1, 1], [], []>} : vector<8x128xbf16>, vector<128x512xbf16>, vector<8x512xf32> -> vector<8x512xf32>
    %393 = arith.addf %390, %392 : vector<8x512xf32>
    %394 = vector.extract_strided_slice %393 {offsets = [0, 0], sizes = [8, 128], strides = [1, 1]} : vector<8x512xf32> to vector<8x128xf32>
    %cst_135 = arith.constant 5.000000e-01 : f32
    %395 = vector.broadcast %cst_135 : f32 to vector<8x128xf32>
    %396 = arith.mulf %395, %394 : vector<8x128xf32>
    %397 = math.tanh %396 : vector<8x128xf32>
    %cst_136 = arith.constant 5.000000e-01 : f32
    %398 = vector.broadcast %cst_136 : f32 to vector<8x128xf32>
    %399 = arith.mulf %398, %397 : vector<8x128xf32>
    %cst_137 = arith.constant 5.000000e-01 : f32
    %400 = vector.broadcast %cst_137 : f32 to vector<8x128xf32>
    %401 = arith.addf %399, %400 : vector<8x128xf32>
    %402 = vector.extract_strided_slice %393 {offsets = [0, 128], sizes = [8, 128], strides = [1, 1]} : vector<8x512xf32> to vector<8x128xf32>
    %cst_138 = arith.constant 5.000000e-01 : f32
    %403 = vector.broadcast %cst_138 : f32 to vector<8x128xf32>
    %404 = arith.mulf %403, %402 : vector<8x128xf32>
    %405 = math.tanh %404 : vector<8x128xf32>
    %cst_139 = arith.constant 5.000000e-01 : f32
    %406 = vector.broadcast %cst_139 : f32 to vector<8x128xf32>
    %407 = arith.mulf %406, %405 : vector<8x128xf32>
    %cst_140 = arith.constant 5.000000e-01 : f32
    %408 = vector.broadcast %cst_140 : f32 to vector<8x128xf32>
    %409 = arith.addf %407, %408 : vector<8x128xf32>
    %410 = vector.extract_strided_slice %393 {offsets = [0, 256], sizes = [8, 128], strides = [1, 1]} : vector<8x512xf32> to vector<8x128xf32>
    %411 = math.tanh %410 : vector<8x128xf32>
    %412 = vector.extract_strided_slice %393 {offsets = [0, 384], sizes = [8, 128], strides = [1, 1]} : vector<8x512xf32> to vector<8x128xf32>
    %cst_141 = arith.constant 5.000000e-01 : f32
    %413 = vector.broadcast %cst_141 : f32 to vector<8x128xf32>
    %414 = arith.mulf %413, %412 : vector<8x128xf32>
    %415 = math.tanh %414 : vector<8x128xf32>
    %cst_142 = arith.constant 5.000000e-01 : f32
    %416 = vector.broadcast %cst_142 : f32 to vector<8x128xf32>
    %417 = arith.mulf %416, %415 : vector<8x128xf32>
    %cst_143 = arith.constant 5.000000e-01 : f32
    %418 = vector.broadcast %cst_143 : f32 to vector<8x128xf32>
    %419 = arith.addf %417, %418 : vector<8x128xf32>
    %420 = arith.mulf %409, %347 : vector<8x128xf32>
    %421 = arith.mulf %401, %411 : vector<8x128xf32>
    %422 = arith.addf %420, %421 : vector<8x128xf32>
    %423 = math.tanh %422 : vector<8x128xf32>
    %424 = arith.mulf %419, %423 : vector<8x128xf32>
    %425 = arith.truncf %424 : vector<8x128xf32> to vector<8x128xbf16>
    %cst_144 = arith.constant dense<0.000000e+00> : vector<8x512xf32>
    %426 = tpu.matmul %425, %4, %cst_144 {dimension_numbers = #tpu.dot_dimension_numbers<[1], [0], [0], [1], [0, 0, 1, 1], [], []>} : vector<8x128xbf16>, vector<128x512xbf16>, vector<8x512xf32> -> vector<8x512xf32>
    %427 = arith.addf %426, %387 : vector<8x512xf32>
    %428 = vector.broadcast %6 : vector<1x512xf32> to vector<8x512xf32>
    %429 = arith.addf %427, %428 : vector<8x512xf32>
    %430 = vector.extract_strided_slice %429 {offsets = [0, 0], sizes = [8, 128], strides = [1, 1]} : vector<8x512xf32> to vector<8x128xf32>
    %cst_145 = arith.constant 5.000000e-01 : f32
    %431 = vector.broadcast %cst_145 : f32 to vector<8x128xf32>
    %432 = arith.mulf %431, %430 : vector<8x128xf32>
    %433 = math.tanh %432 : vector<8x128xf32>
    %cst_146 = arith.constant 5.000000e-01 : f32
    %434 = vector.broadcast %cst_146 : f32 to vector<8x128xf32>
    %435 = arith.mulf %434, %433 : vector<8x128xf32>
    %cst_147 = arith.constant 5.000000e-01 : f32
    %436 = vector.broadcast %cst_147 : f32 to vector<8x128xf32>
    %437 = arith.addf %435, %436 : vector<8x128xf32>
    %438 = vector.extract_strided_slice %429 {offsets = [0, 128], sizes = [8, 128], strides = [1, 1]} : vector<8x512xf32> to vector<8x128xf32>
    %cst_148 = arith.constant 5.000000e-01 : f32
    %439 = vector.broadcast %cst_148 : f32 to vector<8x128xf32>
    %440 = arith.mulf %439, %438 : vector<8x128xf32>
    %441 = math.tanh %440 : vector<8x128xf32>
    %cst_149 = arith.constant 5.000000e-01 : f32
    %442 = vector.broadcast %cst_149 : f32 to vector<8x128xf32>
    %443 = arith.mulf %442, %441 : vector<8x128xf32>
    %cst_150 = arith.constant 5.000000e-01 : f32
    %444 = vector.broadcast %cst_150 : f32 to vector<8x128xf32>
    %445 = arith.addf %443, %444 : vector<8x128xf32>
    %446 = vector.extract_strided_slice %429 {offsets = [0, 256], sizes = [8, 128], strides = [1, 1]} : vector<8x512xf32> to vector<8x128xf32>
    %447 = math.tanh %446 : vector<8x128xf32>
    %448 = vector.extract_strided_slice %429 {offsets = [0, 384], sizes = [8, 128], strides = [1, 1]} : vector<8x512xf32> to vector<8x128xf32>
    %cst_151 = arith.constant 5.000000e-01 : f32
    %449 = vector.broadcast %cst_151 : f32 to vector<8x128xf32>
    %450 = arith.mulf %449, %448 : vector<8x128xf32>
    %451 = math.tanh %450 : vector<8x128xf32>
    %cst_152 = arith.constant 5.000000e-01 : f32
    %452 = vector.broadcast %cst_152 : f32 to vector<8x128xf32>
    %453 = arith.mulf %452, %451 : vector<8x128xf32>
    %cst_153 = arith.constant 5.000000e-01 : f32
    %454 = vector.broadcast %cst_153 : f32 to vector<8x128xf32>
    %455 = arith.addf %453, %454 : vector<8x128xf32>
    %456 = arith.mulf %445, %383 : vector<8x128xf32>
    %457 = arith.mulf %437, %447 : vector<8x128xf32>
    %458 = arith.addf %456, %457 : vector<8x128xf32>
    %459 = math.tanh %458 : vector<8x128xf32>
    %460 = arith.mulf %455, %459 : vector<8x128xf32>
    %c6_i32 = arith.constant 6 : i32
    %461 = arith.truncf %460 : vector<8x128xf32> to vector<8x128xbf16>
    %cst_154 = arith.constant dense<0.000000e+00> : vector<8x512xf32>
    %462 = tpu.matmul %461, %5, %cst_154 {dimension_numbers = #tpu.dot_dimension_numbers<[1], [0], [0], [1], [0, 0, 1, 1], [], []>} : vector<8x128xbf16>, vector<128x512xbf16>, vector<8x512xf32> -> vector<8x512xf32>
    %463 = arith.index_cast %c6_i32 : i32 to index
    %c0_155 = arith.constant 0 : index
    %c0_156 = arith.constant 0 : index
    %464 = vector.load %arg1[%463, %c0_155, %c0_156] : memref<8x8x512xf32, #tpu.memory_space<vmem>>, vector<1x8x512xf32>
    %465 = vector.shape_cast %464 : vector<1x8x512xf32> to vector<8x512xf32>
    %466 = arith.truncf %424 : vector<8x128xf32> to vector<8x128xbf16>
    %cst_157 = arith.constant dense<0.000000e+00> : vector<8x512xf32>
    %467 = tpu.matmul %466, %3, %cst_157 {dimension_numbers = #tpu.dot_dimension_numbers<[1], [0], [0], [1], [0, 0, 1, 1], [], []>} : vector<8x128xbf16>, vector<128x512xbf16>, vector<8x512xf32> -> vector<8x512xf32>
    %468 = arith.addf %465, %467 : vector<8x512xf32>
    %469 = vector.extract_strided_slice %468 {offsets = [0, 0], sizes = [8, 128], strides = [1, 1]} : vector<8x512xf32> to vector<8x128xf32>
    %cst_158 = arith.constant 5.000000e-01 : f32
    %470 = vector.broadcast %cst_158 : f32 to vector<8x128xf32>
    %471 = arith.mulf %470, %469 : vector<8x128xf32>
    %472 = math.tanh %471 : vector<8x128xf32>
    %cst_159 = arith.constant 5.000000e-01 : f32
    %473 = vector.broadcast %cst_159 : f32 to vector<8x128xf32>
    %474 = arith.mulf %473, %472 : vector<8x128xf32>
    %cst_160 = arith.constant 5.000000e-01 : f32
    %475 = vector.broadcast %cst_160 : f32 to vector<8x128xf32>
    %476 = arith.addf %474, %475 : vector<8x128xf32>
    %477 = vector.extract_strided_slice %468 {offsets = [0, 128], sizes = [8, 128], strides = [1, 1]} : vector<8x512xf32> to vector<8x128xf32>
    %cst_161 = arith.constant 5.000000e-01 : f32
    %478 = vector.broadcast %cst_161 : f32 to vector<8x128xf32>
    %479 = arith.mulf %478, %477 : vector<8x128xf32>
    %480 = math.tanh %479 : vector<8x128xf32>
    %cst_162 = arith.constant 5.000000e-01 : f32
    %481 = vector.broadcast %cst_162 : f32 to vector<8x128xf32>
    %482 = arith.mulf %481, %480 : vector<8x128xf32>
    %cst_163 = arith.constant 5.000000e-01 : f32
    %483 = vector.broadcast %cst_163 : f32 to vector<8x128xf32>
    %484 = arith.addf %482, %483 : vector<8x128xf32>
    %485 = vector.extract_strided_slice %468 {offsets = [0, 256], sizes = [8, 128], strides = [1, 1]} : vector<8x512xf32> to vector<8x128xf32>
    %486 = math.tanh %485 : vector<8x128xf32>
    %487 = vector.extract_strided_slice %468 {offsets = [0, 384], sizes = [8, 128], strides = [1, 1]} : vector<8x512xf32> to vector<8x128xf32>
    %cst_164 = arith.constant 5.000000e-01 : f32
    %488 = vector.broadcast %cst_164 : f32 to vector<8x128xf32>
    %489 = arith.mulf %488, %487 : vector<8x128xf32>
    %490 = math.tanh %489 : vector<8x128xf32>
    %cst_165 = arith.constant 5.000000e-01 : f32
    %491 = vector.broadcast %cst_165 : f32 to vector<8x128xf32>
    %492 = arith.mulf %491, %490 : vector<8x128xf32>
    %cst_166 = arith.constant 5.000000e-01 : f32
    %493 = vector.broadcast %cst_166 : f32 to vector<8x128xf32>
    %494 = arith.addf %492, %493 : vector<8x128xf32>
    %495 = arith.mulf %484, %422 : vector<8x128xf32>
    %496 = arith.mulf %476, %486 : vector<8x128xf32>
    %497 = arith.addf %495, %496 : vector<8x128xf32>
    %498 = math.tanh %497 : vector<8x128xf32>
    %499 = arith.mulf %494, %498 : vector<8x128xf32>
    %500 = arith.truncf %499 : vector<8x128xf32> to vector<8x128xbf16>
    %cst_167 = arith.constant dense<0.000000e+00> : vector<8x512xf32>
    %501 = tpu.matmul %500, %4, %cst_167 {dimension_numbers = #tpu.dot_dimension_numbers<[1], [0], [0], [1], [0, 0, 1, 1], [], []>} : vector<8x128xbf16>, vector<128x512xbf16>, vector<8x512xf32> -> vector<8x512xf32>
    %502 = arith.addf %501, %462 : vector<8x512xf32>
    %503 = vector.broadcast %6 : vector<1x512xf32> to vector<8x512xf32>
    %504 = arith.addf %502, %503 : vector<8x512xf32>
    %505 = vector.extract_strided_slice %504 {offsets = [0, 0], sizes = [8, 128], strides = [1, 1]} : vector<8x512xf32> to vector<8x128xf32>
    %cst_168 = arith.constant 5.000000e-01 : f32
    %506 = vector.broadcast %cst_168 : f32 to vector<8x128xf32>
    %507 = arith.mulf %506, %505 : vector<8x128xf32>
    %508 = math.tanh %507 : vector<8x128xf32>
    %cst_169 = arith.constant 5.000000e-01 : f32
    %509 = vector.broadcast %cst_169 : f32 to vector<8x128xf32>
    %510 = arith.mulf %509, %508 : vector<8x128xf32>
    %cst_170 = arith.constant 5.000000e-01 : f32
    %511 = vector.broadcast %cst_170 : f32 to vector<8x128xf32>
    %512 = arith.addf %510, %511 : vector<8x128xf32>
    %513 = vector.extract_strided_slice %504 {offsets = [0, 128], sizes = [8, 128], strides = [1, 1]} : vector<8x512xf32> to vector<8x128xf32>
    %cst_171 = arith.constant 5.000000e-01 : f32
    %514 = vector.broadcast %cst_171 : f32 to vector<8x128xf32>
    %515 = arith.mulf %514, %513 : vector<8x128xf32>
    %516 = math.tanh %515 : vector<8x128xf32>
    %cst_172 = arith.constant 5.000000e-01 : f32
    %517 = vector.broadcast %cst_172 : f32 to vector<8x128xf32>
    %518 = arith.mulf %517, %516 : vector<8x128xf32>
    %cst_173 = arith.constant 5.000000e-01 : f32
    %519 = vector.broadcast %cst_173 : f32 to vector<8x128xf32>
    %520 = arith.addf %518, %519 : vector<8x128xf32>
    %521 = vector.extract_strided_slice %504 {offsets = [0, 256], sizes = [8, 128], strides = [1, 1]} : vector<8x512xf32> to vector<8x128xf32>
    %522 = math.tanh %521 : vector<8x128xf32>
    %523 = vector.extract_strided_slice %504 {offsets = [0, 384], sizes = [8, 128], strides = [1, 1]} : vector<8x512xf32> to vector<8x128xf32>
    %cst_174 = arith.constant 5.000000e-01 : f32
    %524 = vector.broadcast %cst_174 : f32 to vector<8x128xf32>
    %525 = arith.mulf %524, %523 : vector<8x128xf32>
    %526 = math.tanh %525 : vector<8x128xf32>
    %cst_175 = arith.constant 5.000000e-01 : f32
    %527 = vector.broadcast %cst_175 : f32 to vector<8x128xf32>
    %528 = arith.mulf %527, %526 : vector<8x128xf32>
    %cst_176 = arith.constant 5.000000e-01 : f32
    %529 = vector.broadcast %cst_176 : f32 to vector<8x128xf32>
    %530 = arith.addf %528, %529 : vector<8x128xf32>
    %531 = arith.mulf %520, %458 : vector<8x128xf32>
    %532 = arith.mulf %512, %522 : vector<8x128xf32>
    %533 = arith.addf %531, %532 : vector<8x128xf32>
    %534 = math.tanh %533 : vector<8x128xf32>
    %535 = arith.mulf %530, %534 : vector<8x128xf32>
    %c7_i32 = arith.constant 7 : i32
    %536 = arith.truncf %535 : vector<8x128xf32> to vector<8x128xbf16>
    %cst_177 = arith.constant dense<0.000000e+00> : vector<8x512xf32>
    %537 = tpu.matmul %536, %5, %cst_177 {dimension_numbers = #tpu.dot_dimension_numbers<[1], [0], [0], [1], [0, 0, 1, 1], [], []>} : vector<8x128xbf16>, vector<128x512xbf16>, vector<8x512xf32> -> vector<8x512xf32>
    %538 = arith.index_cast %c7_i32 : i32 to index
    %c0_178 = arith.constant 0 : index
    %c0_179 = arith.constant 0 : index
    %539 = vector.load %arg1[%538, %c0_178, %c0_179] : memref<8x8x512xf32, #tpu.memory_space<vmem>>, vector<1x8x512xf32>
    %540 = vector.shape_cast %539 : vector<1x8x512xf32> to vector<8x512xf32>
    %541 = arith.truncf %499 : vector<8x128xf32> to vector<8x128xbf16>
    %cst_180 = arith.constant dense<0.000000e+00> : vector<8x512xf32>
    %542 = tpu.matmul %541, %3, %cst_180 {dimension_numbers = #tpu.dot_dimension_numbers<[1], [0], [0], [1], [0, 0, 1, 1], [], []>} : vector<8x128xbf16>, vector<128x512xbf16>, vector<8x512xf32> -> vector<8x512xf32>
    %543 = arith.addf %540, %542 : vector<8x512xf32>
    %544 = vector.extract_strided_slice %543 {offsets = [0, 0], sizes = [8, 128], strides = [1, 1]} : vector<8x512xf32> to vector<8x128xf32>
    %cst_181 = arith.constant 5.000000e-01 : f32
    %545 = vector.broadcast %cst_181 : f32 to vector<8x128xf32>
    %546 = arith.mulf %545, %544 : vector<8x128xf32>
    %547 = math.tanh %546 : vector<8x128xf32>
    %cst_182 = arith.constant 5.000000e-01 : f32
    %548 = vector.broadcast %cst_182 : f32 to vector<8x128xf32>
    %549 = arith.mulf %548, %547 : vector<8x128xf32>
    %cst_183 = arith.constant 5.000000e-01 : f32
    %550 = vector.broadcast %cst_183 : f32 to vector<8x128xf32>
    %551 = arith.addf %549, %550 : vector<8x128xf32>
    %552 = vector.extract_strided_slice %543 {offsets = [0, 128], sizes = [8, 128], strides = [1, 1]} : vector<8x512xf32> to vector<8x128xf32>
    %cst_184 = arith.constant 5.000000e-01 : f32
    %553 = vector.broadcast %cst_184 : f32 to vector<8x128xf32>
    %554 = arith.mulf %553, %552 : vector<8x128xf32>
    %555 = math.tanh %554 : vector<8x128xf32>
    %cst_185 = arith.constant 5.000000e-01 : f32
    %556 = vector.broadcast %cst_185 : f32 to vector<8x128xf32>
    %557 = arith.mulf %556, %555 : vector<8x128xf32>
    %cst_186 = arith.constant 5.000000e-01 : f32
    %558 = vector.broadcast %cst_186 : f32 to vector<8x128xf32>
    %559 = arith.addf %557, %558 : vector<8x128xf32>
    %560 = vector.extract_strided_slice %543 {offsets = [0, 256], sizes = [8, 128], strides = [1, 1]} : vector<8x512xf32> to vector<8x128xf32>
    %561 = math.tanh %560 : vector<8x128xf32>
    %562 = vector.extract_strided_slice %543 {offsets = [0, 384], sizes = [8, 128], strides = [1, 1]} : vector<8x512xf32> to vector<8x128xf32>
    %cst_187 = arith.constant 5.000000e-01 : f32
    %563 = vector.broadcast %cst_187 : f32 to vector<8x128xf32>
    %564 = arith.mulf %563, %562 : vector<8x128xf32>
    %565 = math.tanh %564 : vector<8x128xf32>
    %cst_188 = arith.constant 5.000000e-01 : f32
    %566 = vector.broadcast %cst_188 : f32 to vector<8x128xf32>
    %567 = arith.mulf %566, %565 : vector<8x128xf32>
    %cst_189 = arith.constant 5.000000e-01 : f32
    %568 = vector.broadcast %cst_189 : f32 to vector<8x128xf32>
    %569 = arith.addf %567, %568 : vector<8x128xf32>
    %570 = arith.mulf %559, %497 : vector<8x128xf32>
    %571 = arith.mulf %551, %561 : vector<8x128xf32>
    %572 = arith.addf %570, %571 : vector<8x128xf32>
    %573 = math.tanh %572 : vector<8x128xf32>
    %574 = arith.mulf %569, %573 : vector<8x128xf32>
    %575 = arith.truncf %574 : vector<8x128xf32> to vector<8x128xbf16>
    %cst_190 = arith.constant dense<0.000000e+00> : vector<8x512xf32>
    %576 = tpu.matmul %575, %4, %cst_190 {dimension_numbers = #tpu.dot_dimension_numbers<[1], [0], [0], [1], [0, 0, 1, 1], [], []>} : vector<8x128xbf16>, vector<128x512xbf16>, vector<8x512xf32> -> vector<8x512xf32>
    %577 = arith.addf %576, %537 : vector<8x512xf32>
    %578 = vector.broadcast %6 : vector<1x512xf32> to vector<8x512xf32>
    %579 = arith.addf %577, %578 : vector<8x512xf32>
    %580 = vector.extract_strided_slice %579 {offsets = [0, 0], sizes = [8, 128], strides = [1, 1]} : vector<8x512xf32> to vector<8x128xf32>
    %cst_191 = arith.constant 5.000000e-01 : f32
    %581 = vector.broadcast %cst_191 : f32 to vector<8x128xf32>
    %582 = arith.mulf %581, %580 : vector<8x128xf32>
    %583 = math.tanh %582 : vector<8x128xf32>
    %cst_192 = arith.constant 5.000000e-01 : f32
    %584 = vector.broadcast %cst_192 : f32 to vector<8x128xf32>
    %585 = arith.mulf %584, %583 : vector<8x128xf32>
    %cst_193 = arith.constant 5.000000e-01 : f32
    %586 = vector.broadcast %cst_193 : f32 to vector<8x128xf32>
    %587 = arith.addf %585, %586 : vector<8x128xf32>
    %588 = vector.extract_strided_slice %579 {offsets = [0, 128], sizes = [8, 128], strides = [1, 1]} : vector<8x512xf32> to vector<8x128xf32>
    %cst_194 = arith.constant 5.000000e-01 : f32
    %589 = vector.broadcast %cst_194 : f32 to vector<8x128xf32>
    %590 = arith.mulf %589, %588 : vector<8x128xf32>
    %591 = math.tanh %590 : vector<8x128xf32>
    %cst_195 = arith.constant 5.000000e-01 : f32
    %592 = vector.broadcast %cst_195 : f32 to vector<8x128xf32>
    %593 = arith.mulf %592, %591 : vector<8x128xf32>
    %cst_196 = arith.constant 5.000000e-01 : f32
    %594 = vector.broadcast %cst_196 : f32 to vector<8x128xf32>
    %595 = arith.addf %593, %594 : vector<8x128xf32>
    %596 = vector.extract_strided_slice %579 {offsets = [0, 256], sizes = [8, 128], strides = [1, 1]} : vector<8x512xf32> to vector<8x128xf32>
    %597 = math.tanh %596 : vector<8x128xf32>
    %598 = vector.extract_strided_slice %579 {offsets = [0, 384], sizes = [8, 128], strides = [1, 1]} : vector<8x512xf32> to vector<8x128xf32>
    %cst_197 = arith.constant 5.000000e-01 : f32
    %599 = vector.broadcast %cst_197 : f32 to vector<8x128xf32>
    %600 = arith.mulf %599, %598 : vector<8x128xf32>
    %601 = math.tanh %600 : vector<8x128xf32>
    %cst_198 = arith.constant 5.000000e-01 : f32
    %602 = vector.broadcast %cst_198 : f32 to vector<8x128xf32>
    %603 = arith.mulf %602, %601 : vector<8x128xf32>
    %cst_199 = arith.constant 5.000000e-01 : f32
    %604 = vector.broadcast %cst_199 : f32 to vector<8x128xf32>
    %605 = arith.addf %603, %604 : vector<8x128xf32>
    %606 = arith.mulf %595, %533 : vector<8x128xf32>
    %607 = arith.mulf %587, %597 : vector<8x128xf32>
    %608 = arith.addf %606, %607 : vector<8x128xf32>
    %609 = math.tanh %608 : vector<8x128xf32>
    %610 = arith.mulf %605, %609 : vector<8x128xf32>
    %c8_i32 = arith.constant 8 : i32
    %c0_200 = arith.constant 0 : index
    %c0_201 = arith.constant 0 : index
    %611 = vector.load %arg9[%c0_200, %c0_201] : memref<8x128xf32, #tpu.memory_space<vmem>>, vector<8x128xf32>
    tpu.vector_store %arg9[%c0_200, %c0_201], %574 {strides = array<i32>} : memref<8x128xf32, #tpu.memory_space<vmem>>, vector<8x128xf32>,
    %c0_202 = arith.constant 0 : index
    %c0_203 = arith.constant 0 : index
    %612 = vector.load %arg10[%c0_202, %c0_203] : memref<8x128xf32, #tpu.memory_space<vmem>>, vector<8x128xf32>
    tpu.vector_store %arg10[%c0_202, %c0_203], %572 {strides = array<i32>} : memref<8x128xf32, #tpu.memory_space<vmem>>, vector<8x128xf32>,
    %c0_204 = arith.constant 0 : index
    %c0_205 = arith.constant 0 : index
    %613 = vector.load %arg11[%c0_204, %c0_205] : memref<8x128xf32, #tpu.memory_space<vmem>>, vector<8x128xf32>
    tpu.vector_store %arg11[%c0_204, %c0_205], %610 {strides = array<i32>} : memref<8x128xf32, #tpu.memory_space<vmem>>, vector<8x128xf32>,
    %c0_206 = arith.constant 0 : index
    %c0_207 = arith.constant 0 : index
    %614 = vector.load %arg12[%c0_206, %c0_207] : memref<8x128xf32, #tpu.memory_space<vmem>>, vector<8x128xf32>
    tpu.vector_store %arg12[%c0_206, %c0_207], %608 {strides = array<i32>} : memref<8x128xf32, #tpu.memory_space<vmem>>, vector<8x128xf32>,
    %c1_i32_208 = arith.constant 1 : i32
    %615 = arith.cmpi eq, %arg0, %c1_i32_208 : i32
    %616 = arith.extui %615 : i1 to i32
    %c0_i32_209 = arith.constant 0 : i32
    %617 = arith.cmpi ne, %616, %c0_i32_209 : i32
    scf.if %617 {
      %618 = arith.truncf %610 : vector<8x128xf32> to vector<8x128xbf16>
      %c0_210 = arith.constant 0 : index
      %c0_211 = arith.constant 0 : index
      %619 = vector.load %arg6[%c0_210, %c0_211] : memref<128x128xbf16, #tpu.memory_space<vmem>>, vector<128x128xbf16>
      %cst_212 = arith.constant dense<0.000000e+00> : vector<8x128xf32>
      %620 = tpu.matmul %618, %619, %cst_212 {dimension_numbers = #tpu.dot_dimension_numbers<[1], [0], [0], [1], [0, 0, 1, 1], [], []>} : vector<8x128xbf16>, vector<128x128xbf16>, vector<8x128xf32> -> vector<8x128xf32>
      %c0_213 = arith.constant 0 : index
      %c0_214 = arith.constant 0 : index
      %621 = vector.load %arg7[%c0_213, %c0_214] : memref<1x128xf32, #tpu.memory_space<vmem>>, vector<1x128xf32>
      %622 = vector.broadcast %621 : vector<1x128xf32> to vector<8x128xf32>
      %623 = arith.addf %620, %622 : vector<8x128xf32>
      %c0_215 = arith.constant 0 : index
      %c0_216 = arith.constant 0 : index
      %624 = vector.load %arg8[%c0_215, %c0_216] : memref<8x128xf32, #tpu.memory_space<vmem>>, vector<8x128xf32>
      tpu.vector_store %arg8[%c0_215, %c0_216], %623 {strides = array<i32>} : memref<8x128xf32, #tpu.memory_space<vmem>>, vector<8x128xf32>,
    } else {
    }
    return
  }
  func.func @transform_0(%arg0: i32) -> (i32, i32, i32) {
    %c0_i32 = arith.constant 0 : i32
    %c0_i32_0 = arith.constant 0 : i32
    %c0_i32_1 = arith.constant 0 : i32
    return %arg0, %c0_i32, %c0_i32_0 : i32, i32, i32
  }
  func.func @transform_1(%arg0: i32) -> (i32, i32) {
    %c0_i32 = arith.constant 0 : i32
    %c0_i32_0 = arith.constant 0 : i32
    %c0_i32_1 = arith.constant 0 : i32
    return %c0_i32, %c0_i32_0 : i32, i32
  }
  func.func @transform_2(%arg0: i32) -> (i32, i32) {
    %c0_i32 = arith.constant 0 : i32
    %c0_i32_0 = arith.constant 0 : i32
    %c0_i32_1 = arith.constant 0 : i32
    return %c0_i32, %c0_i32_0 : i32, i32
  }
  func.func @transform_3(%arg0: i32) -> (i32, i32) {
    %c0_i32 = arith.constant 0 : i32
    %c0_i32_0 = arith.constant 0 : i32
    %c0_i32_1 = arith.constant 0 : i32
    return %c0_i32, %c0_i32_0 : i32, i32
  }
  func.func @transform_4(%arg0: i32) -> (i32, i32) {
    %c0_i32 = arith.constant 0 : i32
    %c0_i32_0 = arith.constant 0 : i32
    %c0_i32_1 = arith.constant 0 : i32
    return %c0_i32, %c0_i32_0 : i32, i32
  }
  func.func @transform_5(%arg0: i32) -> (i32, i32) {
    %c0_i32 = arith.constant 0 : i32
    %c0_i32_0 = arith.constant 0 : i32
    %c0_i32_1 = arith.constant 0 : i32
    return %c0_i32, %c0_i32_0 : i32, i32
  }
  func.func @transform_6(%arg0: i32) -> (i32, i32) {
    %c0_i32 = arith.constant 0 : i32
    %c0_i32_0 = arith.constant 0 : i32
    %c0_i32_1 = arith.constant 0 : i32
    return %c0_i32, %c0_i32_0 : i32, i32
  }
  func.func @transform_7(%arg0: i32) -> (i32, i32) {
    %c0_i32 = arith.constant 0 : i32
    %c0_i32_0 = arith.constant 0 : i32
    %c0_i32_1 = arith.constant 0 : i32
    return %c0_i32, %c0_i32_0 : i32, i32
  }
}

</mosaic_0001>

<bundles_post_ra>
// kernel: lstm2layer_classifier.2
= control target key start
LH: loop header
LB: loop body
LE: loop exit
PB: predicated region body
PF: predicated region fallthrough
CT: control target
= control target key end

     0   :  { %8 = vsyncpa [#allocation3], 0  ;;  %s1052_s12 = smov [#allocation2]   ;;  %s1402_s0 = inlined_call_operand.vmem [shape: bf16[128,256], index: 0, kind: input, shape index: {}]   ;;  %s1403_s1 = inlined_call_operand.hbm [shape: bf16[256,512], index: 1, kind: input, shape index: {}]   ;;  %s1404_s2 = inlined_call_operand.vmem [shape: f32[1,512], index: 2, kind: input, shape index: {}]   ;;  %s1405_s3 = inlined_call_operand.vmem [shape: f32[128,512], index: 3, kind: output, shape index: {}]  }
   0x1   :  { %s16_s13 = sshll.u32 %s1052_s12, 4  ;;  %s1028_s16 = scalar_lea.hbm %s1403_s1, 8192  ;;  %s17_s13 = int_to_ptr.vmem [resolvable:$true] %s16_s13 }
   0x2   :  { %p1029_p0 = scmp.ne.s32.totalorder %s1403_s1, %s1028_s16  ;;  %p1032_p1 = scmp.lt.u32.totalorder %s1028_s16, %s1403_s1 }
   0x4   :  { %p1034_p2 = pnand %p1032_p1, %p1029_p0 }
   0x6   :  { %1037 = shalt.err (!%p1034_p2)
}
   0x7   :  { %s1038_s21 = scalar_lea.vmem %s17_s13, 8192  ;;  %p1043_p4 = scmp.lt.s32.totalorder %s17_s13, %s17_s13 }
   0x8   :  { %p1039_p3 = scmp.ne.s32.totalorder %s17_s13, %s1038_s21  ;;  %p1044_p5 = scmp.lt.s32.totalorder %s1038_s21, %s1038_s21 }
   0xa   :  { %p1045_p6 = por %p1044_p5, %p1043_p4 }
   0xc   :  { %p1046_p7 = pnand %p1045_p6, %p1039_p3 }
   0xe   :  { %1049 = shalt.err (!%p1046_p7)
}
   0xf   :  { %s1053_s22 = smov 256   ;;  %s1054_s23 = smov 16  }
  0x10   :  { %22 = dma.hbm_to_vmem [thread:$0]  %s1403_s1, 8192, %s17_s13, [#allocation3], %s1053_s22, %s1053_s22, %s1054_s23  }
  0x11   :  { %1050 = dma.done.wait [#allocation3], 8192  }
  0x12   :  { %1051 = vsyncadd [#allocation3], 4294959104  ;;  %v908_v0 = vld [vmem:[#allocation2 + $0x4] ss:$16 sps:$4 sm:$0xff]   ;;  %v910_v1 = vld [vmem:[#allocation2 + $0xc] ss:$16 sps:$4 sm:$0xff]  }
  0x13   :  { %530 = vmatprep.subr.bf16.mxu0 %v908_v0  ;;  %v912_v2 = vld [vmem:[#allocation2] ss:$16 sps:$4 sm:$0xff]   ;;  %v913_v3 = vld [vmem:[#allocation2 + $0x8] ss:$16 sps:$4 sm:$0xff]   ;;  %643 = vmatprep.subr.bf16.mxu1 %v910_v1  ;;  %v914_v4 = vld [vmem:[#allocation2 + $0x24] ss:$16 sps:$4 sm:$0xff]  }
  0x14   :  { %531 = vmatpush1.bf16.msra.mxu0 %v912_v2  ;;  %644 = vmatpush1.bf16.msra.mxu1 %v913_v3  ;;  %v916_v5 = vld [vmem:[#allocation2 + $0x2c] ss:$16 sps:$4 sm:$0xff]   ;;  %v918_v6 = vld [vmem:[#allocation2 + $0x20] ss:$16 sps:$4 sm:$0xff]   ;;  %v919_v7 = vld [vmem:[#allocation2 + $0x28] ss:$16 sps:$4 sm:$0xff]  }
  0x15   :  { %532 = vmatprep.subr.bf16.mxu0 %v914_v4  ;;  %645 = vmatprep.subr.bf16.mxu1 %v916_v5  ;;  %v920_v8 = vld [vmem:[#allocation2 + $0x44] ss:$16 sps:$4 sm:$0xff]   ;;  %v922_v9 = vld [vmem:[#allocation2 + $0x4c] ss:$16 sps:$4 sm:$0xff]   ;;  %v924_v10 = vld [vmem:[#allocation2 + $0x40] ss:$16 sps:$4 sm:$0xff]  }
  0x16   :  { %v925_v11 = vld [vmem:[#allocation2 + $0x48] ss:$16 sps:$4 sm:$0xff]   ;;  %v926_v12 = vld [vmem:[#allocation2 + $0x64] ss:$16 sps:$4 sm:$0xff]   ;;  %v928_v13 = vld [vmem:[#allocation2 + $0x6c] ss:$16 sps:$4 sm:$0xff]  }
  0x17   :  { %v930_v14 = vld [vmem:[#allocation2 + $0x60] ss:$16 sps:$4 sm:$0xff]   ;;  %v931_v15 = vld [vmem:[#allocation2 + $0x68] ss:$16 sps:$4 sm:$0xff]   ;;  %v932_v16 = vld [vmem:[#allocation2 + $0x84] ss:$16 sps:$4 sm:$0xff]  }
  0x18   :  { %533 = vmatpush1.bf16.msra.mxu0 %v918_v6  ;;  %646 = vmatpush1.bf16.msra.mxu1 %v919_v7  ;;  %v934_v17 = vld [vmem:[#allocation2 + $0x8c] ss:$16 sps:$4 sm:$0xff]   ;;  %v936_v18 = vld [vmem:[#allocation2 + $0x80] ss:$16 sps:$4 sm:$0xff]   ;;  %v937_v19 = vld [vmem:[#allocation2 + $0x88] ss:$16 sps:$4 sm:$0xff]  }
  0x19   :  { %534 = vmatprep.subr.bf16.mxu0 %v920_v8  ;;  %647 = vmatprep.subr.bf16.mxu1 %v922_v9  ;;  %v938_v20 = vld [vmem:[#allocation2 + $0xa4] ss:$16 sps:$4 sm:$0xff]   ;;  %v940_v21 = vld [vmem:[#allocation2 + $0xac] ss:$16 sps:$4 sm:$0xff]   ;;  %v942_v22 = vld [vmem:[#allocation2 + $0xa0] ss:$16 sps:$4 sm:$0xff]  }
  0x1a   :  { %v943_v23 = vld [vmem:[#allocation2 + $0xa8] ss:$16 sps:$4 sm:$0xff]   ;;  %v944_v24 = vld [vmem:[#allocation2 + $0xc4] ss:$16 sps:$4 sm:$0xff]   ;;  %v946_v25 = vld [vmem:[#allocation2 + $0xcc] ss:$16 sps:$4 sm:$0xff]  }
  0x1b   :  { %v948_v26 = vld [vmem:[#allocation2 + $0xc0] ss:$16 sps:$4 sm:$0xff]   ;;  %v949_v27 = vld [vmem:[#allocation2 + $0xc8] ss:$16 sps:$4 sm:$0xff]   ;;  %v950_v28 = vld [vmem:[#allocation2 + $0xe4] ss:$16 sps:$4 sm:$0xff]  }
  0x1c   :  { %535 = vmatpush1.bf16.msra.mxu0 %v924_v10  ;;  %648 = vmatpush1.bf16.msra.mxu1 %v925_v11  ;;  %v952_v29 = vld [vmem:[#allocation2 + $0xec] ss:$16 sps:$4 sm:$0xff]   ;;  %v954_v30 = vld [vmem:[#allocation2 + $0xe0] ss:$16 sps:$4 sm:$0xff]   ;;  %v955_v31 = vld [vmem:[#allocation2 + $0xe8] ss:$16 sps:$4 sm:$0xff]  }
  0x1d   :  { %536 = vmatprep.subr.bf16.mxu0 %v926_v12  ;;  %649 = vmatprep.subr.bf16.mxu1 %v928_v13  ;;  %v956_v32 = vld [vmem:[#allocation2 + $0x104] ss:$16 sps:$4 sm:$0xff]   ;;  %v958_v33 = vld [vmem:[#allocation2 + $0x10c] ss:$16 sps:$4 sm:$0xff]   ;;  %v960_v34 = vld [vmem:[#allocation2 + $0x100] ss:$16 sps:$4 sm:$0xff]  }
  0x1e   :  { %v961_v35 = vld [vmem:[#allocation2 + $0x108] ss:$16 sps:$4 sm:$0xff]   ;;  %v962_v36 = vld [vmem:[#allocation2 + $0x124] ss:$16 sps:$4 sm:$0xff]   ;;  %v964_v37 = vld [vmem:[#allocation2 + $0x12c] ss:$16 sps:$4 sm:$0xff]  }
  0x1f   :  { %v966_v38 = vld [vmem:[#allocation2 + $0x120] ss:$16 sps:$4 sm:$0xff]   ;;  %v967_v39 = vld [vmem:[#allocation2 + $0x128] ss:$16 sps:$4 sm:$0xff]   ;;  %v968_v40 = vld [vmem:[#allocation2 + $0x144] ss:$16 sps:$4 sm:$0xff]  }
  0x20   :  { %537 = vmatpush1.bf16.msra.mxu0 %v930_v14  ;;  %650 = vmatpush1.bf16.msra.mxu1 %v931_v15  ;;  %v970_v41 = vld [vmem:[#allocation2 + $0x14c] ss:$16 sps:$4 sm:$0xff]   ;;  %v972_v42 = vld [vmem:[#allocation2 + $0x140] ss:$16 sps:$4 sm:$0xff]   ;;  %v973_v43 = vld [vmem:[#allocation2 + $0x148] ss:$16 sps:$4 sm:$0xff]  }
  0x21   :  { %538 = vmatprep.subr.bf16.mxu0 %v932_v16  ;;  %651 = vmatprep.subr.bf16.mxu1 %v934_v17  ;;  %v974_v44 = vld [vmem:[#allocation2 + $0x164] ss:$16 sps:$4 sm:$0xff]   ;;  %v976_v45 = vld [vmem:[#allocation2 + $0x16c] ss:$16 sps:$4 sm:$0xff]   ;;  %v978_v46 = vld [vmem:[#allocation2 + $0x160] ss:$16 sps:$4 sm:$0xff]   ;;  %v110_v16 = vlaneseq }
  0x22   :  { %v979_v47 = vld [vmem:[#allocation2 + $0x168] ss:$16 sps:$4 sm:$0xff]   ;;  %v1006_v48 = vld [vmem:[%s1402_s0 + $0x4] ss:$8 sps:$4 sm:$0xff]   ;;  %v984_v51 = vld [vmem:[#allocation2 + $0x180] ss:$16 sps:$4 sm:$0xff]  }
  0x23   :  { %v980_v49 = vld [vmem:[#allocation2 + $0x184] ss:$16 sps:$4 sm:$0xff]   ;;  %v982_v50 = vld [vmem:[#allocation2 + $0x18c] ss:$16 sps:$4 sm:$0xff]   ;;  %562 = vmatprep.mubr.bf16.mxu0 %v1006_v48  ;;  %675 = vmatprep.mubr.bf16.mxu1 %v1006_v48  ;;  %v985_v52 = vld [vmem:[#allocation2 + $0x188] ss:$16 sps:$4 sm:$0xff]  }
  0x24   :  { %539 = vmatpush1.bf16.msra.mxu0 %v936_v18  ;;  %652 = vmatpush1.bf16.msra.mxu1 %v937_v19  ;;  %v986_v53 = vld [vmem:[#allocation2 + $0x1a4] ss:$16 sps:$4 sm:$0xff]   ;;  %v988_v54 = vld [vmem:[#allocation2 + $0x1ac] ss:$16 sps:$4 sm:$0xff]   ;;  %v990_v55 = vld [vmem:[#allocation2 + $0x1a0] ss:$16 sps:$4 sm:$0xff]  }
  0x25   :  { %540 = vmatprep.subr.bf16.mxu0 %v938_v20  ;;  %653 = vmatprep.subr.bf16.mxu1 %v940_v21  ;;  %v991_v56 = vld [vmem:[#allocation2 + $0x1a8] ss:$16 sps:$4 sm:$0xff]   ;;  %v992_v57 = vld [vmem:[#allocation2 + $0x1c4] ss:$16 sps:$4 sm:$0xff]   ;;  %v994_v58 = vld [vmem:[#allocation2 + $0x1cc] ss:$16 sps:$4 sm:$0xff]  }
  0x26   :  { %v996_v59 = vld [vmem:[#allocation2 + $0x1c0] ss:$16 sps:$4 sm:$0xff]   ;;  %v997_v60 = vld [vmem:[#allocation2 + $0x1c8] ss:$16 sps:$4 sm:$0xff]   ;;  %v998_v61 = vld [vmem:[#allocation2 + $0x1e4] ss:$16 sps:$4 sm:$0xff]  }
  0x27   :  { %v1000_v62 = vld [vmem:[#allocation2 + $0x1ec] ss:$16 sps:$4 sm:$0xff]   ;;  %v1002_v63 = vld [vmem:[#allocation2 + $0x1e0] ss:$16 sps:$4 sm:$0xff]   ;;  %v1003_v0 = vld [vmem:[#allocation2 + $0x1e8] ss:$16 sps:$4 sm:$0xff]  }
  0x28   :  { %541 = vmatpush1.bf16.msra.mxu0 %v942_v22  ;;  %654 = vmatpush1.bf16.msra.mxu1 %v943_v23  ;;  %v1004_v1 = vld [vmem:[%s1402_s0] ss:$8 sps:$4 sm:$0xff]   ;;  %v1007_v2 = vld [vmem:[%s1402_s0 + $0x14] ss:$8 sps:$4 sm:$0xff]   ;;  %v1009_v3 = vld [vmem:[%s1402_s0 + $0x10] ss:$8 sps:$4 sm:$0xff]  }
  0x29   :  { %542 = vmatprep.subr.bf16.mxu0 %v944_v24  ;;  %655 = vmatprep.subr.bf16.mxu1 %v946_v25  ;;  %v1010_v4 = vld [vmem:[%s1402_s0 + $0x24] ss:$8 sps:$4 sm:$0xff]   ;;  %v1012_v5 = vld [vmem:[%s1402_s0 + $0x20] ss:$8 sps:$4 sm:$0xff]   ;;  %v1013_v6 = vld [vmem:[%s1402_s0 + $0x34] ss:$8 sps:$4 sm:$0xff]  }
  0x2a   :  { %v1015_v7 = vld [vmem:[%s1402_s0 + $0x30] ss:$8 sps:$4 sm:$0xff]   ;;  %v1016_v8 = vld [vmem:[%s1402_s0 + $0x44] ss:$8 sps:$4 sm:$0xff]   ;;  %v1018_v9 = vld [vmem:[%s1402_s0 + $0x40] ss:$8 sps:$4 sm:$0xff]  }
  0x2b   :  { %v1019_v10 = vld [vmem:[%s1402_s0 + $0x54] ss:$8 sps:$4 sm:$0xff]   ;;  %v1021_v11 = vld [vmem:[%s1402_s0 + $0x50] ss:$8 sps:$4 sm:$0xff]   ;;  %v1022_v12 = vld [vmem:[%s1402_s0 + $0x64] ss:$8 sps:$4 sm:$0xff]  }
  0x2c   :  { %543 = vmatpush1.bf16.msra.mxu0 %v948_v26  ;;  %656 = vmatpush1.bf16.msra.mxu1 %v949_v27  ;;  %v1024_v13 = vld [vmem:[%s1402_s0 + $0x60] ss:$8 sps:$4 sm:$0xff]   ;;  %v1025_v14 = vld [vmem:[%s1402_s0 + $0x74] ss:$8 sps:$4 sm:$0xff]   ;;  %v1027_v15 = vld [vmem:[%s1402_s0 + $0x70] ss:$8 sps:$4 sm:$0xff]  }
  0x2d   :  { %544 = vmatprep.subr.bf16.mxu0 %v950_v28  ;;  %657 = vmatprep.subr.bf16.mxu1 %v952_v29  ;;  %v111_v17 = vshrl.u32 %v110_v16, 7  ;;  %v108_v20 = vld [vmem:[%s1404_s2] sm:$0xf] }
  0x2f   :  { %v112_v18 = vsub.s32 0, %v111_v17  ;;  %v120_v19 = vsub.s32 2, %v111_v17  ;;  %v116_v21 = vsub.s32 1, %v111_v17  ;;  %v124_v22 = vsub.s32 3, %v111_v17 }
  0x30   :  { %545 = vmatpush1.bf16.msra.mxu0 %v954_v30  ;;  %658 = vmatpush1.bf16.msra.mxu1 %v955_v31 }
  0x31   :  { %546 = vmatprep.subr.bf16.mxu0 %v956_v32  ;;  %659 = vmatprep.subr.bf16.mxu1 %v958_v33  ;;  %v1138_v23 = vrot.slane %v108_v20, %v112_v18  ;;  %v1140_v24 = vrot.slane %v108_v20, %v120_v19  ;;  %v1142_v25 = vrot.slane %v108_v20, %v116_v21 }
  0x32   :  { %v1144_v26 = vrot.slane %v108_v20, %v124_v22 }
  0x34   :  { %547 = vmatpush1.bf16.msra.mxu0 %v960_v34  ;;  %660 = vmatpush1.bf16.msra.mxu1 %v961_v35 }
  0x35   :  { %548 = vmatprep.subr.bf16.mxu0 %v962_v36  ;;  %661 = vmatprep.subr.bf16.mxu1 %v964_v37 }
  0x38   :  { %549 = vmatpush1.bf16.msra.mxu0 %v966_v38  ;;  %662 = vmatpush1.bf16.msra.mxu1 %v967_v39 }
  0x39   :  { %550 = vmatprep.subr.bf16.mxu0 %v968_v40  ;;  %663 = vmatprep.subr.bf16.mxu1 %v970_v41 }
  0x3c   :  { %551 = vmatpush1.bf16.msra.mxu0 %v972_v42  ;;  %664 = vmatpush1.bf16.msra.mxu1 %v973_v43 }
  0x3d   :  { %552 = vmatprep.subr.bf16.mxu0 %v974_v44  ;;  %665 = vmatprep.subr.bf16.mxu1 %v976_v45 }
  0x40   :  { %553 = vmatpush1.bf16.msra.mxu0 %v978_v46  ;;  %666 = vmatpush1.bf16.msra.mxu1 %v979_v47 }
  0x41   :  { %554 = vmatprep.subr.bf16.mxu0 %v980_v49  ;;  %667 = vmatprep.subr.bf16.mxu1 %v982_v50 }
  0x44   :  { %555 = vmatpush1.bf16.msra.mxu0 %v984_v51  ;;  %668 = vmatpush1.bf16.msra.mxu1 %v985_v52 }
  0x45   :  { %556 = vmatprep.subr.bf16.mxu0 %v986_v53  ;;  %669 = vmatprep.subr.bf16.mxu1 %v988_v54 }
  0x48   :  { %557 = vmatpush1.bf16.msra.mxu0 %v990_v55  ;;  %670 = vmatpush1.bf16.msra.mxu1 %v991_v56 }
  0x49   :  { %558 = vmatprep.subr.bf16.mxu0 %v992_v57  ;;  %671 = vmatprep.subr.bf16.mxu1 %v994_v58 }
  0x4c   :  { %559 = vmatpush1.bf16.msra.mxu0 %v996_v59  ;;  %672 = vmatpush1.bf16.msra.mxu1 %v997_v60 }
  0x4d   :  { %560 = vmatprep.subr.bf16.mxu0 %v998_v61  ;;  %673 = vmatprep.subr.bf16.mxu1 %v1000_v62 }
  0x50   :  { %561 = vmatpush1.bf16.msra.mxu0 %v1002_v63  ;;  %674 = vmatpush1.bf16.msra.mxu1 %v1003_v0 }
  0x53   :  { %563 = vmatmul.mubr.bf16.vlgmr.msra.gmra.mrb[0].mxu0 %v1004_v1  ;;  %676 = vmatmul.mubr.bf16.vlgmr.msra.gmra.mrb[0].mxu1 %v1004_v1 }
  0x54   :  { %572 = vmatprep.mubr.bf16.mxu0 %v1007_v2  ;;  %685 = vmatprep.mubr.bf16.mxu1 %v1007_v2 }
  0x5b   :  { %573 = vmatmul.mubr.bf16.gmra.mrb[4].mxu0 %v1009_v3  ;;  %686 = vmatmul.mubr.bf16.gmra.mrb[4].mxu1 %v1009_v3 }
  0x5c   :  { %582 = vmatprep.mubr.bf16.mxu0 %v1010_v4  ;;  %695 = vmatprep.mubr.bf16.mxu1 %v1010_v4 }
  0x63   :  { %583 = vmatmul.mubr.bf16.gmra.mrb[8].mxu0 %v1012_v5  ;;  %696 = vmatmul.mubr.bf16.gmra.mrb[8].mxu1 %v1012_v5 }
  0x64   :  { %592 = vmatprep.mubr.bf16.mxu0 %v1013_v6  ;;  %705 = vmatprep.mubr.bf16.mxu1 %v1013_v6 }
  0x6b   :  { %593 = vmatmul.mubr.bf16.gmra.mrb[12].mxu0 %v1015_v7  ;;  %706 = vmatmul.mubr.bf16.gmra.mrb[12].mxu1 %v1015_v7 }
  0x6c   :  { %602 = vmatprep.mubr.bf16.mxu0 %v1016_v8  ;;  %715 = vmatprep.mubr.bf16.mxu1 %v1016_v8 }
  0x73   :  { %603 = vmatmul.mubr.bf16.gmra.mrb[16].mxu0 %v1018_v9  ;;  %716 = vmatmul.mubr.bf16.gmra.mrb[16].mxu1 %v1018_v9 }
  0x74   :  { %612 = vmatprep.mubr.bf16.mxu0 %v1019_v10  ;;  %725 = vmatprep.mubr.bf16.mxu1 %v1019_v10 }
  0x7b   :  { %613 = vmatmul.mubr.bf16.gmra.mrb[20].mxu0 %v1021_v11  ;;  %726 = vmatmul.mubr.bf16.gmra.mrb[20].mxu1 %v1021_v11 }
  0x7c   :  { %622 = vmatprep.mubr.bf16.mxu0 %v1022_v12  ;;  %735 = vmatprep.mubr.bf16.mxu1 %v1022_v12 }
  0x83   :  { %623 = vmatmul.mubr.bf16.gmra.mrb[24].mxu0 %v1024_v13  ;;  %736 = vmatmul.mubr.bf16.gmra.mrb[24].mxu1 %v1024_v13 }
  0x84   :  { %632 = vmatprep.mubr.bf16.mxu0 %v1025_v14  ;;  %745 = vmatprep.mubr.bf16.mxu1 %v1025_v14 }
  0x8b   :  { %633 = vmatmul.mubr.bf16.gmra.mrb[28].mxu0 %v1027_v15  ;;  %746 = vmatmul.mubr.bf16.gmra.mrb[28].mxu1 %v1027_v15 }
 0x126   :  { %v564_v27 = vpop.f32.mrb[0].mxu0  ;;  %v677_v28 = vpop.f32.mrb[0].mxu1 }
 0x127   :  { %v565_v29 = vadd.f32 %v564_v27, %v1138_v23  ;;  %v678_v30 = vadd.f32 %v677_v28, %v1140_v24  ;;  %v566_v31 = vpop.f32.mrb[1].mxu0  ;;  %v679_v32 = vpop.f32.mrb[1].mxu1 }
 0x128   :  { %v567_v33 = vadd.f32 %v566_v31, %v1142_v25  ;;  %v680_v34 = vadd.f32 %v679_v32, %v1144_v26  ;;  %v568_v35 = vpop.f32.mrb[2].mxu0  ;;  %v681_v36 = vpop.f32.mrb[2].mxu1 }
 0x129   :  { %756 = vst [vmem:[%s1405_s3] sm:$0xff] %v565_v29  ;;  %758 = vst [vmem:[%s1405_s3 + $0x10] sm:$0xff] %v678_v30  ;;  %v569_v37 = vadd.f32 %v568_v35, %v1138_v23  ;;  %v682_v38 = vadd.f32 %v681_v36, %v1140_v24  ;;  %v570_v39 = vpop.f32.mrb[3].mxu0  ;;  %v683_v40 = vpop.f32.mrb[3].mxu1 }
 0x12a   :  { %757 = vst [vmem:[%s1405_s3 + $0x8] sm:$0xff] %v567_v33  ;;  %759 = vst [vmem:[%s1405_s3 + $0x18] sm:$0xff] %v680_v34  ;;  %v571_v41 = vadd.f32 %v570_v39, %v1142_v25  ;;  %v684_v42 = vadd.f32 %v683_v40, %v1144_v26 }
 0x12b   :  { %760 = vst [vmem:[%s1405_s3 + $0x20] sm:$0xff] %v569_v37  ;;  %762 = vst [vmem:[%s1405_s3 + $0x30] sm:$0xff] %v682_v38 }
 0x12c   :  { %761 = vst [vmem:[%s1405_s3 + $0x28] sm:$0xff] %v571_v41  ;;  %763 = vst [vmem:[%s1405_s3 + $0x38] sm:$0xff] %v684_v42 }
 0x12e   :  { %v574_v43 = vpop.f32.mrb[4].mxu0  ;;  %v687_v44 = vpop.f32.mrb[4].mxu1 }
 0x12f   :  { %v575_v45 = vadd.f32 %v574_v43, %v1138_v23  ;;  %v688_v46 = vadd.f32 %v687_v44, %v1140_v24  ;;  %v576_v47 = vpop.f32.mrb[5].mxu0  ;;  %v689_v48 = vpop.f32.mrb[5].mxu1 }
 0x130   :  { %v577_v49 = vadd.f32 %v576_v47, %v1142_v25  ;;  %v690_v50 = vadd.f32 %v689_v48, %v1144_v26  ;;  %v578_v51 = vpop.f32.mrb[6].mxu0  ;;  %v691_v52 = vpop.f32.mrb[6].mxu1 }
 0x131   :  { %764 = vst [vmem:[%s1405_s3 + $0x40] sm:$0xff] %v575_v45  ;;  %766 = vst [vmem:[%s1405_s3 + $0x50] sm:$0xff] %v688_v46  ;;  %v579_v53 = vadd.f32 %v578_v51, %v1138_v23  ;;  %v692_v54 = vadd.f32 %v691_v52, %v1140_v24  ;;  %v580_v55 = vpop.f32.mrb[7].mxu0  ;;  %v693_v56 = vpop.f32.mrb[7].mxu1 }
 0x132   :  { %765 = vst [vmem:[%s1405_s3 + $0x48] sm:$0xff] %v577_v49  ;;  %767 = vst [vmem:[%s1405_s3 + $0x58] sm:$0xff] %v690_v50  ;;  %v581_v57 = vadd.f32 %v580_v55, %v1142_v25  ;;  %v694_v58 = vadd.f32 %v693_v56, %v1144_v26 }
 0x133   :  { %768 = vst [vmem:[%s1405_s3 + $0x60] sm:$0xff] %v579_v53  ;;  %770 = vst [vmem:[%s1405_s3 + $0x70] sm:$0xff] %v692_v54 }
 0x134   :  { %769 = vst [vmem:[%s1405_s3 + $0x68] sm:$0xff] %v581_v57  ;;  %771 = vst [vmem:[%s1405_s3 + $0x78] sm:$0xff] %v694_v58 }
 0x136   :  { %v584_v59 = vpop.f32.mrb[8].mxu0  ;;  %v697_v60 = vpop.f32.mrb[8].mxu1 }
 0x137   :  { %v585_v61 = vadd.f32 %v584_v59, %v1138_v23  ;;  %v698_v62 = vadd.f32 %v697_v60, %v1140_v24  ;;  %v586_v63 = vpop.f32.mrb[9].mxu0  ;;  %v699_v0 = vpop.f32.mrb[9].mxu1 }
 0x138   :  { %v587_v1 = vadd.f32 %v586_v63, %v1142_v25  ;;  %v700_v2 = vadd.f32 %v699_v0, %v1144_v26  ;;  %v588_v3 = vpop.f32.mrb[10].mxu0  ;;  %v701_v4 = vpop.f32.mrb[10].mxu1 }
 0x139   :  { %772 = vst [vmem:[%s1405_s3 + $0x80] sm:$0xff] %v585_v61  ;;  %774 = vst [vmem:[%s1405_s3 + $0x90] sm:$0xff] %v698_v62  ;;  %v589_v5 = vadd.f32 %v588_v3, %v1138_v23  ;;  %v702_v6 = vadd.f32 %v701_v4, %v1140_v24  ;;  %v590_v7 = vpop.f32.mrb[11].mxu0  ;;  %v703_v8 = vpop.f32.mrb[11].mxu1 }
 0x13a   :  { %773 = vst [vmem:[%s1405_s3 + $0x88] sm:$0xff] %v587_v1  ;;  %775 = vst [vmem:[%s1405_s3 + $0x98] sm:$0xff] %v700_v2  ;;  %v591_v9 = vadd.f32 %v590_v7, %v1142_v25  ;;  %v704_v10 = vadd.f32 %v703_v8, %v1144_v26 }
 0x13b   :  { %776 = vst [vmem:[%s1405_s3 + $0xa0] sm:$0xff] %v589_v5  ;;  %778 = vst [vmem:[%s1405_s3 + $0xb0] sm:$0xff] %v702_v6 }
 0x13c   :  { %777 = vst [vmem:[%s1405_s3 + $0xa8] sm:$0xff] %v591_v9  ;;  %779 = vst [vmem:[%s1405_s3 + $0xb8] sm:$0xff] %v704_v10 }
 0x13e   :  { %v594_v11 = vpop.f32.mrb[12].mxu0  ;;  %v707_v12 = vpop.f32.mrb[12].mxu1 }
 0x13f   :  { %v595_v13 = vadd.f32 %v594_v11, %v1138_v23  ;;  %v708_v14 = vadd.f32 %v707_v12, %v1140_v24  ;;  %v596_v15 = vpop.f32.mrb[13].mxu0  ;;  %v709_v16 = vpop.f32.mrb[13].mxu1 }
 0x140   :  { %v597_v17 = vadd.f32 %v596_v15, %v1142_v25  ;;  %v710_v18 = vadd.f32 %v709_v16, %v1144_v26  ;;  %v598_v19 = vpop.f32.mrb[14].mxu0  ;;  %v711_v20 = vpop.f32.mrb[14].mxu1 }
 0x141   :  { %780 = vst [vmem:[%s1405_s3 + $0xc0] sm:$0xff] %v595_v13  ;;  %782 = vst [vmem:[%s1405_s3 + $0xd0] sm:$0xff] %v708_v14  ;;  %v599_v21 = vadd.f32 %v598_v19, %v1138_v23  ;;  %v712_v22 = vadd.f32 %v711_v20, %v1140_v24  ;;  %v600_v27 = vpop.f32.mrb[15].mxu0  ;;  %v713_v28 = vpop.f32.mrb[15].mxu1 }
 0x142   :  { %781 = vst [vmem:[%s1405_s3 + $0xc8] sm:$0xff] %v597_v17  ;;  %783 = vst [vmem:[%s1405_s3 + $0xd8] sm:$0xff] %v710_v18  ;;  %v601_v29 = vadd.f32 %v600_v27, %v1142_v25  ;;  %v714_v30 = vadd.f32 %v713_v28, %v1144_v26 }
 0x143   :  { %784 = vst [vmem:[%s1405_s3 + $0xe0] sm:$0xff] %v599_v21  ;;  %786 = vst [vmem:[%s1405_s3 + $0xf0] sm:$0xff] %v712_v22 }
 0x144   :  { %785 = vst [vmem:[%s1405_s3 + $0xe8] sm:$0xff] %v601_v29  ;;  %787 = vst [vmem:[%s1405_s3 + $0xf8] sm:$0xff] %v714_v30 }
 0x146   :  { %v604_v31 = vpop.f32.mrb[16].mxu0  ;;  %v717_v32 = vpop.f32.mrb[16].mxu1 }
 0x147   :  { %v605_v33 = vadd.f32 %v604_v31, %v1138_v23  ;;  %v718_v34 = vadd.f32 %v717_v32, %v1140_v24  ;;  %v606_v35 = vpop.f32.mrb[17].mxu0  ;;  %v719_v36 = vpop.f32.mrb[17].mxu1 }
 0x148   :  { %v607_v37 = vadd.f32 %v606_v35, %v1142_v25  ;;  %v720_v38 = vadd.f32 %v719_v36, %v1144_v26  ;;  %v608_v39 = vpop.f32.mrb[18].mxu0  ;;  %v721_v40 = vpop.f32.mrb[18].mxu1 }
 0x149   :  { %788 = vst [vmem:[%s1405_s3 + $0x100] sm:$0xff] %v605_v33  ;;  %790 = vst [vmem:[%s1405_s3 + $0x110] sm:$0xff] %v718_v34  ;;  %v609_v41 = vadd.f32 %v608_v39, %v1138_v23  ;;  %v722_v42 = vadd.f32 %v721_v40, %v1140_v24  ;;  %v610_v43 = vpop.f32.mrb[19].mxu0  ;;  %v723_v44 = vpop.f32.mrb[19].mxu1 }
 0x14a   :  { %789 = vst [vmem:[%s1405_s3 + $0x108] sm:$0xff] %v607_v37  ;;  %791 = vst [vmem:[%s1405_s3 + $0x118] sm:$0xff] %v720_v38  ;;  %v611_v45 = vadd.f32 %v610_v43, %v1142_v25  ;;  %v724_v46 = vadd.f32 %v723_v44, %v1144_v26 }
 0x14b   :  { %792 = vst [vmem:[%s1405_s3 + $0x120] sm:$0xff] %v609_v41  ;;  %794 = vst [vmem:[%s1405_s3 + $0x130] sm:$0xff] %v722_v42 }
 0x14c   :  { %793 = vst [vmem:[%s1405_s3 + $0x128] sm:$0xff] %v611_v45  ;;  %795 = vst [vmem:[%s1405_s3 + $0x138] sm:$0xff] %v724_v46 }
 0x14e   :  { %v614_v47 = vpop.f32.mrb[20].mxu0  ;;  %v727_v48 = vpop.f32.mrb[20].mxu1 }
 0x14f   :  { %v615_v49 = vadd.f32 %v614_v47, %v1138_v23  ;;  %v728_v50 = vadd.f32 %v727_v48, %v1140_v24  ;;  %v616_v51 = vpop.f32.mrb[21].mxu0  ;;  %v729_v52 = vpop.f32.mrb[21].mxu1 }
 0x150   :  { %v617_v53 = vadd.f32 %v616_v51, %v1142_v25  ;;  %v730_v54 = vadd.f32 %v729_v52, %v1144_v26  ;;  %v618_v55 = vpop.f32.mrb[22].mxu0  ;;  %v731_v56 = vpop.f32.mrb[22].mxu1 }
 0x151   :  { %796 = vst [vmem:[%s1405_s3 + $0x140] sm:$0xff] %v615_v49  ;;  %798 = vst [vmem:[%s1405_s3 + $0x150] sm:$0xff] %v728_v50  ;;  %v619_v57 = vadd.f32 %v618_v55, %v1138_v23  ;;  %v732_v58 = vadd.f32 %v731_v56, %v1140_v24  ;;  %v620_v59 = vpop.f32.mrb[23].mxu0  ;;  %v733_v60 = vpop.f32.mrb[23].mxu1 }
 0x152   :  { %797 = vst [vmem:[%s1405_s3 + $0x148] sm:$0xff] %v617_v53  ;;  %799 = vst [vmem:[%s1405_s3 + $0x158] sm:$0xff] %v730_v54  ;;  %v621_v61 = vadd.f32 %v620_v59, %v1142_v25  ;;  %v734_v62 = vadd.f32 %v733_v60, %v1144_v26 }
 0x153   :  { %800 = vst [vmem:[%s1405_s3 + $0x160] sm:$0xff] %v619_v57  ;;  %802 = vst [vmem:[%s1405_s3 + $0x170] sm:$0xff] %v732_v58 }
 0x154   :  { %801 = vst [vmem:[%s1405_s3 + $0x168] sm:$0xff] %v621_v61  ;;  %803 = vst [vmem:[%s1405_s3 + $0x178] sm:$0xff] %v734_v62 }
 0x156   :  { %v624_v63 = vpop.f32.mrb[24].mxu0  ;;  %v737_v0 = vpop.f32.mrb[24].mxu1 }
 0x157   :  { %v625_v1 = vadd.f32 %v624_v63, %v1138_v23  ;;  %v738_v2 = vadd.f32 %v737_v0, %v1140_v24  ;;  %v626_v3 = vpop.f32.mrb[25].mxu0  ;;  %v739_v4 = vpop.f32.mrb[25].mxu1 }
 0x158   :  { %v627_v5 = vadd.f32 %v626_v3, %v1142_v25  ;;  %v740_v6 = vadd.f32 %v739_v4, %v1144_v26  ;;  %v628_v7 = vpop.f32.mrb[26].mxu0  ;;  %v741_v8 = vpop.f32.mrb[26].mxu1 }
 0x159   :  { %804 = vst [vmem:[%s1405_s3 + $0x180] sm:$0xff] %v625_v1  ;;  %806 = vst [vmem:[%s1405_s3 + $0x190] sm:$0xff] %v738_v2  ;;  %v629_v9 = vadd.f32 %v628_v7, %v1138_v23  ;;  %v742_v10 = vadd.f32 %v741_v8, %v1140_v24  ;;  %v630_v11 = vpop.f32.mrb[27].mxu0  ;;  %v743_v12 = vpop.f32.mrb[27].mxu1 }
 0x15a   :  { %805 = vst [vmem:[%s1405_s3 + $0x188] sm:$0xff] %v627_v5  ;;  %807 = vst [vmem:[%s1405_s3 + $0x198] sm:$0xff] %v740_v6  ;;  %v631_v13 = vadd.f32 %v630_v11, %v1142_v25  ;;  %v744_v14 = vadd.f32 %v743_v12, %v1144_v26 }
 0x15b   :  { %808 = vst [vmem:[%s1405_s3 + $0x1a0] sm:$0xff] %v629_v9  ;;  %810 = vst [vmem:[%s1405_s3 + $0x1b0] sm:$0xff] %v742_v10 }
 0x15c   :  { %809 = vst [vmem:[%s1405_s3 + $0x1a8] sm:$0xff] %v631_v13  ;;  %811 = vst [vmem:[%s1405_s3 + $0x1b8] sm:$0xff] %v744_v14 }
 0x15e   :  { %v634_v15 = vpop.f32.mrb[28].mxu0  ;;  %v747_v16 = vpop.f32.mrb[28].mxu1 }
 0x15f   :  { %v635_v17 = vadd.f32 %v634_v15, %v1138_v23  ;;  %v748_v18 = vadd.f32 %v747_v16, %v1140_v24  ;;  %v636_v19 = vpop.f32.mrb[29].mxu0  ;;  %v749_v20 = vpop.f32.mrb[29].mxu1 }
 0x160   :  { %v637_v21 = vadd.f32 %v636_v19, %v1142_v25  ;;  %v750_v22 = vadd.f32 %v749_v20, %v1144_v26  ;;  %v638_v27 = vpop.f32.mrb[30].mxu0  ;;  %v751_v28 = vpop.f32.mrb[30].mxu1 }
 0x161   :  { %812 = vst [vmem:[%s1405_s3 + $0x1c0] sm:$0xff] %v635_v17  ;;  %814 = vst [vmem:[%s1405_s3 + $0x1d0] sm:$0xff] %v748_v18  ;;  %v639_v29 = vadd.f32 %v638_v27, %v1138_v23  ;;  %v752_v30 = vadd.f32 %v751_v28, %v1140_v24  ;;  %v640_v31 = vpop.f32.mrb[31].mxu0  ;;  %v753_v32 = vpop.f32.mrb[31].mxu1 }
 0x162   :  { %813 = vst [vmem:[%s1405_s3 + $0x1c8] sm:$0xff] %v637_v21  ;;  %815 = vst [vmem:[%s1405_s3 + $0x1d8] sm:$0xff] %v750_v22  ;;  %v641_v33 = vadd.f32 %v640_v31, %v1142_v25  ;;  %v754_v34 = vadd.f32 %v753_v32, %v1144_v26 }
 0x163   :  { %816 = vst [vmem:[%s1405_s3 + $0x1e0] sm:$0xff] %v639_v29  ;;  %818 = vst [vmem:[%s1405_s3 + $0x1f0] sm:$0xff] %v752_v30 }
 0x164   :  { %817 = vst [vmem:[%s1405_s3 + $0x1e8] sm:$0xff] %v641_v33  ;;  %819 = vst [vmem:[%s1405_s3 + $0x1f8] sm:$0xff] %v754_v34 }
 0x165   :  { %824 = vsyncpa [#allocation3], 1 }

// kernel: lstm2layer_classifier.3
= control target key start
LH: loop header
LB: loop body
LE: loop exit
PB: predicated region body
PF: predicated region fallthrough
CT: control target
= control target key end

     0   :  { %s4147_s24 = smov 0   ;;  %s6711_s0 = inlined_call_operand.vmem [shape: f32[16,8,512], index: 0, kind: input, shape index: {}]   ;;  %s6712_s1 = inlined_call_operand.vmem [shape: bf16[128,512], index: 1, kind: input, shape index: {}]   ;;  %s6713_s2 = inlined_call_operand.vmem [shape: bf16[128,512], index: 2, kind: input, shape index: {}]   ;;  %s6714_s3 = inlined_call_operand.vmem [shape: bf16[128,512], index: 3, kind: input, shape index: {}]   ;;  %s6715_s4 = inlined_call_operand.vmem [shape: f32[1,512], index: 4, kind: input, shape index: {}]   ;;  %s6716_s5 = inlined_call_operand.vmem [shape: bf16[128,128], index: 5, kind: input, shape index: {}]   ;;  %s6717_s6 = inlined_call_operand.vmem [shape: f32[1,128], index: 6, kind: input, shape index: {}]   ;;  %s6718_s7 = inlined_call_operand.vmem [shape: f32[8,128], index: 7, kind: output, shape index: {}]  }
   0x1 LB: > { %s4153_s25 = sadd.s32 4294967295, %s4101_s24   ;;  %p3408_p0 = scmp.ge.s32.totalorder %s4101_s24, 1  ;;  %s4101_s24 = sphi %s4147_s24, %s17_s24  }
   0x2   : > { %p234_p1 = scmp.lt.s32.totalorder %s4101_s24, 3 }
   0x4   : > { %p235_p2 = pnand %p3408_p0, %p234_p1 }
   0x6   : > { %238 = sbr.rel (%p235_p2) target bundleno = 4568 (0x11d8), region = 48 }
   0xd   : > { %s3409_s26 = sshll.u32 %s4153_s25, 3  ;;  %p3412_p4 = scmp.ne.s32.totalorder %s4153_s25, 0 }
   0xe   : > { %p263_p3 = scmp.lt.s32.totalorder %s3409_s26, 15  ;;  %v4103_v0 = vmov (!%p3412_p4), 0.0  }
   0xf   : > { %273 = sbr.rel (%p3412_p4) target bundleno = 22 (0x16), region = 52  ;;  %274 = vst [vmem:[#allocation2] sm:$0xff] (!%p3412_p4), %v4103_v0  ;;  %275 = vst [vmem:[#allocation3] sm:$0xff] (!%p3412_p4), %v4103_v0 }
  0x10   : > { %s7510_s26 = smov (!%p263_p3, %s3409_s26), 15  ;;  %276 = vst [vmem:[#allocation4] sm:$0xff] (!%p3412_p4), %v4103_v0  ;;  %277 = vst [vmem:[#allocation5] sm:$0xff] (!%p3412_p4), %v4103_v0 }
  0x11   : > { %s3549_s27 = sshll.u32 %s7510_s26, 5 }
  0x12   : > { %s4161_s30 = scalar_lea.vmem %s6711_s0, %s3549_s27 }
  0x16 PF: > { %v4167_v1 = vld [vmem:[%s6714_s3 + $0x4] ss:$16 sps:$4 sm:$0xff]   ;;  %v4172_v2 = vld [vmem:[%s6714_s3] ss:$16 sps:$4 sm:$0xff]   ;;  %v6719_v3 = vmov 0   ;;  %p3537_p5 = scmp.ne.s32.totalorder %s4153_s25, 1 }
  0x17   : > { %7042 = vst [vmem:[#allocation6_spill] sm:$0xff] %v4167_v1  ;;  %572 = vmatprep.mubr.bf16.mxu0 %v6719_v3  ;;  %613 = vmatprep.mubr.bf16.mxu1 %v6719_v3  ;;  %v4180_v4 = vld [vmem:[%s6714_s3 + $0x24] ss:$16 sps:$4 sm:$0xff]   ;;  %v4186_v5 = vld [vmem:[%s6714_s3 + $0xc] ss:$16 sps:$4 sm:$0xff]   ;;  %vm4106_vm0 = vmmov (!%p3537_p5), 0  }
  0x18   : > { %540 = vmatprep.subr.bf16.mxu0 %v4167_v1  ;;  %7043 = vst [vmem:[#allocation7_spill] sm:$0xff] %v4186_v5  ;;  %v4191_v6 = vld [vmem:[%s6714_s3 + $0x20] ss:$16 sps:$4 sm:$0xff]   ;;  %v4196_v7 = vld [vmem:[%s6714_s3 + $0x8] ss:$16 sps:$4 sm:$0xff]   ;;  %581 = vmatprep.subr.bf16.mxu1 %v4186_v5 }
  0x19   : > { %541 = vmatpush1.bf16.msra.mxu0 %v4172_v2  ;;  %v4202_v8 = vld [vmem:[%s6714_s3 + $0x44] ss:$16 sps:$4 sm:$0xff]   ;;  %v4208_v9 = vld [vmem:[%s6714_s3 + $0x2c] ss:$16 sps:$4 sm:$0xff]   ;;  %582 = vmatpush1.bf16.msra.mxu1 %v4196_v7  ;;  %v4214_v10 = vld [vmem:[%s6714_s3 + $0x28] ss:$16 sps:$4 sm:$0xff]  }
  0x1a   : > { %542 = vmatprep.subr.bf16.mxu0 %v4180_v4  ;;  %583 = vmatprep.subr.bf16.mxu1 %v4208_v9  ;;  %v4221_v11 = vld [vmem:[%s6714_s3 + $0x40] ss:$16 sps:$4 sm:$0xff]   ;;  %v4227_v12 = vld [vmem:[%s6714_s3 + $0x64] ss:$16 sps:$4 sm:$0xff]   ;;  %v4232_v13 = vld [vmem:[%s6714_s3 + $0x4c] ss:$16 sps:$4 sm:$0xff]  }
  0x1b   : > { %v4238_v14 = vld [vmem:[%s6714_s3 + $0x48] ss:$16 sps:$4 sm:$0xff]   ;;  %v4245_v15 = vld [vmem:[%s6714_s3 + $0x60] ss:$16 sps:$4 sm:$0xff]   ;;  %v4250_v16 = vld [vmem:[%s6714_s3 + $0x6c] ss:$16 sps:$4 sm:$0xff]  }
  0x1c   : > { %v4256_v17 = vld [vmem:[%s6714_s3 + $0x84] ss:$16 sps:$4 sm:$0xff]   ;;  %v4262_v18 = vld [vmem:[%s6714_s3 + $0x80] ss:$16 sps:$4 sm:$0xff]   ;;  %v4267_v19 = vld [vmem:[%s6714_s3 + $0x68] ss:$16 sps:$4 sm:$0xff]  }
  0x1d   : > { %543 = vmatpush1.bf16.msra.mxu0 %v4191_v6  ;;  %584 = vmatpush1.bf16.msra.mxu1 %v4214_v10  ;;  %v4274_v20 = vld [vmem:[%s6714_s3 + $0x8c] ss:$16 sps:$4 sm:$0xff]   ;;  %v4280_v21 = vld [vmem:[%s6714_s3 + $0xa4] ss:$16 sps:$4 sm:$0xff]   ;;  %v4286_v22 = vld [vmem:[%s6714_s3 + $0x88] ss:$16 sps:$4 sm:$0xff]  }
  0x1e   : > { %544 = vmatprep.subr.bf16.mxu0 %v4202_v8  ;;  %585 = vmatprep.subr.bf16.mxu1 %v4232_v13  ;;  %v4293_v23 = vld [vmem:[%s6714_s3 + $0xa0] ss:$16 sps:$4 sm:$0xff]   ;;  %v4298_v24 = vld [vmem:[%s6714_s3 + $0xac] ss:$16 sps:$4 sm:$0xff]   ;;  %v4304_v25 = vld [vmem:[%s6714_s3 + $0xc4] ss:$16 sps:$4 sm:$0xff]  }
  0x1f   : > { %v4310_v26 = vld [vmem:[%s6714_s3 + $0xc0] ss:$16 sps:$4 sm:$0xff]   ;;  %v4315_v27 = vld [vmem:[%s6714_s3 + $0xa8] ss:$16 sps:$4 sm:$0xff]   ;;  %v4322_v28 = vld [vmem:[%s6714_s3 + $0xcc] ss:$16 sps:$4 sm:$0xff]  }
  0x20   : > { %v4328_v29 = vld [vmem:[%s6714_s3 + $0xe4] ss:$16 sps:$4 sm:$0xff]   ;;  %v4333_v30 = vld [vmem:[%s6714_s3 + $0xe0] ss:$16 sps:$4 sm:$0xff]   ;;  %v4339_v31 = vld [vmem:[%s6714_s3 + $0xc8] ss:$16 sps:$4 sm:$0xff]  }
  0x21   : > { %545 = vmatpush1.bf16.msra.mxu0 %v4221_v11  ;;  %586 = vmatpush1.bf16.msra.mxu1 %v4238_v14  ;;  %v377_v32 = vld [vmem:[#allocation4] sm:$0xff]  ;;  %v4346_v33 = vld [vmem:[%s6714_s3 + $0xec] ss:$16 sps:$4 sm:$0xff]   ;;  %v4358_v36 = vld [vmem:[%s6714_s3 + $0xe8] ss:$16 sps:$4 sm:$0xff]  }
  0x22   : > { %546 = vmatprep.subr.bf16.mxu0 %v4227_v12  ;;  %587 = vmatprep.subr.bf16.mxu1 %v4250_v16  ;;  %v4352_v34 = vld [vmem:[%s6712_s1 + $0x4] ss:$16 sps:$4 sm:$0xff]   ;;  %v379_v35 = vpack.c.bf16 %v377_v32, %v377_v32  ;;  %v4363_v37 = vld [vmem:[%s6712_s1] ss:$16 sps:$4 sm:$0xff]   ;;  %v4370_v38 = vld [vmem:[%s6712_s1 + $0xc] ss:$16 sps:$4 sm:$0xff]  }
  0x23   : > { %v4376_v39 = vld [vmem:[%s6712_s1 + $0x24] ss:$16 sps:$4 sm:$0xff]   ;;  %v4382_v40 = vld [vmem:[%s6712_s1 + $0x8] ss:$16 sps:$4 sm:$0xff]   ;;  %v4389_v41 = vld [vmem:[%s6712_s1 + $0x20] ss:$16 sps:$4 sm:$0xff]  }
  0x24   : > { %v4394_v42 = vld [vmem:[%s6712_s1 + $0x2c] ss:$16 sps:$4 sm:$0xff]   ;;  %v4400_v43 = vld [vmem:[%s6712_s1 + $0x44] ss:$16 sps:$4 sm:$0xff]   ;;  %v4407_v44 = vld [vmem:[%s6712_s1 + $0x40] ss:$16 sps:$4 sm:$0xff]  }
  0x25   : > { %547 = vmatpush1.bf16.msra.mxu0 %v4245_v15  ;;  %588 = vmatpush1.bf16.msra.mxu1 %v4267_v19  ;;  %7044 = vst [vmem:[#allocation8_spill] sm:$0xff] %v4400_v43  ;;  %7045 = vst [vmem:[#allocation9_spill] sm:$0xff] %v4407_v44  ;;  %v4412_v45 = vld [vmem:[%s6712_s1 + $0x28] ss:$16 sps:$4 sm:$0xff]   ;;  %v4420_v46 = vld [vmem:[%s6712_s1 + $0x4c] ss:$16 sps:$4 sm:$0xff]  }
  0x26   : > { %548 = vmatprep.subr.bf16.mxu0 %v4256_v17  ;;  %589 = vmatprep.subr.bf16.mxu1 %v4274_v20  ;;  %7046 = vst [vmem:[#allocation10_spill] sm:$0xff] %v4420_v46  ;;  %v4426_v47 = vld [vmem:[%s6712_s1 + $0x64] ss:$16 sps:$4 sm:$0xff]   ;;  %v4431_v48 = vld [vmem:[%s6712_s1 + $0x60] ss:$16 sps:$4 sm:$0xff]  }
  0x27   : > { %7047 = vst [vmem:[#allocation11_spill] sm:$0xff] %v4426_v47  ;;  %7048 = vst [vmem:[#allocation12_spill] sm:$0xff] %v4431_v48  ;;  %v4436_v49 = vld [vmem:[%s6712_s1 + $0x48] ss:$16 sps:$4 sm:$0xff]   ;;  %v4442_v50 = vld [vmem:[%s6712_s1 + $0x84] ss:$16 sps:$4 sm:$0xff]  }
  0x28   : > { %7049 = vst [vmem:[#allocation13_spill] sm:$0xff] %v4436_v49  ;;  %7050 = vst [vmem:[#allocation14_spill] sm:$0xff] %v4442_v50  ;;  %v4449_v51 = vld [vmem:[%s6712_s1 + $0x6c] ss:$16 sps:$4 sm:$0xff]   ;;  %v4455_v52 = vld [vmem:[%s6712_s1 + $0x68] ss:$16 sps:$4 sm:$0xff]  }
  0x29   : > { %549 = vmatpush1.bf16.msra.mxu0 %v4262_v18  ;;  %590 = vmatpush1.bf16.msra.mxu1 %v4286_v22  ;;  %7051 = vst [vmem:[#allocation15_spill] sm:$0xff] %v4449_v51  ;;  %7052 = vst [vmem:[#allocation16_spill] sm:$0xff] %v4455_v52  ;;  %v4460_v53 = vld [vmem:[%s6712_s1 + $0x80] ss:$16 sps:$4 sm:$0xff]   ;;  %v4465_v54 = vld [vmem:[%s6712_s1 + $0x8c] ss:$16 sps:$4 sm:$0xff]  }
  0x2a   : > { %550 = vmatprep.subr.bf16.mxu0 %v4280_v21  ;;  %591 = vmatprep.subr.bf16.mxu1 %v4298_v24  ;;  %7053 = vst [vmem:[#allocation17_spill] sm:$0xff] %v4460_v53  ;;  %7054 = vst [vmem:[#allocation18_spill] sm:$0xff] %v4465_v54  ;;  %v4471_v55 = vld [vmem:[%s6712_s1 + $0xa4] ss:$16 sps:$4 sm:$0xff]   ;;  %v4479_v56 = vld [vmem:[%s6712_s1 + $0x88] ss:$16 sps:$4 sm:$0xff]  }
  0x2b   : > { %7055 = vst [vmem:[#allocation19_spill] sm:$0xff] %v4471_v55  ;;  %7056 = vst [vmem:[#allocation20_spill] sm:$0xff] %v4479_v56  ;;  %v4484_v57 = vld [vmem:[%s6712_s1 + $0xa0] ss:$16 sps:$4 sm:$0xff]   ;;  %v4489_v58 = vld [vmem:[%s6712_s1 + $0xac] ss:$16 sps:$4 sm:$0xff]  }
  0x2c   : > { %7057 = vst [vmem:[#allocation21_spill] sm:$0xff] %v4484_v57  ;;  %7058 = vst [vmem:[#allocation22_spill] sm:$0xff] %v4489_v58  ;;  %v4495_v59 = vld [vmem:[%s6712_s1 + $0xc4] ss:$16 sps:$4 sm:$0xff]   ;;  %v4504_v60 = vld [vmem:[%s6712_s1 + $0xa8] ss:$16 sps:$4 sm:$0xff]  }
  0x2d   : > { %551 = vmatpush1.bf16.msra.mxu0 %v4293_v23  ;;  %592 = vmatpush1.bf16.msra.mxu1 %v4315_v27  ;;  %7059 = vst [vmem:[#allocation23_spill] sm:$0xff] %v4495_v59  ;;  %7060 = vst [vmem:[#allocation24_spill] sm:$0xff] %v4504_v60  ;;  %v4511_v61 = vld [vmem:[%s6712_s1 + $0xc0] ss:$16 sps:$4 sm:$0xff]   ;;  %v4516_v62 = vld [vmem:[%s6712_s1 + $0xcc] ss:$16 sps:$4 sm:$0xff]  }
  0x2e   : > { %552 = vmatprep.subr.bf16.mxu0 %v4304_v25  ;;  %593 = vmatprep.subr.bf16.mxu1 %v4322_v28  ;;  %7061 = vst [vmem:[#allocation25_spill] sm:$0xff] %v4511_v61  ;;  %7062 = vst [vmem:[#allocation26_spill] sm:$0xff] %v4516_v62  ;;  %v4522_v63 = vld [vmem:[%s6712_s1 + $0xe4] ss:$16 sps:$4 sm:$0xff]   ;;  %v4528_v0 = vld [vmem:[%s6712_s1 + $0xc8] ss:$16 sps:$4 sm:$0xff]  }
  0x2f   : > { %7063 = vst [vmem:[#allocation27_spill] sm:$0xff] %v4522_v63  ;;  %7064 = vst [vmem:[#allocation28_spill] sm:$0xff] %v4528_v0  ;;  %v4535_v32 = vld [vmem:[%s6712_s1 + $0xe0] ss:$16 sps:$4 sm:$0xff]  }
  0x30   : > { %7065 = vst [vmem:[#allocation29_spill] sm:$0xff] %v4535_v32 }
  0x31   : > { %553 = vmatpush1.bf16.msra.mxu0 %v4310_v26  ;;  %594 = vmatpush1.bf16.msra.mxu1 %v4339_v31 }
  0x32   : > { %554 = vmatprep.subr.bf16.mxu0 %v4328_v29  ;;  %595 = vmatprep.subr.bf16.mxu1 %v4346_v33 }
  0x35   : > { %555 = vmatpush1.bf16.msra.mxu0 %v4333_v30  ;;  %596 = vmatpush1.bf16.msra.mxu1 %v4358_v36 }
  0x36   : > { %787 = vmatprep.subr.bf16.mxu0 %v4352_v34  ;;  %828 = vmatprep.subr.bf16.mxu1 %v4370_v38 }
  0x38   : > { %573 = vmatmul.mubr.bf16.vlgmr.msra.gmra.mrb[0].mxu0 %v379_v35  ;;  %614 = vmatmul.mubr.bf16.vlgmr.msra.gmra.mrb[0].mxu1 %v379_v35  ;;  %v375_v35 = vld [vmem:[#allocation2] sm:$0xff] }
  0x39   : > { %788 = vmatpush1.bf16.msra.mxu0 %v4363_v37  ;;  %819 = vmatprep.mubr.bf16.mxu0 %v6719_v3 }
  0x3a   : > { %789 = vmatprep.subr.bf16.mxu0 %v4376_v39  ;;  %829 = vmatpush1.bf16.msra.mxu1 %v4382_v40 }
  0x3b   : > { %860 = vmatprep.mubr.bf16.mxu1 %v6719_v3  ;;  %830 = vmatprep.subr.bf16.mxu1 %v4394_v42  ;;  %v4540_v3 = vld [vmem:[%s6712_s1 + $0xec] ss:$16 sps:$4 sm:$0xff]  }
  0x3c   : > { %7066 = vst [vmem:[#allocation30_spill] sm:$0xff] %v4540_v3 }
  0x3d   : > { %790 = vmatpush1.bf16.msra.mxu0 %v4389_v41 }
  0x3e   : > { %791 = vmatprep.subr.bf16.mxu0 %v4400_v43  ;;  %831 = vmatpush1.bf16.msra.mxu1 %v4412_v45 }
  0x3f   : > { %832 = vmatprep.subr.bf16.mxu1 %v4420_v46 }
  0x41   : > { %792 = vmatpush1.bf16.msra.mxu0 %v4407_v44 }
  0x42   : > { %793 = vmatprep.subr.bf16.mxu0 %v4426_v47  ;;  %833 = vmatpush1.bf16.msra.mxu1 %v4436_v49 }
  0x43   : > { %834 = vmatprep.subr.bf16.mxu1 %v4449_v51 }
  0x45   : > { %794 = vmatpush1.bf16.msra.mxu0 %v4431_v48 }
  0x46   : > { %795 = vmatprep.subr.bf16.mxu0 %v4442_v50  ;;  %835 = vmatpush1.bf16.msra.mxu1 %v4455_v52 }
  0x47   : > { %836 = vmatprep.subr.bf16.mxu1 %v4465_v54 }
  0x49   : > { %796 = vmatpush1.bf16.msra.mxu0 %v4460_v53  ;;  %v624_v53 = vld [vmem:[%s4161_s30 + $0x10] sm:$0xff] }
  0x4a   : > { %797 = vmatprep.subr.bf16.mxu0 %v4471_v55  ;;  %837 = vmatpush1.bf16.msra.mxu1 %v4479_v56  ;;  %v623_v55 = vld [vmem:[%s4161_s30 + $0x8] sm:$0xff] }
  0x4b   : > { %838 = vmatprep.subr.bf16.mxu1 %v4489_v58 }
  0x4d   : > { %798 = vmatpush1.bf16.msra.mxu0 %v4484_v57 }
  0x4e   : > { %799 = vmatprep.subr.bf16.mxu0 %v4495_v59  ;;  %839 = vmatpush1.bf16.msra.mxu1 %v4504_v60  ;;  %v626_v59 = vpack.c.bf16 %v375_v35, %v375_v35  ;;  %v4557_v35 = vld [vmem:[%s6713_s2 + $0x4] ss:$16 sps:$4 sm:$0xff]  }
  0x4f   : > { %840 = vmatprep.subr.bf16.mxu1 %v4516_v62  ;;  %v7068_v62 = vmov 0   ;;  %7069 = vst [vmem:[#allocation32_spill] sm:$0xff] %v4557_v35 }
  0x51   : > { %800 = vmatpush1.bf16.msra.mxu0 %v4511_v61  ;;  %v4547_v61 = vld [vmem:[%s6712_s1 + $0xe8] ss:$16 sps:$4 sm:$0xff]  }
  0x52   : > { %801 = vmatprep.subr.bf16.mxu0 %v4522_v63  ;;  %841 = vmatpush1.bf16.msra.mxu1 %v4528_v0  ;;  %7067 = vst [vmem:[#allocation31_spill] sm:$0xff] %v4547_v61  ;;  %v4562_v63 = vld [vmem:[%s6713_s2 + $0xc] ss:$16 sps:$4 sm:$0xff]  }
  0x53   : > { %842 = vmatprep.subr.bf16.mxu1 %v4540_v3  ;;  %7070 = vst [vmem:[#allocation33_spill] sm:$0xff] %v4562_v63  ;;  %v4586_v3 = vld [vmem:[%s6713_s2 + $0x2c] ss:$16 sps:$4 sm:$0xff]  }
  0x54   : > { %7074 = vst [vmem:[#allocation37_spill] sm:$0xff] %v4586_v3 }
  0x55   : > { %802 = vmatpush1.bf16.msra.mxu0 %v4535_v32  ;;  %v4567_v32 = vld [vmem:[%s6713_s2] ss:$16 sps:$4 sm:$0xff]  }
  0x56   : > { %843 = vmatpush1.bf16.msra.mxu1 %v4547_v61  ;;  %7071 = vst [vmem:[#allocation34_spill] sm:$0xff] %v4567_v32  ;;  %1052 = vmatprep.subr.bf16.mxu0 %v4557_v35  ;;  %v4581_v61 = vld [vmem:[%s6713_s2 + $0x24] ss:$16 sps:$4 sm:$0xff]   ;;  %v4591_v35 = vld [vmem:[%s6713_s2 + $0x20] ss:$16 sps:$4 sm:$0xff]  }
  0x57   : > { %1093 = vmatprep.subr.bf16.mxu1 %v4562_v63  ;;  %7073 = vst [vmem:[#allocation36_spill] sm:$0xff] %v4581_v61  ;;  %7075 = vst [vmem:[#allocation38_spill] sm:$0xff] %v4591_v35  ;;  %v4610_v63 = vld [vmem:[%s6713_s2 + $0x4c] ss:$16 sps:$4 sm:$0xff]  }
  0x58   : > { %820 = vmatmul.mubr.bf16.vlgmr.msra.gmra.mrb[4].mxu0 %v626_v59  ;;  %7078 = vst [vmem:[#allocation41_spill] sm:$0xff] %v4610_v63 }
  0x59   : > { %1084 = vmatprep.mubr.bf16.mxu0 %v7068_v62  ;;  %861 = vmatmul.mubr.bf16.vlgmr.msra.gmra.mrb[4].mxu1 %v626_v59  ;;  %v4572_v59 = vld [vmem:[%s6713_s2 + $0x8] ss:$16 sps:$4 sm:$0xff]  }
  0x5a   : > { %1125 = vmatprep.mubr.bf16.mxu1 %v7068_v62  ;;  %7072 = vst [vmem:[#allocation35_spill] sm:$0xff] %v4572_v59  ;;  %1053 = vmatpush1.bf16.msra.mxu0 %v4567_v32  ;;  %v4596_v32 = vld [vmem:[%s6713_s2 + $0x28] ss:$16 sps:$4 sm:$0xff]  }
  0x5b   : > { %1094 = vmatpush1.bf16.msra.mxu1 %v4572_v59  ;;  %7076 = vst [vmem:[#allocation39_spill] sm:$0xff] %v4596_v32  ;;  %1054 = vmatprep.subr.bf16.mxu0 %v4581_v61  ;;  %v4605_v59 = vld [vmem:[%s6713_s2 + $0x44] ss:$16 sps:$4 sm:$0xff]   ;;  %v4615_v61 = vld [vmem:[%s6713_s2 + $0x40] ss:$16 sps:$4 sm:$0xff]  }
  0x5c   : > { %1095 = vmatprep.subr.bf16.mxu1 %v4586_v3  ;;  %7077 = vst [vmem:[#allocation40_spill] sm:$0xff] %v4605_v59  ;;  %7079 = vst [vmem:[#allocation42_spill] sm:$0xff] %v4615_v61  ;;  %v4634_v3 = vld [vmem:[%s6713_s2 + $0x6c] ss:$16 sps:$4 sm:$0xff]  }
  0x5d   : > { %7082 = vst [vmem:[#allocation45_spill] sm:$0xff] %v4634_v3 }
  0x5e   : > { %1055 = vmatpush1.bf16.msra.mxu0 %v4591_v35  ;;  %v4620_v35 = vld [vmem:[%s6713_s2 + $0x48] ss:$16 sps:$4 sm:$0xff]  }
  0x5f   : > { %1096 = vmatpush1.bf16.msra.mxu1 %v4596_v32  ;;  %7080 = vst [vmem:[#allocation43_spill] sm:$0xff] %v4620_v35  ;;  %1056 = vmatprep.subr.bf16.mxu0 %v4605_v59  ;;  %v4629_v32 = vld [vmem:[%s6713_s2 + $0x64] ss:$16 sps:$4 sm:$0xff]   ;;  %v4639_v59 = vld [vmem:[%s6713_s2 + $0x60] ss:$16 sps:$4 sm:$0xff]  }
  0x60   : > { %1097 = vmatprep.subr.bf16.mxu1 %v4610_v63  ;;  %7081 = vst [vmem:[#allocation44_spill] sm:$0xff] %v4629_v32  ;;  %7083 = vst [vmem:[#allocation46_spill] sm:$0xff] %v4639_v59  ;;  %v4658_v63 = vld [vmem:[%s6713_s2 + $0x8c] ss:$16 sps:$4 sm:$0xff]  }
  0x61   : > { %7086 = vst [vmem:[#allocation49_spill] sm:$0xff] %v4658_v63 }
  0x62   : > { %1057 = vmatpush1.bf16.msra.mxu0 %v4615_v61  ;;  %v4644_v61 = vld [vmem:[%s6713_s2 + $0x68] ss:$16 sps:$4 sm:$0xff]  }
  0x63   : > { %1098 = vmatpush1.bf16.msra.mxu1 %v4620_v35  ;;  %7084 = vst [vmem:[#allocation47_spill] sm:$0xff] %v4644_v61  ;;  %1058 = vmatprep.subr.bf16.mxu0 %v4629_v32  ;;  %v4653_v35 = vld [vmem:[%s6713_s2 + $0x84] ss:$16 sps:$4 sm:$0xff]   ;;  %v4663_v32 = vld [vmem:[%s6713_s2 + $0x80] ss:$16 sps:$4 sm:$0xff]  }
  0x64   : > { %1099 = vmatprep.subr.bf16.mxu1 %v4634_v3  ;;  %7085 = vst [vmem:[#allocation48_spill] sm:$0xff] %v4653_v35  ;;  %7087 = vst [vmem:[#allocation50_spill] sm:$0xff] %v4663_v32  ;;  %v4682_v3 = vld [vmem:[%s6713_s2 + $0xac] ss:$16 sps:$4 sm:$0xff]  }
  0x65   : > { %7090 = vst [vmem:[#allocation53_spill] sm:$0xff] %v4682_v3 }
  0x66   : > { %1059 = vmatpush1.bf16.msra.mxu0 %v4639_v59  ;;  %v4668_v59 = vld [vmem:[%s6713_s2 + $0x88] ss:$16 sps:$4 sm:$0xff]  }
  0x67   : > { %1100 = vmatpush1.bf16.msra.mxu1 %v4644_v61  ;;  %7088 = vst [vmem:[#allocation51_spill] sm:$0xff] %v4668_v59  ;;  %1060 = vmatprep.subr.bf16.mxu0 %v4653_v35  ;;  %v4677_v61 = vld [vmem:[%s6713_s2 + $0xa4] ss:$16 sps:$4 sm:$0xff]   ;;  %v4687_v35 = vld [vmem:[%s6713_s2 + $0xa0] ss:$16 sps:$4 sm:$0xff]  }
  0x68   : > { %1101 = vmatprep.subr.bf16.mxu1 %v4658_v63  ;;  %7089 = vst [vmem:[#allocation52_spill] sm:$0xff] %v4677_v61  ;;  %7091 = vst [vmem:[#allocation54_spill] sm:$0xff] %v4687_v35  ;;  %v4706_v63 = vld [vmem:[%s6713_s2 + $0xcc] ss:$16 sps:$4 sm:$0xff]  }
  0x69   : > { %7094 = vst [vmem:[#allocation57_spill] sm:$0xff] %v4706_v63 }
  0x6a   : > { %1061 = vmatpush1.bf16.msra.mxu0 %v4663_v32  ;;  %v4692_v32 = vld [vmem:[%s6713_s2 + $0xa8] ss:$16 sps:$4 sm:$0xff]  }
  0x6b   : > { %1102 = vmatpush1.bf16.msra.mxu1 %v4668_v59  ;;  %7092 = vst [vmem:[#allocation55_spill] sm:$0xff] %v4692_v32  ;;  %1062 = vmatprep.subr.bf16.mxu0 %v4677_v61  ;;  %v4701_v59 = vld [vmem:[%s6713_s2 + $0xc4] ss:$16 sps:$4 sm:$0xff]   ;;  %v4711_v61 = vld [vmem:[%s6713_s2 + $0xc0] ss:$16 sps:$4 sm:$0xff]  }
  0x6c   : > { %1103 = vmatprep.subr.bf16.mxu1 %v4682_v3  ;;  %7093 = vst [vmem:[#allocation56_spill] sm:$0xff] %v4701_v59  ;;  %7095 = vst [vmem:[#allocation58_spill] sm:$0xff] %v4711_v61  ;;  %v4730_v3 = vld [vmem:[%s6713_s2 + $0xec] ss:$16 sps:$4 sm:$0xff]  }
  0x6d   : > { %7098 = vst [vmem:[#allocation61_spill] sm:$0xff] %v4730_v3 }
  0x6e   : > { %1063 = vmatpush1.bf16.msra.mxu0 %v4687_v35  ;;  %v4716_v35 = vld [vmem:[%s6713_s2 + $0xc8] ss:$16 sps:$4 sm:$0xff]  }
  0x6f   : > { %1104 = vmatpush1.bf16.msra.mxu1 %v4692_v32  ;;  %7096 = vst [vmem:[#allocation59_spill] sm:$0xff] %v4716_v35  ;;  %1064 = vmatprep.subr.bf16.mxu0 %v4701_v59  ;;  %v4725_v32 = vld [vmem:[%s6713_s2 + $0xe4] ss:$16 sps:$4 sm:$0xff]   ;;  %v4735_v59 = vld [vmem:[%s6713_s2 + $0xe0] ss:$16 sps:$4 sm:$0xff]  }
  0x70   : > { %1105 = vmatprep.subr.bf16.mxu1 %v4706_v63  ;;  %7097 = vst [vmem:[#allocation60_spill] sm:$0xff] %v4725_v32  ;;  %7099 = vst [vmem:[#allocation62_spill] sm:$0xff] %v4735_v59 }
  0x72   : > { %1065 = vmatpush1.bf16.msra.mxu0 %v4711_v61 }
  0x73   : > { %1106 = vmatpush1.bf16.msra.mxu1 %v4716_v35  ;;  %v4740_v35 = vld [vmem:[%s6713_s2 + $0xe8] ss:$16 sps:$4 sm:$0xff]   ;;  %1066 = vmatprep.subr.bf16.mxu0 %v4725_v32 }
  0x74   : > { %7100 = vst [vmem:[#allocation63_spill] sm:$0xff] %v4740_v35  ;;  %1107 = vmatprep.subr.bf16.mxu1 %v4730_v3 }
  0x76   : > { %1067 = vmatpush1.bf16.msra.mxu0 %v4735_v59  ;;  %v622_v59 = vld [vmem:[%s4161_s30] sm:$0xff] }
  0x77   : > { %1108 = vmatpush1.bf16.msra.mxu1 %v4740_v35  ;;  %1178 = vmatprep.subr.bf16.mxu0 %v4167_v1 }
  0x78   : > { %1219 = vmatprep.subr.bf16.mxu1 %v4186_v5 }
 0x10b   : > { %v4748_v61 = vpop.f32.mrb[0].mxu0  ;;  %v4752_v57 = vpop.f32.mrb[0].mxu1 }
 0x10c   : > { %v4750_v63 = vpop.f32.mrb[1].mxu0  ;;  %v4754_v32 = vpop.f32.mrb[1].mxu1 }
 0x10d   : > { %v578_v0 = vpop.f32.mrb[2].mxu0  ;;  %v619_v3 = vpop.f32.mrb[2].mxu1 }
 0x10e   : > { %v579_v60 = vpop.f32.mrb[3].mxu0  ;;  %v620_v58 = vpop.f32.mrb[3].mxu1  ;;  %v625_v3 = vld [vmem:[%s4161_s30 + $0x18] sm:$0xff] }
 0x12b   : > { %v821_v35 = vpop.f32.mrb[4].mxu0 }
 0x12c   : > { %v869_v56 = vadd.f32 %v821_v35, %v622_v59  ;;  %v823_v1 = vpop.f32.mrb[5].mxu0  ;;  %v862_v48 = vpop.f32.mrb[4].mxu1 }
 0x12d   : > { %v870_v5 = vadd.f32 %v823_v1, %v623_v55  ;;  %v825_v54 = vpop.f32.mrb[6].mxu0  ;;  %v871_v60 = vadd.f32 %v862_v48, %v624_v53  ;;  %v864_v51 = vpop.f32.mrb[5].mxu1 }
 0x12e   : > { %v873_v50 = vmul.f32 0.5, %v869_v56  ;;  %v826_v52 = vpop.f32.mrb[7].mxu0  ;;  %v866_v47 = vpop.f32.mrb[6].mxu1  ;;  %v872_v49 = vadd.f32 %v864_v51, %v625_v3 }
 0x12f   : > { %v877_v0 = vmul.f32 0.5, %v870_v5  ;;  %v867_v58 = vpop.f32.mrb[7].mxu1  ;;  %v376_v52 = vld [vmem:[#allocation3] sm:$0xff] }
 0x130   : > { %3735 = vtanh.f32 %v873_v50  ;;  %v882_v44 = vmul.f32 0.5, %v872_v49 }
 0x131   : > { %3737 = vtanh.f32 %v877_v0 }
 0x132   : > { %3739 = vtanh.f32 %v871_v60 }
 0x133   : > { %3741 = vtanh.f32 %v882_v44 }
 0x13a   : > { %v3736_v46 = vpop.eup %3735 }
 0x13b   : > { %v3738_v35 = vpop.eup %3737  ;;  %v875_v59 = vmul.f32 0.5, %v3736_v46 }
 0x13c   : > { %v3740_v43 = vpop.eup %3739  ;;  %v879_v1 = vmul.f32 0.5, %v3738_v35 }
 0x13d   : > { %v876_v54 = vadd.f32 0.5, %v875_v59  ;;  %v3742_v47 = vpop.eup %3741 }
 0x13e   : > { %v880_v55 = vadd.f32 0.5, %v879_v1  ;;  %v884_v50 = vmul.f32 0.5, %v3742_v47 }
 0x13f   : > { %v887_v5 = vmul.f32 %v3740_v43, %v876_v54 }
 0x140   : > { %v886_v48 = vmul.f32 %v880_v55, %v376_v52  ;;  %v885_v56 = vadd.f32 0.5, %v884_v50  ;;  %v378_v52 = vld [vmem:[#allocation5] sm:$0xff] }
 0x142   : > { %v4760_v53 = vadd.f32 %v887_v5, %v886_v48 }
 0x144   : > { %3743 = vtanh.f32 %v4760_v53 }
 0x14e   : > { %v3744_v51 = vpop.eup %3743 }
 0x14f   : > { %v890_v49 = vmul.f32 %v3744_v51, %v885_v56 }
 0x151   : > { %v4763_v0 = vpack.c.bf16 %v890_v49, %v890_v49 }
 0x153   : > { %1085 = vmatmul.mubr.bf16.vlgmr.msra.gmra.mrb[8].mxu0 %v4763_v0  ;;  %1126 = vmatmul.mubr.bf16.vlgmr.msra.gmra.mrb[8].mxu1 %v4763_v0 }
 0x154   : > { %1179 = vmatpush1.bf16.msra.mxu0 %v4172_v2  ;;  %1220 = vmatpush1.bf16.msra.mxu1 %v4196_v7  ;;  %v1135_v2 = vlaneseq  ;;  %v374_v7 = vld [vmem:[%s6715_s4] sm:$0xf] }
 0x155   : > { %1180 = vmatprep.subr.bf16.mxu0 %v4180_v4  ;;  %1221 = vmatprep.subr.bf16.mxu1 %v4208_v9 }
 0x156   : > { %1210 = vmatprep.mubr.bf16.mxu0 %v7068_v62  ;;  %1251 = vmatprep.mubr.bf16.mxu1 %v7068_v62  ;;  %v1136_v4 = vshrl.u32 %v1135_v2, 7 }
 0x158   : > { %1181 = vmatpush1.bf16.msra.mxu0 %v4191_v6  ;;  %1222 = vmatpush1.bf16.msra.mxu1 %v4214_v10  ;;  %v1137_v6 = vsub.s32 0, %v1136_v4  ;;  %v1145_v10 = vsub.s32 2, %v1136_v4 }
 0x159   : > { %1182 = vmatprep.subr.bf16.mxu0 %v4202_v8  ;;  %1223 = vmatprep.subr.bf16.mxu1 %v4232_v13  ;;  %v1141_v8 = vsub.s32 1, %v1136_v4 }
 0x15a   : > { %v4804_v9 = vrot.slane %v374_v7, %v1137_v6 }
 0x15b   : > { %v4806_v13 = vrot.slane %v374_v7, %v1141_v8  ;;  %v7102_v8 = vld [vmem:[#allocation10_spill] sm:$0xff] }
 0x15c   : > { %1183 = vmatpush1.bf16.msra.mxu0 %v4221_v11  ;;  %1224 = vmatpush1.bf16.msra.mxu1 %v4238_v14 }
 0x15d   : > { %1184 = vmatprep.subr.bf16.mxu0 %v4227_v12  ;;  %1225 = vmatprep.subr.bf16.mxu1 %v4250_v16 }
 0x160   : > { %1185 = vmatpush1.bf16.msra.mxu0 %v4245_v15  ;;  %1226 = vmatpush1.bf16.msra.mxu1 %v4267_v19 }
 0x161   : > { %1186 = vmatprep.subr.bf16.mxu0 %v4256_v17  ;;  %1227 = vmatprep.subr.bf16.mxu1 %v4274_v20 }
 0x164   : > { %1187 = vmatpush1.bf16.msra.mxu0 %v4262_v18  ;;  %1228 = vmatpush1.bf16.msra.mxu1 %v4286_v22 }
 0x165   : > { %1188 = vmatprep.subr.bf16.mxu0 %v4280_v21  ;;  %1229 = vmatprep.subr.bf16.mxu1 %v4298_v24 }
 0x168   : > { %1189 = vmatpush1.bf16.msra.mxu0 %v4293_v23  ;;  %1230 = vmatpush1.bf16.msra.mxu1 %v4315_v27  ;;  %v4813_v23 = vrot.slane %v374_v7, %v1145_v10  ;;  %v7103_v10 = vld [vmem:[#allocation9_spill] sm:$0xff] }
 0x169   : > { %1190 = vmatprep.subr.bf16.mxu0 %v4304_v25  ;;  %1231 = vmatprep.subr.bf16.mxu1 %v4322_v28  ;;  %v1149_v25 = vsub.s32 3, %v1136_v4 }
 0x16b   : > { %v4817_v3 = vrot.slane %v374_v7, %v1149_v25  ;;  %v7101_v7 = vld [vmem:[#allocation8_spill] sm:$0xff]  ;;  %v7119_v25 = vld [vmem:[#allocation25_spill] sm:$0xff] }
 0x16c   : > { %1191 = vmatpush1.bf16.msra.mxu0 %v4310_v26  ;;  %1232 = vmatpush1.bf16.msra.mxu1 %v4339_v31 }
 0x16d   : > { %1192 = vmatprep.subr.bf16.mxu0 %v4328_v29  ;;  %1233 = vmatprep.subr.bf16.mxu1 %v4346_v33 }
 0x170   : > { %1193 = vmatpush1.bf16.msra.mxu0 %v4333_v30  ;;  %1234 = vmatpush1.bf16.msra.mxu1 %v4358_v36 }
 0x171   : > { %1265 = vmatprep.subr.bf16.mxu0 %v4352_v34  ;;  %1306 = vmatprep.subr.bf16.mxu1 %v4370_v38 }
 0x226   : > { %v1086_v11 = vpop.f32.mrb[8].mxu0  ;;  %v1127_v12 = vpop.f32.mrb[8].mxu1 }
 0x227   : > { %v1087_v14 = vadd.f32 %v1086_v11, %v4748_v61  ;;  %v1128_v15 = vadd.f32 %v1127_v12, %v4752_v57  ;;  %v1088_v16 = vpop.f32.mrb[9].mxu0  ;;  %v1129_v17 = vpop.f32.mrb[9].mxu1  ;;  %v7107_v11 = vld [vmem:[#allocation12_spill] sm:$0xff] }
 0x228   : > { %v1089_v18 = vadd.f32 %v1088_v16, %v4750_v63  ;;  %v1130_v19 = vadd.f32 %v1129_v17, %v4754_v32  ;;  %v1090_v20 = vpop.f32.mrb[10].mxu0  ;;  %v1131_v21 = vpop.f32.mrb[10].mxu1  ;;  %v7108_v12 = vld [vmem:[#allocation16_spill] sm:$0xff]  ;;  %v7113_v17 = vld [vmem:[#allocation19_spill] sm:$0xff] }
 0x229   : > { %v1155_v22 = vadd.f32 %v4804_v9, %v1087_v14  ;;  %v1091_v43 = vpop.f32.mrb[11].mxu0  ;;  %v1132_v44 = vpop.f32.mrb[11].mxu1  ;;  %v1157_v57 = vadd.f32 %v4813_v23, %v1128_v15  ;;  %v7109_v14 = vld [vmem:[#allocation14_spill] sm:$0xff]  ;;  %v7111_v15 = vld [vmem:[#allocation17_spill] sm:$0xff]  ;;  %v7112_v16 = vld [vmem:[#allocation20_spill] sm:$0xff] }
 0x22a   : > { %v1156_v46 = vadd.f32 %v4806_v13, %v1089_v18  ;;  %v1158_v63 = vadd.f32 %v4817_v3, %v1130_v19  ;;  %v7114_v18 = vld [vmem:[#allocation22_spill] sm:$0xff]  ;;  %v7115_v19 = vld [vmem:[#allocation21_spill] sm:$0xff]  ;;  %v7116_v20 = vld [vmem:[#allocation24_spill] sm:$0xff] }
 0x22b   : > { %v1159_v61 = vmul.f32 0.5, %v1155_v22  ;;  %v7117_v21 = vld [vmem:[#allocation23_spill] sm:$0xff]  ;;  %v7118_v22 = vld [vmem:[#allocation26_spill] sm:$0xff]  ;;  %v7120_v43 = vld [vmem:[#allocation28_spill] sm:$0xff] }
 0x22c   : > { %v1163_v60 = vmul.f32 0.5, %v1156_v46  ;;  %v1168_v32 = vmul.f32 0.5, %v1158_v63  ;;  %v7121_v44 = vld [vmem:[#allocation27_spill] sm:$0xff]  ;;  %v7122_v46 = vld [vmem:[#allocation30_spill] sm:$0xff]  ;;  %v7126_v63 = vld [vmem:[#allocation33_spill] sm:$0xff] }
 0x22d   : > { %3745 = vtanh.f32 %v1159_v61  ;;  %v7123_v61 = vld [vmem:[#allocation29_spill] sm:$0xff] }
 0x22e   : > { %3747 = vtanh.f32 %v1163_v60  ;;  %v7124_v60 = vld [vmem:[#allocation31_spill] sm:$0xff] }
 0x22f   : > { %3749 = vtanh.f32 %v1157_v57  ;;  %v7125_v57 = vld [vmem:[#allocation32_spill] sm:$0xff] }
 0x230   : > { %3751 = vtanh.f32 %v1168_v32  ;;  %v7127_v32 = vld [vmem:[#allocation34_spill] sm:$0xff] }
 0x237   : > { %v3746_v58 = vpop.eup %3745 }
 0x238   : > { %v3748_v35 = vpop.eup %3747  ;;  %v1161_v59 = vmul.f32 0.5, %v3746_v58  ;;  %v7128_v58 = vld [vmem:[#allocation35_spill] sm:$0xff] }
 0x239   : > { %v1165_v1 = vmul.f32 0.5, %v3748_v35  ;;  %v3750_v55 = vpop.eup %3749  ;;  %v7129_v35 = vld [vmem:[#allocation36_spill] sm:$0xff] }
 0x23a   : > { %v1162_v54 = vadd.f32 0.5, %v1161_v59  ;;  %v3752_v56 = vpop.eup %3751  ;;  %v7130_v59 = vld [vmem:[#allocation37_spill] sm:$0xff] }
 0x23b   : > { %v1166_v5 = vadd.f32 0.5, %v1165_v1  ;;  %v1170_v51 = vmul.f32 0.5, %v3752_v56  ;;  %v7131_v1 = vld [vmem:[#allocation38_spill] sm:$0xff] }
 0x23c   : > { %v1173_v48 = vmul.f32 %v3750_v55, %v1162_v54  ;;  %v7132_v54 = vld [vmem:[#allocation39_spill] sm:$0xff]  ;;  %v7134_v55 = vld [vmem:[#allocation41_spill] sm:$0xff]  ;;  %v7139_v56 = vld [vmem:[#allocation46_spill] sm:$0xff] }
 0x23d   : > { %v1172_v47 = vmul.f32 %v1166_v5, %v378_v52  ;;  %v1171_v49 = vadd.f32 0.5, %v1170_v51  ;;  %v7133_v52 = vld [vmem:[#allocation40_spill] sm:$0xff]  ;;  %v7136_v5 = vld [vmem:[#allocation43_spill] sm:$0xff] }
 0x23e   : > { %v7140_v51 = vld [vmem:[#allocation47_spill] sm:$0xff] }
 0x23f   : > { %v4820_v50 = vadd.f32 %v1173_v48, %v1172_v47  ;;  %v7137_v48 = vld [vmem:[#allocation44_spill] sm:$0xff]  ;;  %v7138_v47 = vld [vmem:[#allocation45_spill] sm:$0xff] }
 0x241   : > { %3753 = vtanh.f32 %v4820_v50 }
 0x24b   : > { %v3754_v2 = vpop.eup %3753 }
 0x24c   : > { %v1176_v4 = vmul.f32 %v3754_v2, %v1171_v49  ;;  %v7141_v49 = vld [vmem:[#allocation48_spill] sm:$0xff]  ;;  %v7142_v2 = vld [vmem:[#allocation49_spill] sm:$0xff] }
 0x24e   : > { %v1177_v6 = vpack.c.bf16 %v1176_v4, %v1176_v4  ;;  %v7143_v4 = vld [vmem:[#allocation50_spill] sm:$0xff] }
 0x250   : > { %1211 = vmatmul.mubr.bf16.vlgmr.msra.gmra.mrb[12].mxu0 %v1177_v6  ;;  %1252 = vmatmul.mubr.bf16.vlgmr.msra.gmra.mrb[12].mxu1 %v1177_v6  ;;  %v7144_v6 = vld [vmem:[#allocation51_spill] sm:$0xff] }
 0x251   : > { %1266 = vmatpush1.bf16.msra.mxu0 %v4363_v37  ;;  %1307 = vmatpush1.bf16.msra.mxu1 %v4382_v40  ;;  %v7104_v37 = vld [vmem:[#allocation13_spill] sm:$0xff]  ;;  %v7105_v40 = vld [vmem:[#allocation11_spill] sm:$0xff] }
 0x252   : > { %1267 = vmatprep.subr.bf16.mxu0 %v4376_v39  ;;  %1308 = vmatprep.subr.bf16.mxu1 %v4394_v42  ;;  %v7106_v39 = vld [vmem:[#allocation15_spill] sm:$0xff] }
 0x253   : > { %1297 = vmatprep.mubr.bf16.mxu0 %v7068_v62  ;;  %1338 = vmatprep.mubr.bf16.mxu1 %v7068_v62 }
 0x255   : > { %1268 = vmatpush1.bf16.msra.mxu0 %v4389_v41  ;;  %1309 = vmatpush1.bf16.msra.mxu1 %v4412_v45  ;;  %v7110_v41 = vld [vmem:[#allocation18_spill] sm:$0xff] }
 0x256   : > { %1269 = vmatprep.subr.bf16.mxu0 %v7101_v7  ;;  %1310 = vmatprep.subr.bf16.mxu1 %v7102_v8  ;;  %v7145_v7 = vld [vmem:[#allocation52_spill] sm:$0xff] }
 0x259   : > { %1270 = vmatpush1.bf16.msra.mxu0 %v7103_v10  ;;  %1311 = vmatpush1.bf16.msra.mxu1 %v7104_v37 }
 0x25a   : > { %1271 = vmatprep.subr.bf16.mxu0 %v7105_v40  ;;  %1312 = vmatprep.subr.bf16.mxu1 %v7106_v39 }
 0x25d   : > { %1272 = vmatpush1.bf16.msra.mxu0 %v7107_v11  ;;  %1313 = vmatpush1.bf16.msra.mxu1 %v7108_v12 }
 0x25e   : > { %1273 = vmatprep.subr.bf16.mxu0 %v7109_v14  ;;  %1314 = vmatprep.subr.bf16.mxu1 %v7110_v41 }
 0x261   : > { %1274 = vmatpush1.bf16.msra.mxu0 %v7111_v15  ;;  %1315 = vmatpush1.bf16.msra.mxu1 %v7112_v16 }
 0x262   : > { %1275 = vmatprep.subr.bf16.mxu0 %v7113_v17  ;;  %1316 = vmatprep.subr.bf16.mxu1 %v7114_v18 }
 0x265   : > { %1276 = vmatpush1.bf16.msra.mxu0 %v7115_v19  ;;  %1317 = vmatpush1.bf16.msra.mxu1 %v7116_v20 }
 0x266   : > { %1277 = vmatprep.subr.bf16.mxu0 %v7117_v21  ;;  %1318 = vmatprep.subr.bf16.mxu1 %v7118_v22 }
 0x269   : > { %1278 = vmatpush1.bf16.msra.mxu0 %v7119_v25  ;;  %1319 = vmatpush1.bf16.msra.mxu1 %v7120_v43 }
 0x26a   : > { %1279 = vmatprep.subr.bf16.mxu0 %v7121_v44  ;;  %1320 = vmatprep.subr.bf16.mxu1 %v7122_v46 }
 0x26d   : > { %1280 = vmatpush1.bf16.msra.mxu0 %v7123_v61  ;;  %1321 = vmatpush1.bf16.msra.mxu1 %v7124_v60 }
 0x26e   : > { %1370 = vmatprep.subr.bf16.mxu0 %v7125_v57  ;;  %1411 = vmatprep.subr.bf16.mxu1 %v7126_v63 }
 0x270   : > { %1298 = vmatmul.mubr.bf16.vlgmr.msra.gmra.mrb[16].mxu0 %v4763_v0  ;;  %1339 = vmatmul.mubr.bf16.vlgmr.msra.gmra.mrb[16].mxu1 %v4763_v0  ;;  %v7135_v0 = vld [vmem:[#allocation42_spill] sm:$0xff] }
 0x271   : > { %1371 = vmatpush1.bf16.msra.mxu0 %v7127_v32  ;;  %1412 = vmatpush1.bf16.msra.mxu1 %v7128_v58 }
 0x272   : > { %1372 = vmatprep.subr.bf16.mxu0 %v7129_v35  ;;  %1413 = vmatprep.subr.bf16.mxu1 %v7130_v59  ;;  %v3511_v59 = vld [vmem:[%s4161_s30 + $0x30] sm:$0xff] }
 0x273   : > { %1402 = vmatprep.mubr.bf16.mxu0 %v7068_v62  ;;  %1443 = vmatprep.mubr.bf16.mxu1 %v7068_v62 }
 0x275   : > { %1373 = vmatpush1.bf16.msra.mxu0 %v7131_v1  ;;  %1414 = vmatpush1.bf16.msra.mxu1 %v7132_v54 }
 0x276   : > { %1374 = vmatprep.subr.bf16.mxu0 %v7133_v52  ;;  %1415 = vmatprep.subr.bf16.mxu1 %v7134_v55  ;;  %v3510_v52 = vld [vmem:[%s4161_s30 + $0x28] sm:$0xff] }
 0x279   : > { %1375 = vmatpush1.bf16.msra.mxu0 %v7135_v0  ;;  %1416 = vmatpush1.bf16.msra.mxu1 %v7136_v5  ;;  %v7146_v0 = vld [vmem:[#allocation53_spill] sm:$0xff]  ;;  %v7147_v5 = vld [vmem:[#allocation54_spill] sm:$0xff] }
 0x27a   : > { %1376 = vmatprep.subr.bf16.mxu0 %v7137_v48  ;;  %1417 = vmatprep.subr.bf16.mxu1 %v7138_v47  ;;  %v7148_v48 = vld [vmem:[#allocation55_spill] sm:$0xff]  ;;  %v7149_v47 = vld [vmem:[#allocation56_spill] sm:$0xff] }
 0x27d   : > { %1377 = vmatpush1.bf16.msra.mxu0 %v7139_v56  ;;  %1418 = vmatpush1.bf16.msra.mxu1 %v7140_v51  ;;  %v7150_v56 = vld [vmem:[#allocation57_spill] sm:$0xff]  ;;  %v7151_v51 = vld [vmem:[#allocation58_spill] sm:$0xff] }
 0x27e   : > { %1378 = vmatprep.subr.bf16.mxu0 %v7141_v49  ;;  %1419 = vmatprep.subr.bf16.mxu1 %v7142_v2  ;;  %v7152_v49 = vld [vmem:[#allocation59_spill] sm:$0xff] }
 0x281   : > { %1379 = vmatpush1.bf16.msra.mxu0 %v7143_v4  ;;  %1420 = vmatpush1.bf16.msra.mxu1 %v7144_v6  ;;  %v7153_v4 = vld [vmem:[#allocation60_spill] sm:$0xff]  ;;  %v7154_v6 = vld [vmem:[#allocation61_spill] sm:$0xff] }
 0x282   : > { %1380 = vmatprep.subr.bf16.mxu0 %v7145_v7  ;;  %1421 = vmatprep.subr.bf16.mxu1 %v7146_v0  ;;  %v7155_v7 = vld [vmem:[#allocation62_spill] sm:$0xff]  ;;  %v7156_v0 = vld [vmem:[#allocation63_spill] sm:$0xff] }
 0x285   : > { %1381 = vmatpush1.bf16.msra.mxu0 %v7147_v5  ;;  %1422 = vmatpush1.bf16.msra.mxu1 %v7148_v48  ;;  %v7157_v5 = vld [vmem:[#allocation6_spill] sm:$0xff]  ;;  %v7158_v48 = vld [vmem:[#allocation7_spill] sm:$0xff] }
 0x286   : > { %1382 = vmatprep.subr.bf16.mxu0 %v7149_v47  ;;  %1423 = vmatprep.subr.bf16.mxu1 %v7150_v56 }
 0x289   : > { %1383 = vmatpush1.bf16.msra.mxu0 %v7151_v51  ;;  %1424 = vmatpush1.bf16.msra.mxu1 %v7152_v49 }
 0x28a   : > { %1384 = vmatprep.subr.bf16.mxu0 %v7153_v4  ;;  %1425 = vmatprep.subr.bf16.mxu1 %v7154_v6 }
 0x28d   : > { %1385 = vmatpush1.bf16.msra.mxu0 %v7155_v7  ;;  %1426 = vmatpush1.bf16.msra.mxu1 %v7156_v0  ;;  %v3509_v7 = vld [vmem:[%s4161_s30 + $0x20] sm:$0xff] }
 0x28e   : > { %1475 = vmatprep.subr.bf16.mxu0 %v7157_v5  ;;  %1516 = vmatprep.subr.bf16.mxu1 %v7158_v48 }
 0x323   : > { %v4893_v56 = vpop.f32.mrb[12].mxu0  ;;  %v4895_v51 = vpop.f32.mrb[12].mxu1 }
 0x324   : > { %v4897_v47 = vpop.f32.mrb[13].mxu0  ;;  %v4899_v49 = vpop.f32.mrb[13].mxu1 }
 0x325   : > { %v1216_v4 = vpop.f32.mrb[14].mxu0  ;;  %v1257_v2 = vpop.f32.mrb[14].mxu1 }
 0x326   : > { %v1217_v6 = vpop.f32.mrb[15].mxu0  ;;  %v1258_v55 = vpop.f32.mrb[15].mxu1 }
 0x327   : > { %v3512_v55 = vld [vmem:[%s4161_s30 + $0x38] sm:$0xff] }
 0x343   : > { %v1299_v0 = vpop.f32.mrb[16].mxu0  ;;  %v1340_v5 = vpop.f32.mrb[16].mxu1 }
 0x344   : > { %v1347_v54 = vadd.f32 %v3509_v7, %v1299_v0  ;;  %v1301_v48 = vpop.f32.mrb[17].mxu0  ;;  %v1342_v1 = vpop.f32.mrb[17].mxu1  ;;  %v1349_v2 = vadd.f32 %v3511_v59, %v1340_v5  ;;  %v4942_v5 = vld [vmem:[%s6714_s3 + $0x20] ss:$16 sps:$4 sm:$0xff]  }
 0x345   : > { %v1348_v35 = vadd.f32 %v3510_v52, %v1301_v48  ;;  %v1303_v58 = vpop.f32.mrb[18].mxu0  ;;  %v1344_v32 = vpop.f32.mrb[18].mxu1  ;;  %v1350_v4 = vadd.f32 %v3512_v55, %v1342_v1  ;;  %v4948_v48 = vld [vmem:[%s6714_s3 + $0x28] ss:$16 sps:$4 sm:$0xff]   ;;  %v4960_v55 = vld [vmem:[%s6714_s3 + $0x4c] ss:$16 sps:$4 sm:$0xff]  }
 0x346   : > { %v1351_v63 = vmul.f32 0.5, %v1347_v54  ;;  %v1304_v57 = vpop.f32.mrb[19].mxu0  ;;  %v1345_v60 = vpop.f32.mrb[19].mxu1 }
 0x347   : > { %v1355_v61 = vmul.f32 0.5, %v1348_v35  ;;  %v1360_v6 = vmul.f32 0.5, %v1350_v4  ;;  %v4966_v4 = vld [vmem:[%s6714_s3 + $0x40] ss:$16 sps:$4 sm:$0xff]  }
 0x348   : > { %3755 = vtanh.f32 %v1351_v63 }
 0x349   : > { %3757 = vtanh.f32 %v1355_v61 }
 0x34a   : > { %3759 = vtanh.f32 %v1349_v2  ;;  %v4954_v2 = vld [vmem:[%s6714_s3 + $0x44] ss:$16 sps:$4 sm:$0xff]  }
 0x34b   : > { %3761 = vtanh.f32 %v1360_v6  ;;  %v4972_v6 = vld [vmem:[%s6714_s3 + $0x48] ss:$16 sps:$4 sm:$0xff]  }
 0x352   : > { %v3756_v46 = vpop.eup %3755 }
 0x353   : > { %v3758_v44 = vpop.eup %3757  ;;  %v1353_v0 = vmul.f32 0.5, %v3756_v46  ;;  %v4934_v46 = vld [vmem:[%s6714_s3 + $0x2c] ss:$16 sps:$4 sm:$0xff]  }
 0x354   : > { %v1357_v7 = vmul.f32 0.5, %v3758_v44  ;;  %v3760_v52 = vpop.eup %3759  ;;  %v4928_v44 = vld [vmem:[%s6714_s3 + $0x24] ss:$16 sps:$4 sm:$0xff]  }
 0x355   : > { %v1354_v43 = vadd.f32 0.5, %v1353_v0  ;;  %v3762_v61 = vpop.eup %3761  ;;  %v4978_v0 = vld [vmem:[%s6714_s3 + $0x64] ss:$16 sps:$4 sm:$0xff]  }
 0x356   : > { %v1358_v58 = vadd.f32 0.5, %v1357_v7  ;;  %v1362_v63 = vmul.f32 0.5, %v3762_v61  ;;  %v4984_v7 = vld [vmem:[%s6714_s3 + $0x6c] ss:$16 sps:$4 sm:$0xff]   ;;  %v5014_v61 = vld [vmem:[%s6714_s3 + $0x80] ss:$16 sps:$4 sm:$0xff]  }
 0x357   : > { %v1365_v32 = vmul.f32 %v3760_v52, %v1354_v43  ;;  %v4916_v43 = vld [vmem:[%s6714_s3] ss:$16 sps:$4 sm:$0xff]   ;;  %7159 = vst [vmem:[#allocation8_spill] sm:$0xff] %v5014_v61 }
 0x358   : > { %v1364_v57 = vmul.f32 %v1358_v58, %v4760_v53  ;;  %v1363_v35 = vadd.f32 0.5, %v1362_v63  ;;  %v4922_v53 = vld [vmem:[%s6714_s3 + $0x8] ss:$16 sps:$4 sm:$0xff]   ;;  %v4990_v52 = vld [vmem:[%s6714_s3 + $0x60] ss:$16 sps:$4 sm:$0xff]  }
 0x359   : > { %v4996_v58 = vld [vmem:[%s6714_s3 + $0x68] ss:$16 sps:$4 sm:$0xff]  }
 0x35a   : > { %v4906_v60 = vadd.f32 %v1365_v32, %v1364_v57  ;;  %v5002_v32 = vld [vmem:[%s6714_s3 + $0x84] ss:$16 sps:$4 sm:$0xff]   ;;  %v5008_v57 = vld [vmem:[%s6714_s3 + $0x8c] ss:$16 sps:$4 sm:$0xff]   ;;  %v5020_v63 = vld [vmem:[%s6714_s3 + $0x88] ss:$16 sps:$4 sm:$0xff]  }
 0x35b   : > { %7160 = vst [vmem:[#allocation10_spill] sm:$0xff] %v5020_v63 }
 0x35c   : > { %3763 = vtanh.f32 %v4906_v60 }
 0x366   : > { %v3764_v59 = vpop.eup %3763 }
 0x367   : > { %v1368_v1 = vmul.f32 %v3764_v59, %v1363_v35  ;;  %v5026_v35 = vld [vmem:[%s6714_s3 + $0xa4] ss:$16 sps:$4 sm:$0xff]   ;;  %v5033_v59 = vld [vmem:[%s6714_s3 + $0xa0] ss:$16 sps:$4 sm:$0xff]  }
 0x368   : > { %7161 = vst [vmem:[#allocation9_spill] sm:$0xff] %v5026_v35  ;;  %7162 = vst [vmem:[#allocation13_spill] sm:$0xff] %v5033_v59 }
 0x369   : > { %v4909_v54 = vpack.c.bf16 %v1368_v1, %v1368_v1  ;;  %v5040_v1 = vld [vmem:[%s6714_s3 + $0xc4] ss:$16 sps:$4 sm:$0xff]  }
 0x36a   : > { %7163 = vst [vmem:[#allocation11_spill] sm:$0xff] %v5040_v1 }
 0x36b   : > { %1403 = vmatmul.mubr.bf16.vlgmr.msra.gmra.mrb[20].mxu0 %v4909_v54  ;;  %1444 = vmatmul.mubr.bf16.vlgmr.msra.gmra.mrb[20].mxu1 %v4909_v54 }
 0x36c   : > { %1476 = vmatpush1.bf16.msra.mxu0 %v4916_v43  ;;  %1517 = vmatpush1.bf16.msra.mxu1 %v4922_v53 }
 0x36d   : > { %1477 = vmatprep.subr.bf16.mxu0 %v4928_v44  ;;  %1518 = vmatprep.subr.bf16.mxu1 %v4934_v46 }
 0x36e   : > { %1507 = vmatprep.mubr.bf16.mxu0 %v7068_v62  ;;  %1548 = vmatprep.mubr.bf16.mxu1 %v7068_v62 }
 0x370   : > { %1478 = vmatpush1.bf16.msra.mxu0 %v4942_v5  ;;  %1519 = vmatpush1.bf16.msra.mxu1 %v4948_v48 }
 0x371   : > { %1479 = vmatprep.subr.bf16.mxu0 %v4954_v2  ;;  %1520 = vmatprep.subr.bf16.mxu1 %v4960_v55 }
 0x374   : > { %1480 = vmatpush1.bf16.msra.mxu0 %v4966_v4  ;;  %1521 = vmatpush1.bf16.msra.mxu1 %v4972_v6 }
 0x375   : > { %1481 = vmatprep.subr.bf16.mxu0 %v4978_v0  ;;  %1522 = vmatprep.subr.bf16.mxu1 %v4984_v7 }
 0x378   : > { %1482 = vmatpush1.bf16.msra.mxu0 %v4990_v52  ;;  %1523 = vmatpush1.bf16.msra.mxu1 %v4996_v58 }
 0x379   : > { %1483 = vmatprep.subr.bf16.mxu0 %v5002_v32  ;;  %1524 = vmatprep.subr.bf16.mxu1 %v5008_v57 }
 0x37c   : > { %1484 = vmatpush1.bf16.msra.mxu0 %v5014_v61  ;;  %1525 = vmatpush1.bf16.msra.mxu1 %v5020_v63 }
 0x37d   : > { %1485 = vmatprep.subr.bf16.mxu0 %v5026_v35  ;;  %1526 = vmatprep.subr.bf16.mxu1 %v4298_v24 }
 0x380   : > { %1486 = vmatpush1.bf16.msra.mxu0 %v5033_v59  ;;  %1527 = vmatpush1.bf16.msra.mxu1 %v4315_v27 }
 0x381   : > { %1487 = vmatprep.subr.bf16.mxu0 %v5040_v1  ;;  %1528 = vmatprep.subr.bf16.mxu1 %v4322_v28 }
 0x384   : > { %1488 = vmatpush1.bf16.msra.mxu0 %v4310_v26  ;;  %1529 = vmatpush1.bf16.msra.mxu1 %v4339_v31 }
 0x385   : > { %1489 = vmatprep.subr.bf16.mxu0 %v4328_v29  ;;  %1530 = vmatprep.subr.bf16.mxu1 %v4346_v33 }
 0x388   : > { %1490 = vmatpush1.bf16.msra.mxu0 %v4333_v30  ;;  %1531 = vmatpush1.bf16.msra.mxu1 %v4358_v36 }
 0x389   : > { %1562 = vmatprep.subr.bf16.mxu0 %v4352_v34  ;;  %1603 = vmatprep.subr.bf16.mxu1 %v4370_v38 }
 0x43e   : > { %v1404_v24 = vpop.f32.mrb[20].mxu0  ;;  %v1445_v27 = vpop.f32.mrb[20].mxu1 }
 0x43f   : > { %v1405_v28 = vadd.f32 %v1404_v24, %v4893_v56  ;;  %v1446_v26 = vadd.f32 %v1445_v27, %v4895_v51  ;;  %v1406_v1 = vpop.f32.mrb[21].mxu0  ;;  %v1447_v31 = vpop.f32.mrb[21].mxu1 }
 0x440   : > { %v1407_v29 = vadd.f32 %v1406_v1, %v4897_v47  ;;  %v1448_v33 = vadd.f32 %v1447_v31, %v4899_v49  ;;  %v1408_v59 = vpop.f32.mrb[22].mxu0  ;;  %v1449_v30 = vpop.f32.mrb[22].mxu1 }
 0x441   : > { %v1452_v36 = vadd.f32 %v1405_v28, %v4804_v9  ;;  %v1409_v35 = vpop.f32.mrb[23].mxu0  ;;  %v1450_v34 = vpop.f32.mrb[23].mxu1  ;;  %v1454_v56 = vadd.f32 %v1446_v26, %v4813_v23 }
 0x442   : > { %v1453_v38 = vadd.f32 %v1407_v29, %v4806_v13  ;;  %v1455_v51 = vadd.f32 %v1448_v33, %v4817_v3 }
 0x443   : > { %v1456_v63 = vmul.f32 0.5, %v1452_v36 }
 0x444   : > { %v1460_v61 = vmul.f32 0.5, %v1453_v38  ;;  %v1465_v47 = vmul.f32 0.5, %v1455_v51  ;;  %v5067_v38 = vld [vmem:[%s6712_s1] ss:$16 sps:$4 sm:$0xff]  }
 0x445   : > { %3765 = vtanh.f32 %v1456_v63  ;;  %v5088_v51 = vld [vmem:[%s6712_s1 + $0x20] ss:$16 sps:$4 sm:$0xff]  }
 0x446   : > { %3767 = vtanh.f32 %v1460_v61  ;;  %7165 = vst [vmem:[#allocation12_spill] sm:$0xff] %v5088_v51 }
 0x447   : > { %3769 = vtanh.f32 %v1454_v56  ;;  %v5079_v56 = vld [vmem:[%s6712_s1 + $0x24] ss:$16 sps:$4 sm:$0xff]  }
 0x448   : > { %3771 = vtanh.f32 %v1465_v47  ;;  %7164 = vst [vmem:[#allocation15_spill] sm:$0xff] %v5079_v56  ;;  %v5095_v47 = vld [vmem:[%s6712_s1 + $0x44] ss:$16 sps:$4 sm:$0xff]  }
 0x449   : > { %7166 = vst [vmem:[#allocation16_spill] sm:$0xff] %v5095_v47 }
 0x44f   : > { %v3766_v1 = vpop.eup %3765 }
 0x450   : > { %v3768_v49 = vpop.eup %3767  ;;  %v1458_v59 = vmul.f32 0.5, %v3766_v1  ;;  %v7188_v1 = vld [vmem:[#allocation48_spill] sm:$0xff] }
 0x451   : > { %v1462_v24 = vmul.f32 0.5, %v3768_v49  ;;  %v3770_v35 = vpop.eup %3769  ;;  %v7189_v49 = vld [vmem:[#allocation49_spill] sm:$0xff] }
 0x452   : > { %v1459_v27 = vadd.f32 0.5, %v1458_v59  ;;  %v3772_v61 = vpop.eup %3771  ;;  %v7190_v59 = vld [vmem:[#allocation50_spill] sm:$0xff] }
 0x453   : > { %v1463_v28 = vadd.f32 0.5, %v1462_v24  ;;  %v1467_v63 = vmul.f32 0.5, %v3772_v61  ;;  %v7191_v24 = vld [vmem:[#allocation51_spill] sm:$0xff]  ;;  %v7197_v61 = vld [vmem:[#allocation57_spill] sm:$0xff] }
 0x454   : > { %v1470_v31 = vmul.f32 %v3770_v35, %v1459_v27  ;;  %v7192_v27 = vld [vmem:[#allocation52_spill] sm:$0xff]  ;;  %v7193_v35 = vld [vmem:[#allocation53_spill] sm:$0xff] }
 0x455   : > { %v1469_v29 = vmul.f32 %v1463_v28, %v4820_v50  ;;  %v1468_v26 = vadd.f32 0.5, %v1467_v63  ;;  %v5073_v50 = vld [vmem:[%s6712_s1 + $0x8] ss:$16 sps:$4 sm:$0xff]   ;;  %v7194_v28 = vld [vmem:[#allocation54_spill] sm:$0xff] }
 0x456   : > { %v7198_v63 = vld [vmem:[#allocation58_spill] sm:$0xff] }
 0x457   : > { %v5061_v30 = vadd.f32 %v1470_v31, %v1469_v29  ;;  %v7195_v31 = vld [vmem:[#allocation55_spill] sm:$0xff]  ;;  %v7196_v29 = vld [vmem:[#allocation56_spill] sm:$0xff] }
 0x459   : > { %3773 = vtanh.f32 %v5061_v30 }
 0x463   : > { %v3774_v33 = vpop.eup %3773 }
 0x464   : > { %v1473_v36 = vmul.f32 %v3774_v33, %v1468_v26  ;;  %v7199_v26 = vld [vmem:[#allocation59_spill] sm:$0xff]  ;;  %v7200_v33 = vld [vmem:[#allocation60_spill] sm:$0xff] }
 0x466   : > { %v1474_v34 = vpack.c.bf16 %v1473_v36, %v1473_v36  ;;  %v7201_v36 = vld [vmem:[#allocation61_spill] sm:$0xff] }
 0x468   : > { %1508 = vmatmul.mubr.bf16.vlgmr.msra.gmra.mrb[24].mxu0 %v1474_v34  ;;  %1549 = vmatmul.mubr.bf16.vlgmr.msra.gmra.mrb[24].mxu1 %v1474_v34  ;;  %v7202_v34 = vld [vmem:[#allocation62_spill] sm:$0xff] }
 0x469   : > { %1563 = vmatpush1.bf16.msra.mxu0 %v5067_v38  ;;  %1604 = vmatpush1.bf16.msra.mxu1 %v5073_v50 }
 0x46a   : > { %1564 = vmatprep.subr.bf16.mxu0 %v5079_v56  ;;  %1605 = vmatprep.subr.bf16.mxu1 %v4394_v42  ;;  %v7167_v42 = vld [vmem:[#allocation28_spill] sm:$0xff] }
 0x46b   : > { %1594 = vmatprep.mubr.bf16.mxu0 %v7068_v62  ;;  %1635 = vmatprep.mubr.bf16.mxu1 %v7068_v62 }
 0x46d   : > { %1565 = vmatpush1.bf16.msra.mxu0 %v5088_v51  ;;  %1606 = vmatpush1.bf16.msra.mxu1 %v4412_v45  ;;  %v7168_v45 = vld [vmem:[#allocation27_spill] sm:$0xff] }
 0x46e   : > { %1566 = vmatprep.subr.bf16.mxu0 %v5095_v47  ;;  %1607 = vmatprep.subr.bf16.mxu1 %v7102_v8  ;;  %v7169_v8 = vld [vmem:[#allocation30_spill] sm:$0xff] }
 0x471   : > { %1567 = vmatpush1.bf16.msra.mxu0 %v7103_v10  ;;  %1608 = vmatpush1.bf16.msra.mxu1 %v7104_v37  ;;  %v7170_v10 = vld [vmem:[#allocation29_spill] sm:$0xff]  ;;  %v7171_v37 = vld [vmem:[#allocation31_spill] sm:$0xff] }
 0x472   : > { %1568 = vmatprep.subr.bf16.mxu0 %v7105_v40  ;;  %1609 = vmatprep.subr.bf16.mxu1 %v7106_v39  ;;  %v7172_v40 = vld [vmem:[#allocation32_spill] sm:$0xff]  ;;  %v7173_v39 = vld [vmem:[#allocation33_spill] sm:$0xff] }
 0x475   : > { %1569 = vmatpush1.bf16.msra.mxu0 %v7107_v11  ;;  %1610 = vmatpush1.bf16.msra.mxu1 %v7108_v12  ;;  %v7174_v11 = vld [vmem:[#allocation34_spill] sm:$0xff]  ;;  %v7175_v12 = vld [vmem:[#allocation35_spill] sm:$0xff] }
 0x476   : > { %1570 = vmatprep.subr.bf16.mxu0 %v7109_v14  ;;  %1611 = vmatprep.subr.bf16.mxu1 %v7110_v41  ;;  %v7176_v14 = vld [vmem:[#allocation36_spill] sm:$0xff]  ;;  %v7177_v41 = vld [vmem:[#allocation37_spill] sm:$0xff] }
 0x479   : > { %1571 = vmatpush1.bf16.msra.mxu0 %v7111_v15  ;;  %1612 = vmatpush1.bf16.msra.mxu1 %v7112_v16  ;;  %v7178_v15 = vld [vmem:[#allocation38_spill] sm:$0xff]  ;;  %v7179_v16 = vld [vmem:[#allocation39_spill] sm:$0xff] }
 0x47a   : > { %1572 = vmatprep.subr.bf16.mxu0 %v7113_v17  ;;  %1613 = vmatprep.subr.bf16.mxu1 %v7114_v18  ;;  %v7180_v17 = vld [vmem:[#allocation40_spill] sm:$0xff]  ;;  %v7181_v18 = vld [vmem:[#allocation41_spill] sm:$0xff] }
 0x47d   : > { %1573 = vmatpush1.bf16.msra.mxu0 %v7115_v19  ;;  %1614 = vmatpush1.bf16.msra.mxu1 %v7116_v20  ;;  %v7182_v19 = vld [vmem:[#allocation42_spill] sm:$0xff]  ;;  %v7183_v20 = vld [vmem:[#allocation43_spill] sm:$0xff] }
 0x47e   : > { %1574 = vmatprep.subr.bf16.mxu0 %v7117_v21  ;;  %1615 = vmatprep.subr.bf16.mxu1 %v7118_v22  ;;  %v7184_v21 = vld [vmem:[#allocation44_spill] sm:$0xff]  ;;  %v7185_v22 = vld [vmem:[#allocation45_spill] sm:$0xff] }
 0x481   : > { %1575 = vmatpush1.bf16.msra.mxu0 %v7119_v25  ;;  %1616 = vmatpush1.bf16.msra.mxu1 %v7167_v42  ;;  %v7186_v25 = vld [vmem:[#allocation46_spill] sm:$0xff]  ;;  %v7203_v42 = vld [vmem:[#allocation63_spill] sm:$0xff] }
 0x482   : > { %1576 = vmatprep.subr.bf16.mxu0 %v7168_v45  ;;  %1617 = vmatprep.subr.bf16.mxu1 %v7169_v8  ;;  %v5160_v45 = vld [vmem:[%s6714_s3 + $0x4] ss:$16 sps:$4 sm:$0xff]   ;;  %v5166_v8 = vld [vmem:[%s6714_s3 + $0xc] ss:$16 sps:$4 sm:$0xff]  }
 0x483   : > { %7204 = vst [vmem:[#allocation14_spill] sm:$0xff] %v5160_v45  ;;  %7205 = vst [vmem:[#allocation18_spill] sm:$0xff] %v5166_v8 }
 0x485   : > { %1577 = vmatpush1.bf16.msra.mxu0 %v7170_v10  ;;  %1618 = vmatpush1.bf16.msra.mxu1 %v7171_v37 }
 0x486   : > { %1667 = vmatprep.subr.bf16.mxu0 %v7172_v40  ;;  %1708 = vmatprep.subr.bf16.mxu1 %v7173_v39 }
 0x488   : > { %1595 = vmatmul.mubr.bf16.vlgmr.msra.gmra.mrb[28].mxu0 %v4909_v54  ;;  %1636 = vmatmul.mubr.bf16.vlgmr.msra.gmra.mrb[28].mxu1 %v4909_v54  ;;  %v7187_v54 = vld [vmem:[#allocation47_spill] sm:$0xff] }
 0x489   : > { %1668 = vmatpush1.bf16.msra.mxu0 %v7174_v11  ;;  %1709 = vmatpush1.bf16.msra.mxu1 %v7175_v12 }
 0x48a   : > { %1669 = vmatprep.subr.bf16.mxu0 %v7176_v14  ;;  %1710 = vmatprep.subr.bf16.mxu1 %v7177_v41 }
 0x48b   : > { %1699 = vmatprep.mubr.bf16.mxu0 %v7068_v62  ;;  %1740 = vmatprep.mubr.bf16.mxu1 %v7068_v62 }
 0x48d   : > { %1670 = vmatpush1.bf16.msra.mxu0 %v7178_v15  ;;  %1711 = vmatpush1.bf16.msra.mxu1 %v7179_v16  ;;  %v3513_v15 = vld [vmem:[%s4161_s30 + $0x40] sm:$0xff]  ;;  %v3514_v16 = vld [vmem:[%s4161_s30 + $0x48] sm:$0xff] }
 0x48e   : > { %1671 = vmatprep.subr.bf16.mxu0 %v7180_v17  ;;  %1712 = vmatprep.subr.bf16.mxu1 %v7181_v18 }
 0x491   : > { %1672 = vmatpush1.bf16.msra.mxu0 %v7182_v19  ;;  %1713 = vmatpush1.bf16.msra.mxu1 %v7183_v20 }
 0x492   : > { %1673 = vmatprep.subr.bf16.mxu0 %v7184_v21  ;;  %1714 = vmatprep.subr.bf16.mxu1 %v7185_v22  ;;  %v3515_v22 = vld [vmem:[%s4161_s30 + $0x50] sm:$0xff] }
 0x495   : > { %1674 = vmatpush1.bf16.msra.mxu0 %v7186_v25  ;;  %1715 = vmatpush1.bf16.msra.mxu1 %v7187_v54 }
 0x496   : > { %1675 = vmatprep.subr.bf16.mxu0 %v7188_v1  ;;  %1716 = vmatprep.subr.bf16.mxu1 %v7189_v49 }
 0x499   : > { %1676 = vmatpush1.bf16.msra.mxu0 %v7190_v59  ;;  %1717 = vmatpush1.bf16.msra.mxu1 %v7191_v24 }
 0x49a   : > { %1677 = vmatprep.subr.bf16.mxu0 %v7192_v27  ;;  %1718 = vmatprep.subr.bf16.mxu1 %v7193_v35 }
 0x49d   : > { %1678 = vmatpush1.bf16.msra.mxu0 %v7194_v28  ;;  %1719 = vmatpush1.bf16.msra.mxu1 %v7195_v31  ;;  %v3516_v28 = vld [vmem:[%s4161_s30 + $0x58] sm:$0xff] }
 0x49e   : > { %1679 = vmatprep.subr.bf16.mxu0 %v7196_v29  ;;  %1720 = vmatprep.subr.bf16.mxu1 %v7197_v61 }
 0x4a1   : > { %1680 = vmatpush1.bf16.msra.mxu0 %v7198_v63  ;;  %1721 = vmatpush1.bf16.msra.mxu1 %v7199_v26 }
 0x4a2   : > { %1681 = vmatprep.subr.bf16.mxu0 %v7200_v33  ;;  %1722 = vmatprep.subr.bf16.mxu1 %v7201_v36 }
 0x4a5   : > { %1682 = vmatpush1.bf16.msra.mxu0 %v7202_v34  ;;  %1723 = vmatpush1.bf16.msra.mxu1 %v7203_v42 }
 0x4a6   : > { %1772 = vmatprep.subr.bf16.mxu0 %v5160_v45  ;;  %1813 = vmatprep.subr.bf16.mxu1 %v5166_v8 }
 0x53b   : > { %v5169_v10 = vpop.f32.mrb[24].mxu0  ;;  %v5171_v37 = vpop.f32.mrb[24].mxu1 }
 0x53c   : > { %v5173_v40 = vpop.f32.mrb[25].mxu0  ;;  %v5175_v39 = vpop.f32.mrb[25].mxu1 }
 0x53d   : > { %v1513_v11 = vpop.f32.mrb[26].mxu0  ;;  %v1554_v12 = vpop.f32.mrb[26].mxu1 }
 0x53e   : > { %v1514_v14 = vpop.f32.mrb[27].mxu0  ;;  %v1555_v41 = vpop.f32.mrb[27].mxu1 }
 0x55b   : > { %v1596_v17 = vpop.f32.mrb[28].mxu0  ;;  %v1637_v18 = vpop.f32.mrb[28].mxu1 }
 0x55c   : > { %v1644_v19 = vadd.f32 %v3513_v15, %v1596_v17  ;;  %v1598_v20 = vpop.f32.mrb[29].mxu0  ;;  %v1639_v21 = vpop.f32.mrb[29].mxu1  ;;  %v1646_v35 = vadd.f32 %v3515_v22, %v1637_v18  ;;  %v5213_v22 = vld [vmem:[%s6714_s3 + $0xac] ss:$16 sps:$4 sm:$0xff]  }
 0x55d   : > { %v1645_v25 = vadd.f32 %v3514_v16, %v1598_v20  ;;  %v1600_v54 = vpop.f32.mrb[30].mxu0  ;;  %v1641_v1 = vpop.f32.mrb[30].mxu1  ;;  %v1647_v31 = vadd.f32 %v3516_v28, %v1639_v21  ;;  %v7207_v20 = vld [vmem:[#allocation10_spill] sm:$0xff]  ;;  %v7208_v21 = vld [vmem:[#allocation9_spill] sm:$0xff] }
 0x55e   : > { %v1648_v49 = vmul.f32 0.5, %v1644_v19  ;;  %v1601_v59 = vpop.f32.mrb[31].mxu0  ;;  %v1642_v24 = vpop.f32.mrb[31].mxu1  ;;  %v5220_v54 = vld [vmem:[%s6714_s3 + $0xa8] ss:$16 sps:$4 sm:$0xff]  }
 0x55f   : > { %v1652_v27 = vmul.f32 0.5, %v1645_v25  ;;  %v1657_v29 = vmul.f32 0.5, %v1647_v31  ;;  %v7209_v25 = vld [vmem:[#allocation13_spill] sm:$0xff]  ;;  %v7210_v1 = vld [vmem:[#allocation11_spill] sm:$0xff]  ;;  %v5233_v59 = vld [vmem:[%s6714_s3 + $0xc0] ss:$16 sps:$4 sm:$0xff]  }
 0x560   : > { %3775 = vtanh.f32 %v1648_v49  ;;  %v5227_v49 = vld [vmem:[%s6714_s3 + $0xcc] ss:$16 sps:$4 sm:$0xff]   ;;  %v5239_v24 = vld [vmem:[%s6714_s3 + $0xc8] ss:$16 sps:$4 sm:$0xff]   ;;  %v5257_v28 = vld [vmem:[%s6714_s3 + $0xe0] ss:$16 sps:$4 sm:$0xff]  }
 0x561   : > { %3777 = vtanh.f32 %v1652_v27  ;;  %v5245_v27 = vld [vmem:[%s6714_s3 + $0xe4] ss:$16 sps:$4 sm:$0xff]   ;;  %v5263_v31 = vld [vmem:[%s6714_s3 + $0xe8] ss:$16 sps:$4 sm:$0xff]  }
 0x562   : > { %3779 = vtanh.f32 %v1646_v35  ;;  %v5251_v35 = vld [vmem:[%s6714_s3 + $0xec] ss:$16 sps:$4 sm:$0xff]   ;;  %7211 = vst [vmem:[#allocation17_spill] sm:$0xff] %v5263_v31 }
 0x563   : > { %3781 = vtanh.f32 %v1657_v29  ;;  %v5269_v29 = vld [vmem:[%s6712_s1 + $0x4] ss:$16 sps:$4 sm:$0xff]  }
 0x564   : > { %7212 = vst [vmem:[#allocation20_spill] sm:$0xff] %v5269_v29 }
 0x56a   : > { %v3776_v61 = vpop.eup %3775 }
 0x56b   : > { %v3778_v63 = vpop.eup %3777  ;;  %v1650_v26 = vmul.f32 0.5, %v3776_v61  ;;  %v5275_v61 = vld [vmem:[%s6712_s1 + $0xc] ss:$16 sps:$4 sm:$0xff]  }
 0x56c   : > { %v1654_v33 = vmul.f32 0.5, %v3778_v63  ;;  %v3780_v34 = vpop.eup %3779  ;;  %7213 = vst [vmem:[#allocation19_spill] sm:$0xff] %v5275_v61 }
 0x56d   : > { %v1651_v36 = vadd.f32 0.5, %v1650_v26  ;;  %v3782_v41 = vpop.eup %3781 }
 0x56e   : > { %v1655_v42 = vadd.f32 0.5, %v1654_v33  ;;  %v1659_v15 = vmul.f32 0.5, %v3782_v41 }
 0x56f   : > { %v1662_v11 = vmul.f32 %v3780_v34, %v1651_v36 }
 0x570   : > { %v1661_v12 = vmul.f32 %v1655_v42, %v4906_v60  ;;  %v1660_v16 = vadd.f32 0.5, %v1659_v15  ;;  %v7206_v60 = vld [vmem:[#allocation8_spill] sm:$0xff] }
 0x572   : > { %v5182_v14 = vadd.f32 %v1662_v11, %v1661_v12 }
 0x574   : > { %3783 = vtanh.f32 %v5182_v14 }
 0x57e   : > { %v3784_v17 = vpop.eup %3783 }
 0x57f   : > { %v1665_v18 = vmul.f32 %v3784_v17, %v1660_v16 }
 0x581   : > { %v5185_v19 = vpack.c.bf16 %v1665_v18, %v1665_v18 }
 0x583   : > { %1700 = vmatmul.mubr.bf16.vlgmr.msra.gmra.mrb[32].mxu0 %v5185_v19  ;;  %1741 = vmatmul.mubr.bf16.vlgmr.msra.gmra.mrb[32].mxu1 %v5185_v19 }
 0x584   : > { %1773 = vmatpush1.bf16.msra.mxu0 %v4916_v43  ;;  %1814 = vmatpush1.bf16.msra.mxu1 %v4922_v53 }
 0x585   : > { %1774 = vmatprep.subr.bf16.mxu0 %v4928_v44  ;;  %1815 = vmatprep.subr.bf16.mxu1 %v4934_v46 }
 0x586   : > { %1804 = vmatprep.mubr.bf16.mxu0 %v7068_v62  ;;  %1845 = vmatprep.mubr.bf16.mxu1 %v7068_v62 }
 0x588   : > { %1775 = vmatpush1.bf16.msra.mxu0 %v4942_v5  ;;  %1816 = vmatpush1.bf16.msra.mxu1 %v4948_v48 }
 0x589   : > { %1776 = vmatprep.subr.bf16.mxu0 %v4954_v2  ;;  %1817 = vmatprep.subr.bf16.mxu1 %v4960_v55 }
 0x58c   : > { %1777 = vmatpush1.bf16.msra.mxu0 %v4966_v4  ;;  %1818 = vmatpush1.bf16.msra.mxu1 %v4972_v6 }
 0x58d   : > { %1778 = vmatprep.subr.bf16.mxu0 %v4978_v0  ;;  %1819 = vmatprep.subr.bf16.mxu1 %v4984_v7 }
 0x590   : > { %1779 = vmatpush1.bf16.msra.mxu0 %v4990_v52  ;;  %1820 = vmatpush1.bf16.msra.mxu1 %v4996_v58 }
 0x591   : > { %1780 = vmatprep.subr.bf16.mxu0 %v5002_v32  ;;  %1821 = vmatprep.subr.bf16.mxu1 %v5008_v57 }
 0x594   : > { %1781 = vmatpush1.bf16.msra.mxu0 %v7206_v60  ;;  %1822 = vmatpush1.bf16.msra.mxu1 %v7207_v20 }
 0x595   : > { %1782 = vmatprep.subr.bf16.mxu0 %v7208_v21  ;;  %1823 = vmatprep.subr.bf16.mxu1 %v5213_v22 }
 0x598   : > { %1783 = vmatpush1.bf16.msra.mxu0 %v7209_v25  ;;  %1824 = vmatpush1.bf16.msra.mxu1 %v5220_v54 }
 0x599   : > { %1784 = vmatprep.subr.bf16.mxu0 %v7210_v1  ;;  %1825 = vmatprep.subr.bf16.mxu1 %v5227_v49 }
 0x59c   : > { %1785 = vmatpush1.bf16.msra.mxu0 %v5233_v59  ;;  %1826 = vmatpush1.bf16.msra.mxu1 %v5239_v24 }
 0x59d   : > { %1786 = vmatprep.subr.bf16.mxu0 %v5245_v27  ;;  %1827 = vmatprep.subr.bf16.mxu1 %v5251_v35 }
 0x5a0   : > { %1787 = vmatpush1.bf16.msra.mxu0 %v5257_v28  ;;  %1828 = vmatpush1.bf16.msra.mxu1 %v5263_v31 }
 0x5a1   : > { %1859 = vmatprep.subr.bf16.mxu0 %v5269_v29  ;;  %1900 = vmatprep.subr.bf16.mxu1 %v5275_v61 }
 0x656   : > { %v1701_v63 = vpop.f32.mrb[32].mxu0  ;;  %v1742_v26 = vpop.f32.mrb[32].mxu1 }
 0x657   : > { %v1702_v33 = vadd.f32 %v1701_v63, %v5169_v10  ;;  %v1743_v36 = vadd.f32 %v1742_v26, %v5171_v37  ;;  %v1703_v34 = vpop.f32.mrb[33].mxu0  ;;  %v1744_v42 = vpop.f32.mrb[33].mxu1 }
 0x658   : > { %v1704_v11 = vadd.f32 %v1703_v34, %v5173_v40  ;;  %v1745_v12 = vadd.f32 %v1744_v42, %v5175_v39  ;;  %v1705_v41 = vpop.f32.mrb[34].mxu0  ;;  %v1746_v15 = vpop.f32.mrb[34].mxu1 }
 0x659   : > { %v1749_v16 = vadd.f32 %v1702_v33, %v4804_v9  ;;  %v1706_v17 = vpop.f32.mrb[35].mxu0  ;;  %v1747_v18 = vpop.f32.mrb[35].mxu1  ;;  %v1751_v10 = vadd.f32 %v1743_v36, %v4813_v23 }
 0x65a   : > { %v1750_v61 = vadd.f32 %v1704_v11, %v4806_v13  ;;  %v1752_v37 = vadd.f32 %v1745_v12, %v4817_v3  ;;  %v5305_v18 = vld [vmem:[%s6712_s1 + $0x28] ss:$16 sps:$4 sm:$0xff]  }
 0x65b   : > { %v1753_v29 = vmul.f32 0.5, %v1749_v16  ;;  %7215 = vst [vmem:[#allocation21_spill] sm:$0xff] %v5305_v18 }
 0x65c   : > { %v1757_v31 = vmul.f32 0.5, %v1750_v61  ;;  %v1762_v40 = vmul.f32 0.5, %v1752_v37  ;;  %v5318_v37 = vld [vmem:[%s6712_s1 + $0x40] ss:$16 sps:$4 sm:$0xff]  }
 0x65d   : > { %3785 = vtanh.f32 %v1753_v29  ;;  %7217 = vst [vmem:[#allocation23_spill] sm:$0xff] %v5318_v37 }
 0x65e   : > { %3787 = vtanh.f32 %v1757_v31 }
 0x65f   : > { %3789 = vtanh.f32 %v1751_v10  ;;  %v5312_v10 = vld [vmem:[%s6712_s1 + $0x4c] ss:$16 sps:$4 sm:$0xff]  }
 0x660   : > { %3791 = vtanh.f32 %v1762_v40  ;;  %7216 = vst [vmem:[#allocation24_spill] sm:$0xff] %v5312_v10  ;;  %v5324_v40 = vld [vmem:[%s6712_s1 + $0x48] ss:$16 sps:$4 sm:$0xff]  }
 0x661   : > { %7218 = vst [vmem:[#allocation26_spill] sm:$0xff] %v5324_v40 }
 0x667   : > { %v3786_v63 = vpop.eup %3785 }
 0x668   : > { %v3788_v39 = vpop.eup %3787  ;;  %v1755_v26 = vmul.f32 0.5, %v3786_v63  ;;  %v5330_v63 = vld [vmem:[%s6712_s1 + $0x64] ss:$16 sps:$4 sm:$0xff]  }
 0x669   : > { %v1759_v34 = vmul.f32 0.5, %v3788_v39  ;;  %v3790_v42 = vpop.eup %3789  ;;  %7219 = vst [vmem:[#allocation25_spill] sm:$0xff] %v5330_v63  ;;  %v5336_v39 = vld [vmem:[%s6712_s1 + $0x6c] ss:$16 sps:$4 sm:$0xff]  }
 0x66a   : > { %v1756_v33 = vadd.f32 0.5, %v1755_v26  ;;  %v3792_v31 = vpop.eup %3791  ;;  %7220 = vst [vmem:[#allocation6_spill] sm:$0xff] %v5336_v39  ;;  %v5342_v26 = vld [vmem:[%s6712_s1 + $0x60] ss:$16 sps:$4 sm:$0xff]  }
 0x66b   : > { %v1760_v41 = vadd.f32 0.5, %v1759_v34  ;;  %v1764_v29 = vmul.f32 0.5, %v3792_v31  ;;  %7221 = vst [vmem:[#allocation7_spill] sm:$0xff] %v5342_v26  ;;  %v5348_v34 = vld [vmem:[%s6712_s1 + $0x68] ss:$16 sps:$4 sm:$0xff]  }
 0x66c   : > { %v1767_v15 = vmul.f32 %v3790_v42, %v1756_v33  ;;  %7222 = vst [vmem:[#allocation28_spill] sm:$0xff] %v5348_v34  ;;  %v5354_v33 = vld [vmem:[%s6712_s1 + $0x84] ss:$16 sps:$4 sm:$0xff]   ;;  %v5360_v42 = vld [vmem:[%s6712_s1 + $0x8c] ss:$16 sps:$4 sm:$0xff]  }
 0x66d   : > { %v1766_v11 = vmul.f32 %v1760_v41, %v5061_v30  ;;  %v1765_v36 = vadd.f32 0.5, %v1764_v29  ;;  %v5296_v30 = vld [vmem:[%s6712_s1 + $0x2c] ss:$16 sps:$4 sm:$0xff]   ;;  %7223 = vst [vmem:[#allocation27_spill] sm:$0xff] %v5354_v33  ;;  %7224 = vst [vmem:[#allocation30_spill] sm:$0xff] %v5360_v42 }
 0x66e   : > { %7214 = vst [vmem:[#allocation22_spill] sm:$0xff] %v5296_v30  ;;  %v5366_v41 = vld [vmem:[%s6712_s1 + $0x80] ss:$16 sps:$4 sm:$0xff]   ;;  %v5384_v31 = vld [vmem:[%s6712_s1 + $0xac] ss:$16 sps:$4 sm:$0xff]  }
 0x66f   : > { %v5287_v61 = vadd.f32 %v1767_v15, %v1766_v11  ;;  %7225 = vst [vmem:[#allocation29_spill] sm:$0xff] %v5366_v41  ;;  %v5372_v15 = vld [vmem:[%s6712_s1 + $0x88] ss:$16 sps:$4 sm:$0xff]   ;;  %v5378_v11 = vld [vmem:[%s6712_s1 + $0xa4] ss:$16 sps:$4 sm:$0xff]   ;;  %7228 = vst [vmem:[#allocation33_spill] sm:$0xff] %v5384_v31 }
 0x670   : > { %7226 = vst [vmem:[#allocation31_spill] sm:$0xff] %v5372_v15  ;;  %7227 = vst [vmem:[#allocation32_spill] sm:$0xff] %v5378_v11  ;;  %v5390_v29 = vld [vmem:[%s6712_s1 + $0xa0] ss:$16 sps:$4 sm:$0xff]  }
 0x671   : > { %3793 = vtanh.f32 %v5287_v61  ;;  %7229 = vst [vmem:[#allocation34_spill] sm:$0xff] %v5390_v29 }
 0x67b   : > { %v3794_v12 = vpop.eup %3793 }
 0x67c   : > { %v1770_v16 = vmul.f32 %v3794_v12, %v1765_v36  ;;  %v5396_v36 = vld [vmem:[%s6712_s1 + $0xa8] ss:$16 sps:$4 sm:$0xff]   ;;  %v5402_v12 = vld [vmem:[%s6712_s1 + $0xc4] ss:$16 sps:$4 sm:$0xff]  }
 0x67d   : > { %7230 = vst [vmem:[#allocation35_spill] sm:$0xff] %v5396_v36  ;;  %7231 = vst [vmem:[#allocation36_spill] sm:$0xff] %v5402_v12 }
 0x67e   : > { %v1771_v17 = vpack.c.bf16 %v1770_v16, %v1770_v16  ;;  %v5408_v16 = vld [vmem:[%s6712_s1 + $0xcc] ss:$16 sps:$4 sm:$0xff]  }
 0x67f   : > { %7232 = vst [vmem:[#allocation37_spill] sm:$0xff] %v5408_v16 }
 0x680   : > { %1805 = vmatmul.mubr.bf16.vlgmr.msra.gmra.mrb[36].mxu0 %v1771_v17  ;;  %1846 = vmatmul.mubr.bf16.vlgmr.msra.gmra.mrb[36].mxu1 %v1771_v17  ;;  %v5414_v17 = vld [vmem:[%s6712_s1 + $0xc0] ss:$16 sps:$4 sm:$0xff]  }
 0x681   : > { %1860 = vmatpush1.bf16.msra.mxu0 %v5067_v38  ;;  %1901 = vmatpush1.bf16.msra.mxu1 %v5073_v50  ;;  %7233 = vst [vmem:[#allocation38_spill] sm:$0xff] %v5414_v17 }
 0x682   : > { %1861 = vmatprep.subr.bf16.mxu0 %v5079_v56  ;;  %1902 = vmatprep.subr.bf16.mxu1 %v5296_v30 }
 0x683   : > { %1891 = vmatprep.mubr.bf16.mxu0 %v7068_v62  ;;  %1932 = vmatprep.mubr.bf16.mxu1 %v7068_v62 }
 0x685   : > { %1862 = vmatpush1.bf16.msra.mxu0 %v5088_v51  ;;  %1903 = vmatpush1.bf16.msra.mxu1 %v5305_v18 }
 0x686   : > { %1863 = vmatprep.subr.bf16.mxu0 %v5095_v47  ;;  %1904 = vmatprep.subr.bf16.mxu1 %v5312_v10 }
 0x689   : > { %1864 = vmatpush1.bf16.msra.mxu0 %v5318_v37  ;;  %1905 = vmatpush1.bf16.msra.mxu1 %v5324_v40 }
 0x68a   : > { %1865 = vmatprep.subr.bf16.mxu0 %v5330_v63  ;;  %1906 = vmatprep.subr.bf16.mxu1 %v5336_v39 }
 0x68d   : > { %1866 = vmatpush1.bf16.msra.mxu0 %v5342_v26  ;;  %1907 = vmatpush1.bf16.msra.mxu1 %v5348_v34  ;;  %v3519_v26 = vld [vmem:[%s4161_s30 + $0x70] sm:$0xff] }
 0x68e   : > { %1867 = vmatprep.subr.bf16.mxu0 %v5354_v33  ;;  %1908 = vmatprep.subr.bf16.mxu1 %v5360_v42  ;;  %v3518_v42 = vld [vmem:[%s4161_s30 + $0x68] sm:$0xff] }
 0x691   : > { %1868 = vmatpush1.bf16.msra.mxu0 %v5366_v41  ;;  %1909 = vmatpush1.bf16.msra.mxu1 %v5372_v15  ;;  %v3517_v41 = vld [vmem:[%s4161_s30 + $0x60] sm:$0xff] }
 0x692   : > { %1869 = vmatprep.subr.bf16.mxu0 %v5378_v11  ;;  %1910 = vmatprep.subr.bf16.mxu1 %v5384_v31 }
 0x695   : > { %1870 = vmatpush1.bf16.msra.mxu0 %v5390_v29  ;;  %1911 = vmatpush1.bf16.msra.mxu1 %v5396_v36  ;;  %v5420_v36 = vld [vmem:[%s6712_s1 + $0xc8] ss:$16 sps:$4 sm:$0xff]  }
 0x696   : > { %1871 = vmatprep.subr.bf16.mxu0 %v5402_v12  ;;  %1912 = vmatprep.subr.bf16.mxu1 %v5408_v16  ;;  %7234 = vst [vmem:[#allocation39_spill] sm:$0xff] %v5420_v36  ;;  %v5426_v12 = vld [vmem:[%s6712_s1 + $0xe4] ss:$16 sps:$4 sm:$0xff]   ;;  %v5432_v16 = vld [vmem:[%s6712_s1 + $0xec] ss:$16 sps:$4 sm:$0xff]  }
 0x697   : > { %7235 = vst [vmem:[#allocation40_spill] sm:$0xff] %v5426_v12  ;;  %7236 = vst [vmem:[#allocation41_spill] sm:$0xff] %v5432_v16 }
 0x699   : > { %1872 = vmatpush1.bf16.msra.mxu0 %v5414_v17  ;;  %1913 = vmatpush1.bf16.msra.mxu1 %v5420_v36  ;;  %v5438_v17 = vld [vmem:[%s6712_s1 + $0xe0] ss:$16 sps:$4 sm:$0xff]   ;;  %v5444_v36 = vld [vmem:[%s6712_s1 + $0xe8] ss:$16 sps:$4 sm:$0xff]  }
 0x69a   : > { %1873 = vmatprep.subr.bf16.mxu0 %v5426_v12  ;;  %1914 = vmatprep.subr.bf16.mxu1 %v5432_v16  ;;  %7237 = vst [vmem:[#allocation42_spill] sm:$0xff] %v5438_v17  ;;  %7238 = vst [vmem:[#allocation43_spill] sm:$0xff] %v5444_v36  ;;  %v5450_v12 = vld [vmem:[%s6713_s2 + $0x4] ss:$16 sps:$4 sm:$0xff]   ;;  %v5456_v16 = vld [vmem:[%s6713_s2 + $0xc] ss:$16 sps:$4 sm:$0xff]  }
 0x69b   : > { %7239 = vst [vmem:[#allocation44_spill] sm:$0xff] %v5450_v12  ;;  %7240 = vst [vmem:[#allocation45_spill] sm:$0xff] %v5456_v16 }
 0x69d   : > { %1874 = vmatpush1.bf16.msra.mxu0 %v5438_v17  ;;  %1915 = vmatpush1.bf16.msra.mxu1 %v5444_v36  ;;  %v5464_v36 = vld [vmem:[%s6713_s2] ss:$16 sps:$4 sm:$0xff]  }
 0x69e   : > { %1964 = vmatprep.subr.bf16.mxu0 %v5450_v12  ;;  %2005 = vmatprep.subr.bf16.mxu1 %v5456_v16  ;;  %7241 = vst [vmem:[#allocation46_spill] sm:$0xff] %v5464_v36  ;;  %v5470_v12 = vld [vmem:[%s6713_s2 + $0x8] ss:$16 sps:$4 sm:$0xff]   ;;  %v5476_v16 = vld [vmem:[%s6713_s2 + $0x24] ss:$16 sps:$4 sm:$0xff]  }
 0x69f   : > { %7242 = vst [vmem:[#allocation47_spill] sm:$0xff] %v5470_v12  ;;  %7243 = vst [vmem:[#allocation48_spill] sm:$0xff] %v5476_v16 }
 0x6a0   : > { %1892 = vmatmul.mubr.bf16.vlgmr.msra.gmra.mrb[40].mxu0 %v5185_v19  ;;  %1933 = vmatmul.mubr.bf16.vlgmr.msra.gmra.mrb[40].mxu1 %v5185_v19  ;;  %v5482_v19 = vld [vmem:[%s6713_s2 + $0x2c] ss:$16 sps:$4 sm:$0xff]  }
 0x6a1   : > { %1965 = vmatpush1.bf16.msra.mxu0 %v5464_v36  ;;  %2006 = vmatpush1.bf16.msra.mxu1 %v5470_v12  ;;  %7244 = vst [vmem:[#allocation49_spill] sm:$0xff] %v5482_v19  ;;  %v5490_v12 = vld [vmem:[%s6713_s2 + $0x20] ss:$16 sps:$4 sm:$0xff]   ;;  %v5508_v36 = vld [vmem:[%s6713_s2 + $0x4c] ss:$16 sps:$4 sm:$0xff]  }
 0x6a2   : > { %1966 = vmatprep.subr.bf16.mxu0 %v5476_v16  ;;  %2007 = vmatprep.subr.bf16.mxu1 %v5482_v19  ;;  %7245 = vst [vmem:[#allocation50_spill] sm:$0xff] %v5490_v12  ;;  %v5496_v16 = vld [vmem:[%s6713_s2 + $0x28] ss:$16 sps:$4 sm:$0xff]   ;;  %v5502_v19 = vld [vmem:[%s6713_s2 + $0x44] ss:$16 sps:$4 sm:$0xff]   ;;  %7248 = vst [vmem:[#allocation53_spill] sm:$0xff] %v5508_v36 }
 0x6a3   : > { %1996 = vmatprep.mubr.bf16.mxu0 %v7068_v62  ;;  %2037 = vmatprep.mubr.bf16.mxu1 %v7068_v62  ;;  %7246 = vst [vmem:[#allocation51_spill] sm:$0xff] %v5496_v16  ;;  %7247 = vst [vmem:[#allocation52_spill] sm:$0xff] %v5502_v19 }
 0x6a5   : > { %1967 = vmatpush1.bf16.msra.mxu0 %v5490_v12  ;;  %2008 = vmatpush1.bf16.msra.mxu1 %v5496_v16  ;;  %v5514_v12 = vld [vmem:[%s6713_s2 + $0x40] ss:$16 sps:$4 sm:$0xff]   ;;  %v5520_v16 = vld [vmem:[%s6713_s2 + $0x48] ss:$16 sps:$4 sm:$0xff]  }
 0x6a6   : > { %1968 = vmatprep.subr.bf16.mxu0 %v5502_v19  ;;  %2009 = vmatprep.subr.bf16.mxu1 %v5508_v36  ;;  %7249 = vst [vmem:[#allocation54_spill] sm:$0xff] %v5514_v12  ;;  %7250 = vst [vmem:[#allocation55_spill] sm:$0xff] %v5520_v16  ;;  %v5526_v19 = vld [vmem:[%s6713_s2 + $0x64] ss:$16 sps:$4 sm:$0xff]   ;;  %v5532_v36 = vld [vmem:[%s6713_s2 + $0x6c] ss:$16 sps:$4 sm:$0xff]  }
 0x6a7   : > { %7251 = vst [vmem:[#allocation56_spill] sm:$0xff] %v5526_v19  ;;  %7252 = vst [vmem:[#allocation57_spill] sm:$0xff] %v5532_v36 }
 0x6a9   : > { %1969 = vmatpush1.bf16.msra.mxu0 %v5514_v12  ;;  %2010 = vmatpush1.bf16.msra.mxu1 %v5520_v16  ;;  %v5538_v12 = vld [vmem:[%s6713_s2 + $0x60] ss:$16 sps:$4 sm:$0xff]   ;;  %v5544_v16 = vld [vmem:[%s6713_s2 + $0x68] ss:$16 sps:$4 sm:$0xff]  }
 0x6aa   : > { %1970 = vmatprep.subr.bf16.mxu0 %v5526_v19  ;;  %2011 = vmatprep.subr.bf16.mxu1 %v5532_v36  ;;  %7253 = vst [vmem:[#allocation58_spill] sm:$0xff] %v5538_v12  ;;  %7254 = vst [vmem:[#allocation59_spill] sm:$0xff] %v5544_v16  ;;  %v5550_v19 = vld [vmem:[%s6713_s2 + $0x84] ss:$16 sps:$4 sm:$0xff]   ;;  %v5556_v36 = vld [vmem:[%s6713_s2 + $0x8c] ss:$16 sps:$4 sm:$0xff]  }
 0x6ab   : > { %7255 = vst [vmem:[#allocation60_spill] sm:$0xff] %v5550_v19  ;;  %7256 = vst [vmem:[#allocation61_spill] sm:$0xff] %v5556_v36 }
 0x6ad   : > { %1971 = vmatpush1.bf16.msra.mxu0 %v5538_v12  ;;  %2012 = vmatpush1.bf16.msra.mxu1 %v5544_v16  ;;  %v5562_v12 = vld [vmem:[%s6713_s2 + $0x80] ss:$16 sps:$4 sm:$0xff]   ;;  %v5568_v16 = vld [vmem:[%s6713_s2 + $0x88] ss:$16 sps:$4 sm:$0xff]  }
 0x6ae   : > { %1972 = vmatprep.subr.bf16.mxu0 %v5550_v19  ;;  %2013 = vmatprep.subr.bf16.mxu1 %v5556_v36  ;;  %7257 = vst [vmem:[#allocation62_spill] sm:$0xff] %v5562_v12  ;;  %7258 = vst [vmem:[#allocation63_spill] sm:$0xff] %v5568_v16  ;;  %v5574_v19 = vld [vmem:[%s6713_s2 + $0xa4] ss:$16 sps:$4 sm:$0xff]   ;;  %v5580_v36 = vld [vmem:[%s6713_s2 + $0xac] ss:$16 sps:$4 sm:$0xff]  }
 0x6af   : > { %7259 = vst [vmem:[#allocation8_spill] sm:$0xff] %v5574_v19  ;;  %7260 = vst [vmem:[#allocation10_spill] sm:$0xff] %v5580_v36 }
 0x6b1   : > { %1973 = vmatpush1.bf16.msra.mxu0 %v5562_v12  ;;  %2014 = vmatpush1.bf16.msra.mxu1 %v5568_v16  ;;  %v5586_v12 = vld [vmem:[%s6713_s2 + $0xa0] ss:$16 sps:$4 sm:$0xff]   ;;  %v5592_v16 = vld [vmem:[%s6713_s2 + $0xa8] ss:$16 sps:$4 sm:$0xff]  }
 0x6b2   : > { %1974 = vmatprep.subr.bf16.mxu0 %v5574_v19  ;;  %2015 = vmatprep.subr.bf16.mxu1 %v5580_v36  ;;  %7261 = vst [vmem:[#allocation9_spill] sm:$0xff] %v5586_v12  ;;  %7262 = vst [vmem:[#allocation13_spill] sm:$0xff] %v5592_v16  ;;  %v5598_v19 = vld [vmem:[%s6713_s2 + $0xc4] ss:$16 sps:$4 sm:$0xff]   ;;  %v5604_v36 = vld [vmem:[%s6713_s2 + $0xcc] ss:$16 sps:$4 sm:$0xff]  }
 0x6b3   : > { %7263 = vst [vmem:[#allocation11_spill] sm:$0xff] %v5598_v19  ;;  %7264 = vst [vmem:[#allocation64_spill] sm:$0xff] %v5604_v36 }
 0x6b5   : > { %1975 = vmatpush1.bf16.msra.mxu0 %v5586_v12  ;;  %2016 = vmatpush1.bf16.msra.mxu1 %v5592_v16  ;;  %v5610_v12 = vld [vmem:[%s6713_s2 + $0xc0] ss:$16 sps:$4 sm:$0xff]   ;;  %v5616_v16 = vld [vmem:[%s6713_s2 + $0xc8] ss:$16 sps:$4 sm:$0xff]  }
 0x6b6   : > { %1976 = vmatprep.subr.bf16.mxu0 %v5598_v19  ;;  %2017 = vmatprep.subr.bf16.mxu1 %v5604_v36  ;;  %7265 = vst [vmem:[#allocation65_spill] sm:$0xff] %v5610_v12  ;;  %7266 = vst [vmem:[#allocation66_spill] sm:$0xff] %v5616_v16  ;;  %v5622_v19 = vld [vmem:[%s6713_s2 + $0xe4] ss:$16 sps:$4 sm:$0xff]   ;;  %v5628_v36 = vld [vmem:[%s6713_s2 + $0xec] ss:$16 sps:$4 sm:$0xff]  }
 0x6b7   : > { %7267 = vst [vmem:[#allocation67_spill] sm:$0xff] %v5622_v19  ;;  %7268 = vst [vmem:[#allocation68_spill] sm:$0xff] %v5628_v36 }
 0x6b9   : > { %1977 = vmatpush1.bf16.msra.mxu0 %v5610_v12  ;;  %2018 = vmatpush1.bf16.msra.mxu1 %v5616_v16  ;;  %v5634_v16 = vld [vmem:[%s6713_s2 + $0xe0] ss:$16 sps:$4 sm:$0xff]  }
 0x6ba   : > { %1978 = vmatprep.subr.bf16.mxu0 %v5622_v19  ;;  %2019 = vmatprep.subr.bf16.mxu1 %v5628_v36  ;;  %7269 = vst [vmem:[#allocation69_spill] sm:$0xff] %v5634_v16  ;;  %v5640_v19 = vld [vmem:[%s6713_s2 + $0xe8] ss:$16 sps:$4 sm:$0xff]  }
 0x6bb   : > { %7270 = vst [vmem:[#allocation70_spill] sm:$0xff] %v5640_v19 }
 0x6bd   : > { %1979 = vmatpush1.bf16.msra.mxu0 %v5634_v16  ;;  %2020 = vmatpush1.bf16.msra.mxu1 %v5640_v19 }
 0x6be   : > { %2069 = vmatprep.subr.bf16.mxu0 %v5160_v45  ;;  %2110 = vmatprep.subr.bf16.mxu1 %v5166_v8 }
 0x753   : > { %v5645_v36 = vpop.f32.mrb[36].mxu0  ;;  %v5647_v12 = vpop.f32.mrb[36].mxu1 }
 0x754   : > { %v5649_v17 = vpop.f32.mrb[37].mxu0  ;;  %v5651_v29 = vpop.f32.mrb[37].mxu1 }
 0x755   : > { %v1810_v16 = vpop.f32.mrb[38].mxu0  ;;  %v1851_v31 = vpop.f32.mrb[38].mxu1 }
 0x756   : > { %v1811_v11 = vpop.f32.mrb[39].mxu0  ;;  %v1852_v15 = vpop.f32.mrb[39].mxu1 }
 0x757   : > { %v3520_v15 = vld [vmem:[%s4161_s30 + $0x78] sm:$0xff] }
 0x773   : > { %v1893_v19 = vpop.f32.mrb[40].mxu0  ;;  %v1934_v45 = vpop.f32.mrb[40].mxu1 }
 0x774   : > { %v1941_v33 = vadd.f32 %v3517_v41, %v1893_v19  ;;  %v1895_v8 = vpop.f32.mrb[41].mxu0  ;;  %v1936_v34 = vpop.f32.mrb[41].mxu1  ;;  %v1943_v31 = vadd.f32 %v3519_v26, %v1934_v45 }
 0x775   : > { %v1942_v39 = vadd.f32 %v3518_v42, %v1895_v8  ;;  %v1897_v63 = vpop.f32.mrb[42].mxu0  ;;  %v1938_v40 = vpop.f32.mrb[42].mxu1  ;;  %v1944_v11 = vadd.f32 %v3520_v15, %v1936_v34 }
 0x776   : > { %v1945_v37 = vmul.f32 0.5, %v1941_v33  ;;  %v1898_v10 = vpop.f32.mrb[43].mxu0  ;;  %v1939_v47 = vpop.f32.mrb[43].mxu1 }
 0x777   : > { %v1949_v18 = vmul.f32 0.5, %v1942_v39  ;;  %v1954_v16 = vmul.f32 0.5, %v1944_v11 }
 0x778   : > { %3795 = vtanh.f32 %v1945_v37 }
 0x779   : > { %3797 = vtanh.f32 %v1949_v18 }
 0x77a   : > { %3799 = vtanh.f32 %v1943_v31 }
 0x77b   : > { %3801 = vtanh.f32 %v1954_v16 }
 0x782   : > { %v3796_v51 = vpop.eup %3795 }
 0x783   : > { %v3798_v30 = vpop.eup %3797  ;;  %v1947_v41 = vmul.f32 0.5, %v3796_v51 }
 0x784   : > { %v1951_v19 = vmul.f32 0.5, %v3798_v30  ;;  %v3800_v8 = vpop.eup %3799 }
 0x785   : > { %v1948_v56 = vadd.f32 0.5, %v1947_v41  ;;  %v3802_v45 = vpop.eup %3801 }
 0x786   : > { %v1952_v63 = vadd.f32 0.5, %v1951_v19  ;;  %v1956_v18 = vmul.f32 0.5, %v3802_v45  ;;  %v7278_v45 = vld [vmem:[#allocation16_spill] sm:$0xff] }
 0x787   : > { %v1959_v40 = vmul.f32 %v3800_v8, %v1948_v56 }
 0x788   : > { %v1958_v10 = vmul.f32 %v1952_v63, %v5182_v14  ;;  %v1957_v37 = vadd.f32 0.5, %v1956_v18  ;;  %v7274_v63 = vld [vmem:[#allocation15_spill] sm:$0xff]  ;;  %v7279_v18 = vld [vmem:[#allocation24_spill] sm:$0xff] }
 0x78a   : > { %v5658_v47 = vadd.f32 %v1959_v40, %v1958_v10  ;;  %v7275_v40 = vld [vmem:[#allocation22_spill] sm:$0xff]  ;;  %v7277_v10 = vld [vmem:[#allocation21_spill] sm:$0xff] }
 0x78c   : > { %3803 = vtanh.f32 %v5658_v47 }
 0x796   : > { %v3804_v39 = vpop.eup %3803 }
 0x797   : > { %v1962_v26 = vmul.f32 %v3804_v39, %v1957_v37  ;;  %v7280_v37 = vld [vmem:[#allocation23_spill] sm:$0xff]  ;;  %v7283_v39 = vld [vmem:[#allocation6_spill] sm:$0xff] }
 0x799   : > { %v5661_v34 = vpack.c.bf16 %v1962_v26, %v1962_v26  ;;  %v7284_v26 = vld [vmem:[#allocation7_spill] sm:$0xff] }
 0x79b   : > { %1997 = vmatmul.mubr.bf16.vlgmr.msra.gmra.mrb[44].mxu0 %v5661_v34  ;;  %2038 = vmatmul.mubr.bf16.vlgmr.msra.gmra.mrb[44].mxu1 %v5661_v34 }
 0x79c   : > { %2070 = vmatpush1.bf16.msra.mxu0 %v4916_v43  ;;  %2111 = vmatpush1.bf16.msra.mxu1 %v4922_v53  ;;  %v7271_v43 = vld [vmem:[#allocation17_spill] sm:$0xff]  ;;  %v7272_v53 = vld [vmem:[#allocation20_spill] sm:$0xff] }
 0x79d   : > { %2071 = vmatprep.subr.bf16.mxu0 %v4928_v44  ;;  %2112 = vmatprep.subr.bf16.mxu1 %v4934_v46  ;;  %v7273_v44 = vld [vmem:[#allocation19_spill] sm:$0xff] }
 0x79e   : > { %2101 = vmatprep.mubr.bf16.mxu0 %v7068_v62  ;;  %2142 = vmatprep.mubr.bf16.mxu1 %v7068_v62 }
 0x7a0   : > { %2072 = vmatpush1.bf16.msra.mxu0 %v4942_v5  ;;  %2113 = vmatpush1.bf16.msra.mxu1 %v4948_v48 }
 0x7a1   : > { %2073 = vmatprep.subr.bf16.mxu0 %v4954_v2  ;;  %2114 = vmatprep.subr.bf16.mxu1 %v4960_v55 }
 0x7a4   : > { %2074 = vmatpush1.bf16.msra.mxu0 %v4966_v4  ;;  %2115 = vmatpush1.bf16.msra.mxu1 %v4972_v6 }
 0x7a5   : > { %2075 = vmatprep.subr.bf16.mxu0 %v4978_v0  ;;  %2116 = vmatprep.subr.bf16.mxu1 %v4984_v7 }
 0x7a8   : > { %2076 = vmatpush1.bf16.msra.mxu0 %v4990_v52  ;;  %2117 = vmatpush1.bf16.msra.mxu1 %v4996_v58 }
 0x7a9   : > { %2077 = vmatprep.subr.bf16.mxu0 %v5002_v32  ;;  %2118 = vmatprep.subr.bf16.mxu1 %v5008_v57 }
 0x7ac   : > { %2078 = vmatpush1.bf16.msra.mxu0 %v7206_v60  ;;  %2119 = vmatpush1.bf16.msra.mxu1 %v7207_v20 }
 0x7ad   : > { %2079 = vmatprep.subr.bf16.mxu0 %v7208_v21  ;;  %2120 = vmatprep.subr.bf16.mxu1 %v5213_v22 }
 0x7b0   : > { %2080 = vmatpush1.bf16.msra.mxu0 %v7209_v25  ;;  %2121 = vmatpush1.bf16.msra.mxu1 %v5220_v54 }
 0x7b1   : > { %2081 = vmatprep.subr.bf16.mxu0 %v7210_v1  ;;  %2122 = vmatprep.subr.bf16.mxu1 %v5227_v49 }
 0x7b4   : > { %2082 = vmatpush1.bf16.msra.mxu0 %v5233_v59  ;;  %2123 = vmatpush1.bf16.msra.mxu1 %v5239_v24 }
 0x7b5   : > { %2083 = vmatprep.subr.bf16.mxu0 %v5245_v27  ;;  %2124 = vmatprep.subr.bf16.mxu1 %v5251_v35 }
 0x7b8   : > { %2084 = vmatpush1.bf16.msra.mxu0 %v5257_v28  ;;  %2125 = vmatpush1.bf16.msra.mxu1 %v7271_v43 }
 0x7b9   : > { %2156 = vmatprep.subr.bf16.mxu0 %v7272_v53  ;;  %2197 = vmatprep.subr.bf16.mxu1 %v7273_v44 }
 0x86e   : > { %v1998_v46 = vpop.f32.mrb[44].mxu0  ;;  %v2039_v5 = vpop.f32.mrb[44].mxu1 }
 0x86f   : > { %v1999_v48 = vadd.f32 %v1998_v46, %v5645_v36  ;;  %v2040_v2 = vadd.f32 %v2039_v5, %v5647_v12  ;;  %v2000_v55 = vpop.f32.mrb[45].mxu0  ;;  %v2041_v4 = vpop.f32.mrb[45].mxu1  ;;  %v7285_v46 = vld [vmem:[#allocation28_spill] sm:$0xff]  ;;  %v7286_v5 = vld [vmem:[#allocation27_spill] sm:$0xff] }
 0x870   : > { %v2001_v6 = vadd.f32 %v2000_v55, %v5649_v17  ;;  %v2042_v0 = vadd.f32 %v2041_v4, %v5651_v29  ;;  %v2002_v7 = vpop.f32.mrb[46].mxu0  ;;  %v2043_v52 = vpop.f32.mrb[46].mxu1  ;;  %v7289_v55 = vld [vmem:[#allocation31_spill] sm:$0xff]  ;;  %v7290_v4 = vld [vmem:[#allocation32_spill] sm:$0xff] }
 0x871   : > { %v2046_v58 = vadd.f32 %v1999_v48, %v4804_v9  ;;  %v2003_v32 = vpop.f32.mrb[47].mxu0  ;;  %v2044_v57 = vpop.f32.mrb[47].mxu1  ;;  %v2048_v60 = vadd.f32 %v2040_v2, %v4813_v23  ;;  %v7287_v48 = vld [vmem:[#allocation30_spill] sm:$0xff]  ;;  %v7288_v2 = vld [vmem:[#allocation29_spill] sm:$0xff]  ;;  %v7293_v7 = vld [vmem:[#allocation35_spill] sm:$0xff] }
 0x872   : > { %v2047_v56 = vadd.f32 %v2001_v6, %v4806_v13  ;;  %v2049_v20 = vadd.f32 %v2042_v0, %v4817_v3  ;;  %v7291_v6 = vld [vmem:[#allocation33_spill] sm:$0xff]  ;;  %v7292_v0 = vld [vmem:[#allocation34_spill] sm:$0xff]  ;;  %v7294_v52 = vld [vmem:[#allocation36_spill] sm:$0xff] }
 0x873   : > { %v2050_v51 = vmul.f32 0.5, %v2046_v58  ;;  %v7295_v58 = vld [vmem:[#allocation37_spill] sm:$0xff]  ;;  %v7296_v32 = vld [vmem:[#allocation38_spill] sm:$0xff]  ;;  %v7297_v57 = vld [vmem:[#allocation39_spill] sm:$0xff] }
 0x874   : > { %v2054_v14 = vmul.f32 0.5, %v2047_v56  ;;  %v2059_v21 = vmul.f32 0.5, %v2049_v20  ;;  %v7298_v56 = vld [vmem:[#allocation40_spill] sm:$0xff] }
 0x875   : > { %3805 = vtanh.f32 %v2050_v51  ;;  %v7299_v51 = vld [vmem:[#allocation41_spill] sm:$0xff]  ;;  %v7302_v20 = vld [vmem:[#allocation44_spill] sm:$0xff] }
 0x876   : > { %3807 = vtanh.f32 %v2054_v14  ;;  %v7300_v14 = vld [vmem:[#allocation42_spill] sm:$0xff] }
 0x877   : > { %3809 = vtanh.f32 %v2048_v60  ;;  %v7301_v60 = vld [vmem:[#allocation43_spill] sm:$0xff] }
 0x878   : > { %3811 = vtanh.f32 %v2059_v21  ;;  %v7303_v21 = vld [vmem:[#allocation45_spill] sm:$0xff] }
 0x87f   : > { %v3806_v25 = vpop.eup %3805 }
 0x880   : > { %v3808_v1 = vpop.eup %3807  ;;  %v2052_v30 = vmul.f32 0.5, %v3806_v25  ;;  %v7304_v25 = vld [vmem:[#allocation46_spill] sm:$0xff] }
 0x881   : > { %v2056_v33 = vmul.f32 0.5, %v3808_v1  ;;  %v3810_v29 = vpop.eup %3809  ;;  %v7305_v1 = vld [vmem:[#allocation47_spill] sm:$0xff] }
 0x882   : > { %v2053_v42 = vadd.f32 0.5, %v2052_v30  ;;  %v3812_v15 = vpop.eup %3811  ;;  %v7306_v30 = vld [vmem:[#allocation48_spill] sm:$0xff] }
 0x883   : > { %v2057_v36 = vadd.f32 0.5, %v2056_v33  ;;  %v2061_v11 = vmul.f32 0.5, %v3812_v15  ;;  %v7307_v33 = vld [vmem:[#allocation49_spill] sm:$0xff]  ;;  %v7314_v15 = vld [vmem:[#allocation56_spill] sm:$0xff] }
 0x884   : > { %v2064_v12 = vmul.f32 %v3810_v29, %v2053_v42  ;;  %v7308_v42 = vld [vmem:[#allocation50_spill] sm:$0xff]  ;;  %v7309_v29 = vld [vmem:[#allocation51_spill] sm:$0xff] }
 0x885   : > { %v2063_v17 = vmul.f32 %v2057_v36, %v5287_v61  ;;  %v2062_v16 = vadd.f32 0.5, %v2061_v11  ;;  %v7276_v61 = vld [vmem:[#allocation12_spill] sm:$0xff]  ;;  %v7315_v11 = vld [vmem:[#allocation57_spill] sm:$0xff] }
 0x886   : > { %v7310_v36 = vld [vmem:[#allocation52_spill] sm:$0xff] }
 0x887   : > { %v5708_v31 = vadd.f32 %v2064_v12, %v2063_v17  ;;  %v7311_v12 = vld [vmem:[#allocation53_spill] sm:$0xff]  ;;  %v7313_v17 = vld [vmem:[#allocation55_spill] sm:$0xff] }
 0x889   : > { %3813 = vtanh.f32 %v5708_v31 }
 0x893   : > { %v3814_v41 = vpop.eup %3813 }
 0x894   : > { %v2067_v19 = vmul.f32 %v3814_v41, %v2062_v16  ;;  %v7316_v16 = vld [vmem:[#allocation58_spill] sm:$0xff]  ;;  %v7317_v41 = vld [vmem:[#allocation59_spill] sm:$0xff] }
 0x896   : > { %v2068_v8 = vpack.c.bf16 %v2067_v19, %v2067_v19  ;;  %v7318_v19 = vld [vmem:[#allocation60_spill] sm:$0xff] }
 0x898   : > { %2102 = vmatmul.mubr.bf16.vlgmr.msra.gmra.mrb[48].mxu0 %v2068_v8  ;;  %2143 = vmatmul.mubr.bf16.vlgmr.msra.gmra.mrb[48].mxu1 %v2068_v8  ;;  %v7319_v8 = vld [vmem:[#allocation61_spill] sm:$0xff] }
 0x899   : > { %2157 = vmatpush1.bf16.msra.mxu0 %v5067_v38  ;;  %2198 = vmatpush1.bf16.msra.mxu1 %v5073_v50  ;;  %v7281_v38 = vld [vmem:[#allocation26_spill] sm:$0xff]  ;;  %v7282_v50 = vld [vmem:[#allocation25_spill] sm:$0xff] }
 0x89a   : > { %2158 = vmatprep.subr.bf16.mxu0 %v7274_v63  ;;  %2199 = vmatprep.subr.bf16.mxu1 %v7275_v40  ;;  %v7320_v63 = vld [vmem:[#allocation62_spill] sm:$0xff] }
 0x89b   : > { %2188 = vmatprep.mubr.bf16.mxu0 %v7068_v62  ;;  %2229 = vmatprep.mubr.bf16.mxu1 %v7068_v62 }
 0x89d   : > { %2159 = vmatpush1.bf16.msra.mxu0 %v7276_v61  ;;  %2200 = vmatpush1.bf16.msra.mxu1 %v7277_v10  ;;  %v7321_v61 = vld [vmem:[#allocation63_spill] sm:$0xff] }
 0x89e   : > { %2160 = vmatprep.subr.bf16.mxu0 %v7278_v45  ;;  %2201 = vmatprep.subr.bf16.mxu1 %v7279_v18  ;;  %v7322_v45 = vld [vmem:[#allocation8_spill] sm:$0xff] }
 0x8a1   : > { %2161 = vmatpush1.bf16.msra.mxu0 %v7280_v37  ;;  %2202 = vmatpush1.bf16.msra.mxu1 %v7281_v38 }
 0x8a2   : > { %2162 = vmatprep.subr.bf16.mxu0 %v7282_v50  ;;  %2203 = vmatprep.subr.bf16.mxu1 %v7283_v39 }
 0x8a5   : > { %2163 = vmatpush1.bf16.msra.mxu0 %v7284_v26  ;;  %2204 = vmatpush1.bf16.msra.mxu1 %v7285_v46 }
 0x8a6   : > { %2164 = vmatprep.subr.bf16.mxu0 %v7286_v5  ;;  %2205 = vmatprep.subr.bf16.mxu1 %v7287_v48 }
 0x8a9   : > { %2165 = vmatpush1.bf16.msra.mxu0 %v7288_v2  ;;  %2206 = vmatpush1.bf16.msra.mxu1 %v7289_v55 }
 0x8aa   : > { %2166 = vmatprep.subr.bf16.mxu0 %v7290_v4  ;;  %2207 = vmatprep.subr.bf16.mxu1 %v7291_v6 }
 0x8ad   : > { %2167 = vmatpush1.bf16.msra.mxu0 %v7292_v0  ;;  %2208 = vmatpush1.bf16.msra.mxu1 %v7293_v7 }
 0x8ae   : > { %2168 = vmatprep.subr.bf16.mxu0 %v7294_v52  ;;  %2209 = vmatprep.subr.bf16.mxu1 %v7295_v58 }
 0x8b1   : > { %2169 = vmatpush1.bf16.msra.mxu0 %v7296_v32  ;;  %2210 = vmatpush1.bf16.msra.mxu1 %v7297_v57 }
 0x8b2   : > { %2170 = vmatprep.subr.bf16.mxu0 %v7298_v56  ;;  %2211 = vmatprep.subr.bf16.mxu1 %v7299_v51 }
 0x8b5   : > { %2171 = vmatpush1.bf16.msra.mxu0 %v7300_v14  ;;  %2212 = vmatpush1.bf16.msra.mxu1 %v7301_v60 }
 0x8b6   : > { %2261 = vmatprep.subr.bf16.mxu0 %v7302_v20  ;;  %2302 = vmatprep.subr.bf16.mxu1 %v7303_v21 }
 0x8b8   : > { %2189 = vmatmul.mubr.bf16.vlgmr.msra.gmra.mrb[52].mxu0 %v5661_v34  ;;  %2230 = vmatmul.mubr.bf16.vlgmr.msra.gmra.mrb[52].mxu1 %v5661_v34  ;;  %v7312_v34 = vld [vmem:[#allocation54_spill] sm:$0xff] }
 0x8b9   : > { %2262 = vmatpush1.bf16.msra.mxu0 %v7304_v25  ;;  %2303 = vmatpush1.bf16.msra.mxu1 %v7305_v1 }
 0x8ba   : > { %2263 = vmatprep.subr.bf16.mxu0 %v7306_v30  ;;  %2304 = vmatprep.subr.bf16.mxu1 %v7307_v33  ;;  %v3523_v33 = vld [vmem:[%s4161_s30 + $0x90] sm:$0xff] }
 0x8bb   : > { %2293 = vmatprep.mubr.bf16.mxu0 %v7068_v62  ;;  %2334 = vmatprep.mubr.bf16.mxu1 %v7068_v62 }
 0x8bd   : > { %2264 = vmatpush1.bf16.msra.mxu0 %v7308_v42  ;;  %2305 = vmatpush1.bf16.msra.mxu1 %v7309_v29 }
 0x8be   : > { %2265 = vmatprep.subr.bf16.mxu0 %v7310_v36  ;;  %2306 = vmatprep.subr.bf16.mxu1 %v7311_v12  ;;  %v3522_v36 = vld [vmem:[%s4161_s30 + $0x88] sm:$0xff] }
 0x8c1   : > { %2266 = vmatpush1.bf16.msra.mxu0 %v7312_v34  ;;  %2307 = vmatpush1.bf16.msra.mxu1 %v7313_v17  ;;  %v7323_v34 = vld [vmem:[#allocation10_spill] sm:$0xff]  ;;  %v7324_v17 = vld [vmem:[#allocation9_spill] sm:$0xff] }
 0x8c2   : > { %2267 = vmatprep.subr.bf16.mxu0 %v7314_v15  ;;  %2308 = vmatprep.subr.bf16.mxu1 %v7315_v11  ;;  %v7325_v15 = vld [vmem:[#allocation13_spill] sm:$0xff]  ;;  %v7326_v11 = vld [vmem:[#allocation11_spill] sm:$0xff] }
 0x8c5   : > { %2268 = vmatpush1.bf16.msra.mxu0 %v7316_v16  ;;  %2309 = vmatpush1.bf16.msra.mxu1 %v7317_v41  ;;  %v7327_v16 = vld [vmem:[#allocation64_spill] sm:$0xff]  ;;  %v7328_v41 = vld [vmem:[#allocation65_spill] sm:$0xff] }
 0x8c6   : > { %2269 = vmatprep.subr.bf16.mxu0 %v7318_v19  ;;  %2310 = vmatprep.subr.bf16.mxu1 %v7319_v8  ;;  %v7329_v19 = vld [vmem:[#allocation66_spill] sm:$0xff] }
 0x8c9   : > { %2270 = vmatpush1.bf16.msra.mxu0 %v7320_v63  ;;  %2311 = vmatpush1.bf16.msra.mxu1 %v7321_v61  ;;  %v7330_v63 = vld [vmem:[#allocation67_spill] sm:$0xff]  ;;  %v7331_v61 = vld [vmem:[#allocation68_spill] sm:$0xff] }
 0x8ca   : > { %2271 = vmatprep.subr.bf16.mxu0 %v7322_v45  ;;  %2312 = vmatprep.subr.bf16.mxu1 %v7323_v34  ;;  %v7332_v45 = vld [vmem:[#allocation69_spill] sm:$0xff]  ;;  %v7333_v34 = vld [vmem:[#allocation70_spill] sm:$0xff] }
 0x8cd   : > { %2272 = vmatpush1.bf16.msra.mxu0 %v7324_v17  ;;  %2313 = vmatpush1.bf16.msra.mxu1 %v7325_v15  ;;  %v7334_v17 = vld [vmem:[#allocation14_spill] sm:$0xff] }
 0x8ce   : > { %2273 = vmatprep.subr.bf16.mxu0 %v7326_v11  ;;  %2314 = vmatprep.subr.bf16.mxu1 %v7327_v16  ;;  %v7335_v15 = vld [vmem:[#allocation18_spill] sm:$0xff] }
 0x8d1   : > { %2274 = vmatpush1.bf16.msra.mxu0 %v7328_v41  ;;  %2315 = vmatpush1.bf16.msra.mxu1 %v7329_v19 }
 0x8d2   : > { %2275 = vmatprep.subr.bf16.mxu0 %v7330_v63  ;;  %2316 = vmatprep.subr.bf16.mxu1 %v7331_v61 }
 0x8d5   : > { %2276 = vmatpush1.bf16.msra.mxu0 %v7332_v45  ;;  %2317 = vmatpush1.bf16.msra.mxu1 %v7333_v34  ;;  %v3521_v45 = vld [vmem:[%s4161_s30 + $0x80] sm:$0xff] }
 0x8d6   : > { %2366 = vmatprep.subr.bf16.mxu0 %v7334_v17  ;;  %2407 = vmatprep.subr.bf16.mxu1 %v7335_v15 }
 0x96b   : > { %v5781_v16 = vpop.f32.mrb[48].mxu0  ;;  %v5783_v41 = vpop.f32.mrb[48].mxu1 }
 0x96c   : > { %v5785_v11 = vpop.f32.mrb[49].mxu0  ;;  %v5787_v19 = vpop.f32.mrb[49].mxu1 }
 0x96d   : > { %v2107_v63 = vpop.f32.mrb[50].mxu0  ;;  %v2148_v8 = vpop.f32.mrb[50].mxu1 }
 0x96e   : > { %v2108_v61 = vpop.f32.mrb[51].mxu0  ;;  %v2149_v12 = vpop.f32.mrb[51].mxu1 }
 0x96f   : > { %v3524_v12 = vld [vmem:[%s4161_s30 + $0x98] sm:$0xff] }
 0x98b   : > { %v2190_v34 = vpop.f32.mrb[52].mxu0  ;;  %v2231_v17 = vpop.f32.mrb[52].mxu1 }
 0x98c   : > { %v2238_v29 = vadd.f32 %v3521_v45, %v2190_v34  ;;  %v2192_v15 = vpop.f32.mrb[53].mxu0  ;;  %v2233_v42 = vpop.f32.mrb[53].mxu1  ;;  %v2240_v8 = vadd.f32 %v3523_v33, %v2231_v17  ;;  %v5830_v17 = vld [vmem:[%s6714_s3 + $0x20] ss:$16 sps:$4 sm:$0xff]  }
 0x98d   : > { %v2239_v30 = vadd.f32 %v3522_v36, %v2192_v15  ;;  %v2194_v1 = vpop.f32.mrb[54].mxu0  ;;  %v2235_v25 = vpop.f32.mrb[54].mxu1  ;;  %v2241_v63 = vadd.f32 %v3524_v12, %v2233_v42  ;;  %v5836_v15 = vld [vmem:[%s6714_s3 + $0x28] ss:$16 sps:$4 sm:$0xff]   ;;  %v5848_v12 = vld [vmem:[%s6714_s3 + $0x4c] ss:$16 sps:$4 sm:$0xff]  }
 0x98e   : > { %v2242_v21 = vmul.f32 0.5, %v2238_v29  ;;  %v2195_v20 = vpop.f32.mrb[55].mxu0  ;;  %v2236_v60 = vpop.f32.mrb[55].mxu1 }
 0x98f   : > { %v2246_v14 = vmul.f32 0.5, %v2239_v30  ;;  %v2251_v61 = vmul.f32 0.5, %v2241_v63  ;;  %v5854_v63 = vld [vmem:[%s6714_s3 + $0x40] ss:$16 sps:$4 sm:$0xff]  }
 0x990   : > { %3815 = vtanh.f32 %v2242_v21 }
 0x991   : > { %3817 = vtanh.f32 %v2246_v14 }
 0x992   : > { %3819 = vtanh.f32 %v2240_v8  ;;  %v5842_v8 = vld [vmem:[%s6714_s3 + $0x44] ss:$16 sps:$4 sm:$0xff]  }
 0x993   : > { %3821 = vtanh.f32 %v2251_v61  ;;  %v5860_v61 = vld [vmem:[%s6714_s3 + $0x48] ss:$16 sps:$4 sm:$0xff]  }
 0x99a   : > { %v3816_v51 = vpop.eup %3815 }
 0x99b   : > { %v3818_v56 = vpop.eup %3817  ;;  %v2244_v34 = vmul.f32 0.5, %v3816_v51  ;;  %v5822_v51 = vld [vmem:[%s6714_s3 + $0x2c] ss:$16 sps:$4 sm:$0xff]  }
 0x99c   : > { %v2248_v45 = vmul.f32 0.5, %v3818_v56  ;;  %v3820_v36 = vpop.eup %3819  ;;  %v5816_v56 = vld [vmem:[%s6714_s3 + $0x24] ss:$16 sps:$4 sm:$0xff]  }
 0x99d   : > { %v2245_v57 = vadd.f32 0.5, %v2244_v34  ;;  %v3822_v14 = vpop.eup %3821  ;;  %v5866_v34 = vld [vmem:[%s6714_s3 + $0x64] ss:$16 sps:$4 sm:$0xff]  }
 0x99e   : > { %v2249_v1 = vadd.f32 0.5, %v2248_v45  ;;  %v2253_v21 = vmul.f32 0.5, %v3822_v14  ;;  %v5872_v45 = vld [vmem:[%s6714_s3 + $0x6c] ss:$16 sps:$4 sm:$0xff]   ;;  %v5902_v14 = vld [vmem:[%s6714_s3 + $0x80] ss:$16 sps:$4 sm:$0xff]  }
 0x99f   : > { %v2256_v25 = vmul.f32 %v3820_v36, %v2245_v57  ;;  %v5804_v57 = vld [vmem:[%s6714_s3] ss:$16 sps:$4 sm:$0xff]   ;;  %7336 = vst [vmem:[#allocation17_spill] sm:$0xff] %v5902_v14 }
 0x9a0   : > { %v2255_v20 = vmul.f32 %v2249_v1, %v5658_v47  ;;  %v2254_v30 = vadd.f32 0.5, %v2253_v21  ;;  %v5810_v47 = vld [vmem:[%s6714_s3 + $0x8] ss:$16 sps:$4 sm:$0xff]   ;;  %v5878_v36 = vld [vmem:[%s6714_s3 + $0x60] ss:$16 sps:$4 sm:$0xff]  }
 0x9a1   : > { %v5884_v1 = vld [vmem:[%s6714_s3 + $0x68] ss:$16 sps:$4 sm:$0xff]  }
 0x9a2   : > { %v5794_v60 = vadd.f32 %v2256_v25, %v2255_v20  ;;  %v5890_v25 = vld [vmem:[%s6714_s3 + $0x84] ss:$16 sps:$4 sm:$0xff]   ;;  %v5896_v20 = vld [vmem:[%s6714_s3 + $0x8c] ss:$16 sps:$4 sm:$0xff]   ;;  %v5908_v21 = vld [vmem:[%s6714_s3 + $0x88] ss:$16 sps:$4 sm:$0xff]  }
 0x9a3   : > { %7337 = vst [vmem:[#allocation20_spill] sm:$0xff] %v5908_v21 }
 0x9a4   : > { %3823 = vtanh.f32 %v5794_v60 }
 0x9ae   : > { %v3824_v33 = vpop.eup %3823 }
 0x9af   : > { %v2259_v42 = vmul.f32 %v3824_v33, %v2254_v30  ;;  %v5914_v30 = vld [vmem:[%s6714_s3 + $0xa4] ss:$16 sps:$4 sm:$0xff]   ;;  %v5921_v33 = vld [vmem:[%s6714_s3 + $0xa0] ss:$16 sps:$4 sm:$0xff]  }
 0x9b0   : > { %7338 = vst [vmem:[#allocation19_spill] sm:$0xff] %v5914_v30  ;;  %7339 = vst [vmem:[#allocation15_spill] sm:$0xff] %v5921_v33 }
 0x9b1   : > { %v5797_v29 = vpack.c.bf16 %v2259_v42, %v2259_v42  ;;  %v5928_v42 = vld [vmem:[%s6714_s3 + $0xc4] ss:$16 sps:$4 sm:$0xff]  }
 0x9b2   : > { %7340 = vst [vmem:[#allocation22_spill] sm:$0xff] %v5928_v42 }
 0x9b3   : > { %2294 = vmatmul.mubr.bf16.vlgmr.msra.gmra.mrb[56].mxu0 %v5797_v29  ;;  %2335 = vmatmul.mubr.bf16.vlgmr.msra.gmra.mrb[56].mxu1 %v5797_v29 }
 0x9b4   : > { %2367 = vmatpush1.bf16.msra.mxu0 %v5804_v57  ;;  %2408 = vmatpush1.bf16.msra.mxu1 %v5810_v47 }
 0x9b5   : > { %2368 = vmatprep.subr.bf16.mxu0 %v5816_v56  ;;  %2409 = vmatprep.subr.bf16.mxu1 %v5822_v51 }
 0x9b6   : > { %2398 = vmatprep.mubr.bf16.mxu0 %v7068_v62  ;;  %2439 = vmatprep.mubr.bf16.mxu1 %v7068_v62 }
 0x9b8   : > { %2369 = vmatpush1.bf16.msra.mxu0 %v5830_v17  ;;  %2410 = vmatpush1.bf16.msra.mxu1 %v5836_v15 }
 0x9b9   : > { %2370 = vmatprep.subr.bf16.mxu0 %v5842_v8  ;;  %2411 = vmatprep.subr.bf16.mxu1 %v5848_v12 }
 0x9bc   : > { %2371 = vmatpush1.bf16.msra.mxu0 %v5854_v63  ;;  %2412 = vmatpush1.bf16.msra.mxu1 %v5860_v61 }
 0x9bd   : > { %2372 = vmatprep.subr.bf16.mxu0 %v5866_v34  ;;  %2413 = vmatprep.subr.bf16.mxu1 %v5872_v45 }
 0x9c0   : > { %2373 = vmatpush1.bf16.msra.mxu0 %v5878_v36  ;;  %2414 = vmatpush1.bf16.msra.mxu1 %v5884_v1 }
 0x9c1   : > { %2374 = vmatprep.subr.bf16.mxu0 %v5890_v25  ;;  %2415 = vmatprep.subr.bf16.mxu1 %v5896_v20 }
 0x9c4   : > { %2375 = vmatpush1.bf16.msra.mxu0 %v5902_v14  ;;  %2416 = vmatpush1.bf16.msra.mxu1 %v5908_v21 }
 0x9c5   : > { %2376 = vmatprep.subr.bf16.mxu0 %v5914_v30  ;;  %2417 = vmatprep.subr.bf16.mxu1 %v5213_v22 }
 0x9c8   : > { %2377 = vmatpush1.bf16.msra.mxu0 %v5921_v33  ;;  %2418 = vmatpush1.bf16.msra.mxu1 %v5220_v54 }
 0x9c9   : > { %2378 = vmatprep.subr.bf16.mxu0 %v5928_v42  ;;  %2419 = vmatprep.subr.bf16.mxu1 %v5227_v49 }
 0x9cc   : > { %2379 = vmatpush1.bf16.msra.mxu0 %v5233_v59  ;;  %2420 = vmatpush1.bf16.msra.mxu1 %v5239_v24 }
 0x9cd   : > { %2380 = vmatprep.subr.bf16.mxu0 %v5245_v27  ;;  %2421 = vmatprep.subr.bf16.mxu1 %v5251_v35 }
 0x9d0   : > { %2381 = vmatpush1.bf16.msra.mxu0 %v5257_v28  ;;  %2422 = vmatpush1.bf16.msra.mxu1 %v7271_v43 }
 0x9d1   : > { %2453 = vmatprep.subr.bf16.mxu0 %v7272_v53  ;;  %2494 = vmatprep.subr.bf16.mxu1 %v7273_v44 }
 0xa86   : > { %v2295_v22 = vpop.f32.mrb[56].mxu0  ;;  %v2336_v54 = vpop.f32.mrb[56].mxu1 }
 0xa87   : > { %v2296_v49 = vadd.f32 %v2295_v22, %v5781_v16  ;;  %v2337_v59 = vadd.f32 %v2336_v54, %v5783_v41  ;;  %v2297_v42 = vpop.f32.mrb[57].mxu0  ;;  %v2338_v24 = vpop.f32.mrb[57].mxu1 }
 0xa88   : > { %v2298_v27 = vadd.f32 %v2297_v42, %v5785_v11  ;;  %v2339_v35 = vadd.f32 %v2338_v24, %v5787_v19  ;;  %v2299_v33 = vpop.f32.mrb[58].mxu0  ;;  %v2340_v28 = vpop.f32.mrb[58].mxu1 }
 0xa89   : > { %v2343_v43 = vadd.f32 %v2296_v49, %v4804_v9  ;;  %v2300_v30 = vpop.f32.mrb[59].mxu0  ;;  %v2341_v53 = vpop.f32.mrb[59].mxu1  ;;  %v2345_v16 = vadd.f32 %v2337_v59, %v4813_v23 }
 0xa8a   : > { %v2344_v44 = vadd.f32 %v2298_v27, %v4806_v13  ;;  %v2346_v41 = vadd.f32 %v2339_v35, %v4817_v3 }
 0xa8b   : > { %v2347_v21 = vmul.f32 0.5, %v2343_v43 }
 0xa8c   : > { %v2351_v14 = vmul.f32 0.5, %v2344_v44  ;;  %v2356_v11 = vmul.f32 0.5, %v2346_v41  ;;  %v5955_v44 = vld [vmem:[%s6712_s1] ss:$16 sps:$4 sm:$0xff]  }
 0xa8d   : > { %3825 = vtanh.f32 %v2347_v21  ;;  %v5976_v41 = vld [vmem:[%s6712_s1 + $0x20] ss:$16 sps:$4 sm:$0xff]  }
 0xa8e   : > { %3827 = vtanh.f32 %v2351_v14  ;;  %7342 = vst [vmem:[#allocation21_spill] sm:$0xff] %v5976_v41 }
 0xa8f   : > { %3829 = vtanh.f32 %v2345_v16  ;;  %v5967_v16 = vld [vmem:[%s6712_s1 + $0x24] ss:$16 sps:$4 sm:$0xff]  }
 0xa90   : > { %3831 = vtanh.f32 %v2356_v11  ;;  %7341 = vst [vmem:[#allocation12_spill] sm:$0xff] %v5967_v16  ;;  %v5983_v11 = vld [vmem:[%s6712_s1 + $0x44] ss:$16 sps:$4 sm:$0xff]  }
 0xa91   : > { %7343 = vst [vmem:[#allocation16_spill] sm:$0xff] %v5983_v11 }
 0xa97   : > { %v3826_v42 = vpop.eup %3825 }
 0xa98   : > { %v3828_v19 = vpop.eup %3827  ;;  %v2349_v33 = vmul.f32 0.5, %v3826_v42  ;;  %v7365_v42 = vld [vmem:[#allocation60_spill] sm:$0xff] }
 0xa99   : > { %v2353_v22 = vmul.f32 0.5, %v3828_v19  ;;  %v3830_v30 = vpop.eup %3829  ;;  %v7366_v19 = vld [vmem:[#allocation61_spill] sm:$0xff] }
 0xa9a   : > { %v2350_v54 = vadd.f32 0.5, %v2349_v33  ;;  %v3832_v14 = vpop.eup %3831  ;;  %v7367_v33 = vld [vmem:[#allocation62_spill] sm:$0xff] }
 0xa9b   : > { %v2354_v49 = vadd.f32 0.5, %v2353_v22  ;;  %v2358_v21 = vmul.f32 0.5, %v3832_v14  ;;  %v7368_v22 = vld [vmem:[#allocation63_spill] sm:$0xff]  ;;  %v7374_v14 = vld [vmem:[#allocation64_spill] sm:$0xff] }
 0xa9c   : > { %v2361_v24 = vmul.f32 %v3830_v30, %v2350_v54  ;;  %v7369_v54 = vld [vmem:[#allocation8_spill] sm:$0xff]  ;;  %v7370_v30 = vld [vmem:[#allocation10_spill] sm:$0xff] }
 0xa9d   : > { %v2360_v27 = vmul.f32 %v2354_v49, %v5708_v31  ;;  %v2359_v59 = vadd.f32 0.5, %v2358_v21  ;;  %v5961_v31 = vld [vmem:[%s6712_s1 + $0x8] ss:$16 sps:$4 sm:$0xff]  }
 0xa9e   : > { %v7371_v49 = vld [vmem:[#allocation9_spill] sm:$0xff] }
 0xa9f   : > { %v5949_v28 = vadd.f32 %v2361_v24, %v2360_v27  ;;  %v7372_v24 = vld [vmem:[#allocation13_spill] sm:$0xff]  ;;  %v7373_v27 = vld [vmem:[#allocation11_spill] sm:$0xff] }
 0xaa0   : > { %v7375_v21 = vld [vmem:[#allocation65_spill] sm:$0xff] }
 0xaa1   : > { %3833 = vtanh.f32 %v5949_v28 }
 0xaab   : > { %v3834_v35 = vpop.eup %3833 }
 0xaac   : > { %v2364_v43 = vmul.f32 %v3834_v35, %v2359_v59  ;;  %v7376_v59 = vld [vmem:[#allocation66_spill] sm:$0xff]  ;;  %v7377_v35 = vld [vmem:[#allocation67_spill] sm:$0xff] }
 0xaae   : > { %v2365_v53 = vpack.c.bf16 %v2364_v43, %v2364_v43  ;;  %v7378_v43 = vld [vmem:[#allocation68_spill] sm:$0xff] }
 0xab0   : > { %2399 = vmatmul.mubr.bf16.vlgmr.msra.gmra.mrb[60].mxu0 %v2365_v53  ;;  %2440 = vmatmul.mubr.bf16.vlgmr.msra.gmra.mrb[60].mxu1 %v2365_v53  ;;  %v7379_v53 = vld [vmem:[#allocation69_spill] sm:$0xff] }
 0xab1   : > { %2454 = vmatpush1.bf16.msra.mxu0 %v5955_v44  ;;  %2495 = vmatpush1.bf16.msra.mxu1 %v5961_v31 }
 0xab2   : > { %2455 = vmatprep.subr.bf16.mxu0 %v5967_v16  ;;  %2496 = vmatprep.subr.bf16.mxu1 %v7275_v40  ;;  %v7344_v40 = vld [vmem:[#allocation39_spill] sm:$0xff] }
 0xab3   : > { %2485 = vmatprep.mubr.bf16.mxu0 %v7068_v62  ;;  %2526 = vmatprep.mubr.bf16.mxu1 %v7068_v62 }
 0xab5   : > { %2456 = vmatpush1.bf16.msra.mxu0 %v5976_v41  ;;  %2497 = vmatpush1.bf16.msra.mxu1 %v7277_v10  ;;  %v7345_v10 = vld [vmem:[#allocation40_spill] sm:$0xff] }
 0xab6   : > { %2457 = vmatprep.subr.bf16.mxu0 %v5983_v11  ;;  %2498 = vmatprep.subr.bf16.mxu1 %v7279_v18  ;;  %v7346_v18 = vld [vmem:[#allocation41_spill] sm:$0xff] }
 0xab9   : > { %2458 = vmatpush1.bf16.msra.mxu0 %v7280_v37  ;;  %2499 = vmatpush1.bf16.msra.mxu1 %v7281_v38  ;;  %v7347_v37 = vld [vmem:[#allocation42_spill] sm:$0xff]  ;;  %v7348_v38 = vld [vmem:[#allocation43_spill] sm:$0xff] }
 0xaba   : > { %2459 = vmatprep.subr.bf16.mxu0 %v7282_v50  ;;  %2500 = vmatprep.subr.bf16.mxu1 %v7283_v39  ;;  %v7349_v50 = vld [vmem:[#allocation44_spill] sm:$0xff]  ;;  %v7350_v39 = vld [vmem:[#allocation45_spill] sm:$0xff] }
 0xabd   : > { %2460 = vmatpush1.bf16.msra.mxu0 %v7284_v26  ;;  %2501 = vmatpush1.bf16.msra.mxu1 %v7285_v46  ;;  %v7351_v26 = vld [vmem:[#allocation46_spill] sm:$0xff]  ;;  %v7352_v46 = vld [vmem:[#allocation47_spill] sm:$0xff] }
 0xabe   : > { %2461 = vmatprep.subr.bf16.mxu0 %v7286_v5  ;;  %2502 = vmatprep.subr.bf16.mxu1 %v7287_v48  ;;  %v7353_v5 = vld [vmem:[#allocation48_spill] sm:$0xff]  ;;  %v7354_v48 = vld [vmem:[#allocation49_spill] sm:$0xff] }
 0xac1   : > { %2462 = vmatpush1.bf16.msra.mxu0 %v7288_v2  ;;  %2503 = vmatpush1.bf16.msra.mxu1 %v7289_v55  ;;  %v7355_v2 = vld [vmem:[#allocation50_spill] sm:$0xff]  ;;  %v7356_v55 = vld [vmem:[#allocation51_spill] sm:$0xff] }
 0xac2   : > { %2463 = vmatprep.subr.bf16.mxu0 %v7290_v4  ;;  %2504 = vmatprep.subr.bf16.mxu1 %v7291_v6  ;;  %v7357_v4 = vld [vmem:[#allocation52_spill] sm:$0xff]  ;;  %v7358_v6 = vld [vmem:[#allocation53_spill] sm:$0xff] }
 0xac5   : > { %2464 = vmatpush1.bf16.msra.mxu0 %v7292_v0  ;;  %2505 = vmatpush1.bf16.msra.mxu1 %v7293_v7  ;;  %v7359_v0 = vld [vmem:[#allocation54_spill] sm:$0xff]  ;;  %v7360_v7 = vld [vmem:[#allocation55_spill] sm:$0xff] }
 0xac6   : > { %2465 = vmatprep.subr.bf16.mxu0 %v7294_v52  ;;  %2506 = vmatprep.subr.bf16.mxu1 %v7295_v58  ;;  %v7361_v52 = vld [vmem:[#allocation56_spill] sm:$0xff]  ;;  %v7362_v58 = vld [vmem:[#allocation57_spill] sm:$0xff] }
 0xac9   : > { %2466 = vmatpush1.bf16.msra.mxu0 %v7296_v32  ;;  %2507 = vmatpush1.bf16.msra.mxu1 %v7344_v40  ;;  %v7363_v32 = vld [vmem:[#allocation58_spill] sm:$0xff] }
 0xaca   : > { %2467 = vmatprep.subr.bf16.mxu0 %v7345_v10  ;;  %2508 = vmatprep.subr.bf16.mxu1 %v7346_v18  ;;  %v7380_v40 = vld [vmem:[#allocation70_spill] sm:$0xff]  ;;  %v6054_v18 = vld [vmem:[%s6714_s3 + $0xc] ss:$16 sps:$4 sm:$0xff]  }
 0xacb   : > { %v6048_v10 = vld [vmem:[%s6714_s3 + $0x4] ss:$16 sps:$4 sm:$0xff]  }
 0xacd   : > { %2468 = vmatpush1.bf16.msra.mxu0 %v7347_v37  ;;  %2509 = vmatpush1.bf16.msra.mxu1 %v7348_v38 }
 0xace   : > { %2558 = vmatprep.subr.bf16.mxu0 %v7349_v50  ;;  %2599 = vmatprep.subr.bf16.mxu1 %v7350_v39 }
 0xad0   : > { %2486 = vmatmul.mubr.bf16.vlgmr.msra.gmra.mrb[64].mxu0 %v5797_v29  ;;  %2527 = vmatmul.mubr.bf16.vlgmr.msra.gmra.mrb[64].mxu1 %v5797_v29  ;;  %v7364_v29 = vld [vmem:[#allocation59_spill] sm:$0xff] }
 0xad1   : > { %2559 = vmatpush1.bf16.msra.mxu0 %v7351_v26  ;;  %2600 = vmatpush1.bf16.msra.mxu1 %v7352_v46 }
 0xad2   : > { %2560 = vmatprep.subr.bf16.mxu0 %v7353_v5  ;;  %2601 = vmatprep.subr.bf16.mxu1 %v7354_v48 }
 0xad3   : > { %2590 = vmatprep.mubr.bf16.mxu0 %v7068_v62  ;;  %2631 = vmatprep.mubr.bf16.mxu1 %v7068_v62 }
 0xad5   : > { %2561 = vmatpush1.bf16.msra.mxu0 %v7355_v2  ;;  %2602 = vmatpush1.bf16.msra.mxu1 %v7356_v55  ;;  %v3525_v2 = vld [vmem:[%s4161_s30 + $0xa0] sm:$0xff]  ;;  %v3526_v55 = vld [vmem:[%s4161_s30 + $0xa8] sm:$0xff] }
 0xad6   : > { %2562 = vmatprep.subr.bf16.mxu0 %v7357_v4  ;;  %2603 = vmatprep.subr.bf16.mxu1 %v7358_v6 }
 0xad9   : > { %2563 = vmatpush1.bf16.msra.mxu0 %v7359_v0  ;;  %2604 = vmatpush1.bf16.msra.mxu1 %v7360_v7 }
 0xada   : > { %2564 = vmatprep.subr.bf16.mxu0 %v7361_v52  ;;  %2605 = vmatprep.subr.bf16.mxu1 %v7362_v58  ;;  %v3527_v58 = vld [vmem:[%s4161_s30 + $0xb0] sm:$0xff] }
 0xadd   : > { %2565 = vmatpush1.bf16.msra.mxu0 %v7363_v32  ;;  %2606 = vmatpush1.bf16.msra.mxu1 %v7364_v29 }
 0xade   : > { %2566 = vmatprep.subr.bf16.mxu0 %v7365_v42  ;;  %2607 = vmatprep.subr.bf16.mxu1 %v7366_v19 }
 0xae1   : > { %2567 = vmatpush1.bf16.msra.mxu0 %v7367_v33  ;;  %2608 = vmatpush1.bf16.msra.mxu1 %v7368_v22 }
 0xae2   : > { %2568 = vmatprep.subr.bf16.mxu0 %v7369_v54  ;;  %2609 = vmatprep.subr.bf16.mxu1 %v7370_v30 }
 0xae5   : > { %2569 = vmatpush1.bf16.msra.mxu0 %v7371_v49  ;;  %2610 = vmatpush1.bf16.msra.mxu1 %v7372_v24  ;;  %v3528_v49 = vld [vmem:[%s4161_s30 + $0xb8] sm:$0xff] }
 0xae6   : > { %2570 = vmatprep.subr.bf16.mxu0 %v7373_v27  ;;  %2611 = vmatprep.subr.bf16.mxu1 %v7374_v14 }
 0xae9   : > { %2571 = vmatpush1.bf16.msra.mxu0 %v7375_v21  ;;  %2612 = vmatpush1.bf16.msra.mxu1 %v7376_v59 }
 0xaea   : > { %2572 = vmatprep.subr.bf16.mxu0 %v7377_v35  ;;  %2613 = vmatprep.subr.bf16.mxu1 %v7378_v43 }
 0xaed   : > { %2573 = vmatpush1.bf16.msra.mxu0 %v7379_v53  ;;  %2614 = vmatpush1.bf16.msra.mxu1 %v7380_v40 }
 0xaee   : > { %2663 = vmatprep.subr.bf16.mxu0 %v6048_v10  ;;  %2704 = vmatprep.subr.bf16.mxu1 %v6054_v18 }
 0xb83   : > { %v6057_v37 = vpop.f32.mrb[60].mxu0  ;;  %v6059_v38 = vpop.f32.mrb[60].mxu1 }
 0xb84   : > { %v6061_v50 = vpop.f32.mrb[61].mxu0  ;;  %v6063_v39 = vpop.f32.mrb[61].mxu1 }
 0xb85   : > { %v2404_v26 = vpop.f32.mrb[62].mxu0  ;;  %v2445_v46 = vpop.f32.mrb[62].mxu1 }
 0xb86   : > { %v2405_v5 = vpop.f32.mrb[63].mxu0  ;;  %v2446_v48 = vpop.f32.mrb[63].mxu1 }
 0xba3   : > { %v2487_v4 = vpop.f32.mrb[64].mxu0  ;;  %v2528_v6 = vpop.f32.mrb[64].mxu1 }
 0xba4   : > { %v2535_v0 = vadd.f32 %v3525_v2, %v2487_v4  ;;  %v2489_v7 = vpop.f32.mrb[65].mxu0  ;;  %v2530_v52 = vpop.f32.mrb[65].mxu1  ;;  %v2537_v30 = vadd.f32 %v3527_v58, %v2528_v6  ;;  %v6101_v58 = vld [vmem:[%s6714_s3 + $0xac] ss:$16 sps:$4 sm:$0xff]  }
 0xba5   : > { %v2536_v32 = vadd.f32 %v3526_v55, %v2489_v7  ;;  %v2491_v29 = vpop.f32.mrb[66].mxu0  ;;  %v2532_v42 = vpop.f32.mrb[66].mxu1  ;;  %v2538_v24 = vadd.f32 %v3528_v49, %v2530_v52  ;;  %v7382_v7 = vld [vmem:[#allocation20_spill] sm:$0xff]  ;;  %v7383_v52 = vld [vmem:[#allocation19_spill] sm:$0xff] }
 0xba6   : > { %v2539_v19 = vmul.f32 0.5, %v2535_v0  ;;  %v2492_v33 = vpop.f32.mrb[67].mxu0  ;;  %v2533_v22 = vpop.f32.mrb[67].mxu1  ;;  %v6108_v29 = vld [vmem:[%s6714_s3 + $0xa8] ss:$16 sps:$4 sm:$0xff]   ;;  %v7385_v42 = vld [vmem:[#allocation22_spill] sm:$0xff] }
 0xba7   : > { %v2543_v54 = vmul.f32 0.5, %v2536_v32  ;;  %v2548_v27 = vmul.f32 0.5, %v2538_v24  ;;  %v7384_v32 = vld [vmem:[#allocation15_spill] sm:$0xff]  ;;  %v6121_v33 = vld [vmem:[%s6714_s3 + $0xc0] ss:$16 sps:$4 sm:$0xff]  }
 0xba8   : > { %3835 = vtanh.f32 %v2539_v19  ;;  %v6115_v19 = vld [vmem:[%s6714_s3 + $0xcc] ss:$16 sps:$4 sm:$0xff]   ;;  %v6127_v22 = vld [vmem:[%s6714_s3 + $0xc8] ss:$16 sps:$4 sm:$0xff]   ;;  %v6145_v49 = vld [vmem:[%s6714_s3 + $0xe0] ss:$16 sps:$4 sm:$0xff]  }
 0xba9   : > { %3837 = vtanh.f32 %v2543_v54  ;;  %v6133_v54 = vld [vmem:[%s6714_s3 + $0xe4] ss:$16 sps:$4 sm:$0xff]   ;;  %v6151_v24 = vld [vmem:[%s6714_s3 + $0xe8] ss:$16 sps:$4 sm:$0xff]  }
 0xbaa   : > { %3839 = vtanh.f32 %v2537_v30  ;;  %v6139_v30 = vld [vmem:[%s6714_s3 + $0xec] ss:$16 sps:$4 sm:$0xff]   ;;  %7386 = vst [vmem:[#allocation24_spill] sm:$0xff] %v6151_v24 }
 0xbab   : > { %3841 = vtanh.f32 %v2548_v27  ;;  %v6157_v27 = vld [vmem:[%s6712_s1 + $0x4] ss:$16 sps:$4 sm:$0xff]  }
 0xbac   : > { %7387 = vst [vmem:[#allocation23_spill] sm:$0xff] %v6157_v27 }
 0xbb2   : > { %v3836_v14 = vpop.eup %3835 }
 0xbb3   : > { %v3838_v21 = vpop.eup %3837  ;;  %v2541_v59 = vmul.f32 0.5, %v3836_v14  ;;  %v6163_v14 = vld [vmem:[%s6712_s1 + $0xc] ss:$16 sps:$4 sm:$0xff]  }
 0xbb4   : > { %v2545_v35 = vmul.f32 0.5, %v3838_v21  ;;  %v3840_v53 = vpop.eup %3839  ;;  %7388 = vst [vmem:[#allocation26_spill] sm:$0xff] %v6163_v14 }
 0xbb5   : > { %v2542_v43 = vadd.f32 0.5, %v2541_v59  ;;  %v3842_v48 = vpop.eup %3841 }
 0xbb6   : > { %v2546_v40 = vadd.f32 0.5, %v2545_v35  ;;  %v2550_v2 = vmul.f32 0.5, %v3842_v48 }
 0xbb7   : > { %v2553_v26 = vmul.f32 %v3840_v53, %v2542_v43 }
 0xbb8   : > { %v2552_v46 = vmul.f32 %v2546_v40, %v5794_v60  ;;  %v2551_v55 = vadd.f32 0.5, %v2550_v2  ;;  %v7381_v60 = vld [vmem:[#allocation17_spill] sm:$0xff] }
 0xbba   : > { %v6070_v5 = vadd.f32 %v2553_v26, %v2552_v46 }
 0xbbc   : > { %3843 = vtanh.f32 %v6070_v5 }
 0xbc6   : > { %v3844_v4 = vpop.eup %3843 }
 0xbc7   : > { %v2556_v6 = vmul.f32 %v3844_v4, %v2551_v55 }
 0xbc9   : > { %v6073_v0 = vpack.c.bf16 %v2556_v6, %v2556_v6 }
 0xbcb   : > { %2591 = vmatmul.mubr.bf16.vlgmr.msra.gmra.mrb[68].mxu0 %v6073_v0  ;;  %2632 = vmatmul.mubr.bf16.vlgmr.msra.gmra.mrb[68].mxu1 %v6073_v0 }
 0xbcc   : > { %2664 = vmatpush1.bf16.msra.mxu0 %v5804_v57  ;;  %2705 = vmatpush1.bf16.msra.mxu1 %v5810_v47 }
 0xbcd   : > { %2665 = vmatprep.subr.bf16.mxu0 %v5816_v56  ;;  %2706 = vmatprep.subr.bf16.mxu1 %v5822_v51 }
 0xbce   : > { %2695 = vmatprep.mubr.bf16.mxu0 %v7068_v62  ;;  %2736 = vmatprep.mubr.bf16.mxu1 %v7068_v62 }
 0xbd0   : > { %2666 = vmatpush1.bf16.msra.mxu0 %v5830_v17  ;;  %2707 = vmatpush1.bf16.msra.mxu1 %v5836_v15 }
 0xbd1   : > { %2667 = vmatprep.subr.bf16.mxu0 %v5842_v8  ;;  %2708 = vmatprep.subr.bf16.mxu1 %v5848_v12 }
 0xbd4   : > { %2668 = vmatpush1.bf16.msra.mxu0 %v5854_v63  ;;  %2709 = vmatpush1.bf16.msra.mxu1 %v5860_v61 }
 0xbd5   : > { %2669 = vmatprep.subr.bf16.mxu0 %v5866_v34  ;;  %2710 = vmatprep.subr.bf16.mxu1 %v5872_v45 }
 0xbd8   : > { %2670 = vmatpush1.bf16.msra.mxu0 %v5878_v36  ;;  %2711 = vmatpush1.bf16.msra.mxu1 %v5884_v1 }
 0xbd9   : > { %2671 = vmatprep.subr.bf16.mxu0 %v5890_v25  ;;  %2712 = vmatprep.subr.bf16.mxu1 %v5896_v20 }
 0xbdc   : > { %2672 = vmatpush1.bf16.msra.mxu0 %v7381_v60  ;;  %2713 = vmatpush1.bf16.msra.mxu1 %v7382_v7 }
 0xbdd   : > { %2673 = vmatprep.subr.bf16.mxu0 %v7383_v52  ;;  %2714 = vmatprep.subr.bf16.mxu1 %v6101_v58 }
 0xbe0   : > { %2674 = vmatpush1.bf16.msra.mxu0 %v7384_v32  ;;  %2715 = vmatpush1.bf16.msra.mxu1 %v6108_v29 }
 0xbe1   : > { %2675 = vmatprep.subr.bf16.mxu0 %v7385_v42  ;;  %2716 = vmatprep.subr.bf16.mxu1 %v6115_v19 }
 0xbe4   : > { %2676 = vmatpush1.bf16.msra.mxu0 %v6121_v33  ;;  %2717 = vmatpush1.bf16.msra.mxu1 %v6127_v22 }
 0xbe5   : > { %2677 = vmatprep.subr.bf16.mxu0 %v6133_v54  ;;  %2718 = vmatprep.subr.bf16.mxu1 %v6139_v30 }
 0xbe8   : > { %2678 = vmatpush1.bf16.msra.mxu0 %v6145_v49  ;;  %2719 = vmatpush1.bf16.msra.mxu1 %v6151_v24 }
 0xbe9   : > { %2750 = vmatprep.subr.bf16.mxu0 %v6157_v27  ;;  %2791 = vmatprep.subr.bf16.mxu1 %v6163_v14 }
 0xc9e   : > { %v2592_v21 = vpop.f32.mrb[68].mxu0  ;;  %v2633_v59 = vpop.f32.mrb[68].mxu1 }
 0xc9f   : > { %v2593_v35 = vadd.f32 %v2592_v21, %v6057_v37  ;;  %v2634_v43 = vadd.f32 %v2633_v59, %v6059_v38  ;;  %v2594_v53 = vpop.f32.mrb[69].mxu0  ;;  %v2635_v40 = vpop.f32.mrb[69].mxu1 }
 0xca0   : > { %v2595_v26 = vadd.f32 %v2594_v53, %v6061_v50  ;;  %v2636_v46 = vadd.f32 %v2635_v40, %v6063_v39  ;;  %v2596_v48 = vpop.f32.mrb[70].mxu0  ;;  %v2637_v2 = vpop.f32.mrb[70].mxu1 }
 0xca1   : > { %v2640_v55 = vadd.f32 %v2593_v35, %v4804_v9  ;;  %v2597_v4 = vpop.f32.mrb[71].mxu0  ;;  %v2638_v6 = vpop.f32.mrb[71].mxu1  ;;  %v2642_v37 = vadd.f32 %v2634_v43, %v4813_v23 }
 0xca2   : > { %v2641_v14 = vadd.f32 %v2595_v26, %v4806_v13  ;;  %v2643_v38 = vadd.f32 %v2636_v46, %v4817_v3  ;;  %v6193_v6 = vld [vmem:[%s6712_s1 + $0x28] ss:$16 sps:$4 sm:$0xff]  }
 0xca3   : > { %v2644_v27 = vmul.f32 0.5, %v2640_v55  ;;  %7390 = vst [vmem:[#allocation6_spill] sm:$0xff] %v6193_v6 }
 0xca4   : > { %v2648_v24 = vmul.f32 0.5, %v2641_v14  ;;  %v2653_v50 = vmul.f32 0.5, %v2643_v38  ;;  %v6206_v38 = vld [vmem:[%s6712_s1 + $0x40] ss:$16 sps:$4 sm:$0xff]  }
 0xca5   : > { %3845 = vtanh.f32 %v2644_v27  ;;  %7392 = vst [vmem:[#allocation28_spill] sm:$0xff] %v6206_v38 }
 0xca6   : > { %3847 = vtanh.f32 %v2648_v24 }
 0xca7   : > { %3849 = vtanh.f32 %v2642_v37  ;;  %v6200_v37 = vld [vmem:[%s6712_s1 + $0x4c] ss:$16 sps:$4 sm:$0xff]  }
 0xca8   : > { %3851 = vtanh.f32 %v2653_v50  ;;  %7391 = vst [vmem:[#allocation7_spill] sm:$0xff] %v6200_v37  ;;  %v6212_v50 = vld [vmem:[%s6712_s1 + $0x48] ss:$16 sps:$4 sm:$0xff]  }
 0xca9   : > { %7393 = vst [vmem:[#allocation27_spill] sm:$0xff] %v6212_v50 }
 0xcaf   : > { %v3846_v21 = vpop.eup %3845 }
 0xcb0   : > { %v3848_v39 = vpop.eup %3847  ;;  %v2646_v59 = vmul.f32 0.5, %v3846_v21  ;;  %v6218_v21 = vld [vmem:[%s6712_s1 + $0x64] ss:$16 sps:$4 sm:$0xff]  }
 0xcb1   : > { %v2650_v53 = vmul.f32 0.5, %v3848_v39  ;;  %v3850_v40 = vpop.eup %3849  ;;  %7394 = vst [vmem:[#allocation30_spill] sm:$0xff] %v6218_v21  ;;  %v6224_v39 = vld [vmem:[%s6712_s1 + $0x6c] ss:$16 sps:$4 sm:$0xff]  }
 0xcb2   : > { %v2647_v35 = vadd.f32 0.5, %v2646_v59  ;;  %v3852_v24 = vpop.eup %3851  ;;  %7395 = vst [vmem:[#allocation29_spill] sm:$0xff] %v6224_v39  ;;  %v6230_v59 = vld [vmem:[%s6712_s1 + $0x60] ss:$16 sps:$4 sm:$0xff]  }
 0xcb3   : > { %v2651_v48 = vadd.f32 0.5, %v2650_v53  ;;  %v2655_v27 = vmul.f32 0.5, %v3852_v24  ;;  %7396 = vst [vmem:[#allocation31_spill] sm:$0xff] %v6230_v59  ;;  %v6236_v53 = vld [vmem:[%s6712_s1 + $0x68] ss:$16 sps:$4 sm:$0xff]  }
 0xcb4   : > { %v2658_v2 = vmul.f32 %v3850_v40, %v2647_v35  ;;  %7397 = vst [vmem:[#allocation32_spill] sm:$0xff] %v6236_v53  ;;  %v6242_v35 = vld [vmem:[%s6712_s1 + $0x84] ss:$16 sps:$4 sm:$0xff]   ;;  %v6248_v40 = vld [vmem:[%s6712_s1 + $0x8c] ss:$16 sps:$4 sm:$0xff]  }
 0xcb5   : > { %v2657_v26 = vmul.f32 %v2651_v48, %v5949_v28  ;;  %v2656_v43 = vadd.f32 0.5, %v2655_v27  ;;  %v6184_v28 = vld [vmem:[%s6712_s1 + $0x2c] ss:$16 sps:$4 sm:$0xff]   ;;  %7398 = vst [vmem:[#allocation33_spill] sm:$0xff] %v6242_v35  ;;  %7399 = vst [vmem:[#allocation34_spill] sm:$0xff] %v6248_v40 }
 0xcb6   : > { %7389 = vst [vmem:[#allocation25_spill] sm:$0xff] %v6184_v28  ;;  %v6254_v48 = vld [vmem:[%s6712_s1 + $0x80] ss:$16 sps:$4 sm:$0xff]   ;;  %v6272_v24 = vld [vmem:[%s6712_s1 + $0xac] ss:$16 sps:$4 sm:$0xff]  }
 0xcb7   : > { %v6175_v14 = vadd.f32 %v2658_v2, %v2657_v26  ;;  %7400 = vst [vmem:[#allocation35_spill] sm:$0xff] %v6254_v48  ;;  %v6260_v2 = vld [vmem:[%s6712_s1 + $0x88] ss:$16 sps:$4 sm:$0xff]   ;;  %v6266_v26 = vld [vmem:[%s6712_s1 + $0xa4] ss:$16 sps:$4 sm:$0xff]   ;;  %7403 = vst [vmem:[#allocation38_spill] sm:$0xff] %v6272_v24 }
 0xcb8   : > { %7401 = vst [vmem:[#allocation36_spill] sm:$0xff] %v6260_v2  ;;  %7402 = vst [vmem:[#allocation37_spill] sm:$0xff] %v6266_v26  ;;  %v6278_v27 = vld [vmem:[%s6712_s1 + $0xa0] ss:$16 sps:$4 sm:$0xff]  }
 0xcb9   : > { %3853 = vtanh.f32 %v6175_v14  ;;  %7404 = vst [vmem:[#allocation14_spill] sm:$0xff] %v6278_v27 }
 0xcc3   : > { %v3854_v46 = vpop.eup %3853 }
 0xcc4   : > { %v2661_v55 = vmul.f32 %v3854_v46, %v2656_v43  ;;  %v6284_v43 = vld [vmem:[%s6712_s1 + $0xa8] ss:$16 sps:$4 sm:$0xff]   ;;  %v6290_v46 = vld [vmem:[%s6712_s1 + $0xc4] ss:$16 sps:$4 sm:$0xff]  }
 0xcc5   : > { %7405 = vst [vmem:[#allocation18_spill] sm:$0xff] %v6284_v43  ;;  %7406 = vst [vmem:[#allocation39_spill] sm:$0xff] %v6290_v46 }
 0xcc6   : > { %v2662_v4 = vpack.c.bf16 %v2661_v55, %v2661_v55  ;;  %v6296_v55 = vld [vmem:[%s6712_s1 + $0xcc] ss:$16 sps:$4 sm:$0xff]  }
 0xcc7   : > { %7407 = vst [vmem:[#allocation40_spill] sm:$0xff] %v6296_v55 }
 0xcc8   : > { %2696 = vmatmul.mubr.bf16.vlgmr.msra.gmra.mrb[72].mxu0 %v2662_v4  ;;  %2737 = vmatmul.mubr.bf16.vlgmr.msra.gmra.mrb[72].mxu1 %v2662_v4  ;;  %v6302_v4 = vld [vmem:[%s6712_s1 + $0xc0] ss:$16 sps:$4 sm:$0xff]  }
 0xcc9   : > { %2751 = vmatpush1.bf16.msra.mxu0 %v5955_v44  ;;  %2792 = vmatpush1.bf16.msra.mxu1 %v5961_v31  ;;  %7408 = vst [vmem:[#allocation41_spill] sm:$0xff] %v6302_v4 }
 0xcca   : > { %2752 = vmatprep.subr.bf16.mxu0 %v5967_v16  ;;  %2793 = vmatprep.subr.bf16.mxu1 %v6184_v28 }
 0xccb   : > { %2782 = vmatprep.mubr.bf16.mxu0 %v7068_v62  ;;  %2823 = vmatprep.mubr.bf16.mxu1 %v7068_v62 }
 0xccd   : > { %2753 = vmatpush1.bf16.msra.mxu0 %v5976_v41  ;;  %2794 = vmatpush1.bf16.msra.mxu1 %v6193_v6 }
 0xcce   : > { %2754 = vmatprep.subr.bf16.mxu0 %v5983_v11  ;;  %2795 = vmatprep.subr.bf16.mxu1 %v6200_v37 }
 0xcd1   : > { %2755 = vmatpush1.bf16.msra.mxu0 %v6206_v38  ;;  %2796 = vmatpush1.bf16.msra.mxu1 %v6212_v50 }
 0xcd2   : > { %2756 = vmatprep.subr.bf16.mxu0 %v6218_v21  ;;  %2797 = vmatprep.subr.bf16.mxu1 %v6224_v39 }
 0xcd5   : > { %2757 = vmatpush1.bf16.msra.mxu0 %v6230_v59  ;;  %2798 = vmatpush1.bf16.msra.mxu1 %v6236_v53  ;;  %v3531_v59 = vld [vmem:[%s4161_s30 + $0xd0] sm:$0xff] }
 0xcd6   : > { %2758 = vmatprep.subr.bf16.mxu0 %v6242_v35  ;;  %2799 = vmatprep.subr.bf16.mxu1 %v6248_v40  ;;  %v3530_v40 = vld [vmem:[%s4161_s30 + $0xc8] sm:$0xff] }
 0xcd9   : > { %2759 = vmatpush1.bf16.msra.mxu0 %v6254_v48  ;;  %2800 = vmatpush1.bf16.msra.mxu1 %v6260_v2  ;;  %v3529_v48 = vld [vmem:[%s4161_s30 + $0xc0] sm:$0xff] }
 0xcda   : > { %2760 = vmatprep.subr.bf16.mxu0 %v6266_v26  ;;  %2801 = vmatprep.subr.bf16.mxu1 %v6272_v24 }
 0xcdd   : > { %2761 = vmatpush1.bf16.msra.mxu0 %v6278_v27  ;;  %2802 = vmatpush1.bf16.msra.mxu1 %v6284_v43  ;;  %v6308_v43 = vld [vmem:[%s6712_s1 + $0xc8] ss:$16 sps:$4 sm:$0xff]  }
 0xcde   : > { %2762 = vmatprep.subr.bf16.mxu0 %v6290_v46  ;;  %2803 = vmatprep.subr.bf16.mxu1 %v6296_v55  ;;  %7409 = vst [vmem:[#allocation42_spill] sm:$0xff] %v6308_v43  ;;  %v6314_v46 = vld [vmem:[%s6712_s1 + $0xe4] ss:$16 sps:$4 sm:$0xff]   ;;  %v6320_v55 = vld [vmem:[%s6712_s1 + $0xec] ss:$16 sps:$4 sm:$0xff]  }
 0xcdf   : > { %7410 = vst [vmem:[#allocation43_spill] sm:$0xff] %v6314_v46  ;;  %7411 = vst [vmem:[#allocation44_spill] sm:$0xff] %v6320_v55 }
 0xce1   : > { %2763 = vmatpush1.bf16.msra.mxu0 %v6302_v4  ;;  %2804 = vmatpush1.bf16.msra.mxu1 %v6308_v43  ;;  %v6326_v4 = vld [vmem:[%s6712_s1 + $0xe0] ss:$16 sps:$4 sm:$0xff]   ;;  %v6332_v43 = vld [vmem:[%s6712_s1 + $0xe8] ss:$16 sps:$4 sm:$0xff]  }
 0xce2   : > { %2764 = vmatprep.subr.bf16.mxu0 %v6314_v46  ;;  %2805 = vmatprep.subr.bf16.mxu1 %v6320_v55  ;;  %7412 = vst [vmem:[#allocation45_spill] sm:$0xff] %v6326_v4  ;;  %7413 = vst [vmem:[#allocation46_spill] sm:$0xff] %v6332_v43  ;;  %v6338_v46 = vld [vmem:[%s6713_s2 + $0x4] ss:$16 sps:$4 sm:$0xff]   ;;  %v6344_v55 = vld [vmem:[%s6713_s2 + $0xc] ss:$16 sps:$4 sm:$0xff]  }
 0xce3   : > { %7414 = vst [vmem:[#allocation47_spill] sm:$0xff] %v6338_v46  ;;  %7415 = vst [vmem:[#allocation48_spill] sm:$0xff] %v6344_v55 }
 0xce5   : > { %2765 = vmatpush1.bf16.msra.mxu0 %v6326_v4  ;;  %2806 = vmatpush1.bf16.msra.mxu1 %v6332_v43  ;;  %v6352_v43 = vld [vmem:[%s6713_s2] ss:$16 sps:$4 sm:$0xff]  }
 0xce6   : > { %2855 = vmatprep.subr.bf16.mxu0 %v6338_v46  ;;  %2896 = vmatprep.subr.bf16.mxu1 %v6344_v55  ;;  %7416 = vst [vmem:[#allocation49_spill] sm:$0xff] %v6352_v43  ;;  %v6358_v46 = vld [vmem:[%s6713_s2 + $0x8] ss:$16 sps:$4 sm:$0xff]   ;;  %v6364_v55 = vld [vmem:[%s6713_s2 + $0x24] ss:$16 sps:$4 sm:$0xff]  }
 0xce7   : > { %7417 = vst [vmem:[#allocation50_spill] sm:$0xff] %v6358_v46  ;;  %7418 = vst [vmem:[#allocation51_spill] sm:$0xff] %v6364_v55 }
 0xce8   : > { %2783 = vmatmul.mubr.bf16.vlgmr.msra.gmra.mrb[76].mxu0 %v6073_v0  ;;  %2824 = vmatmul.mubr.bf16.vlgmr.msra.gmra.mrb[76].mxu1 %v6073_v0  ;;  %v6370_v0 = vld [vmem:[%s6713_s2 + $0x2c] ss:$16 sps:$4 sm:$0xff]  }
 0xce9   : > { %2856 = vmatpush1.bf16.msra.mxu0 %v6352_v43  ;;  %2897 = vmatpush1.bf16.msra.mxu1 %v6358_v46  ;;  %7419 = vst [vmem:[#allocation52_spill] sm:$0xff] %v6370_v0  ;;  %v6378_v46 = vld [vmem:[%s6713_s2 + $0x20] ss:$16 sps:$4 sm:$0xff]   ;;  %v6396_v43 = vld [vmem:[%s6713_s2 + $0x4c] ss:$16 sps:$4 sm:$0xff]  }
 0xcea   : > { %2857 = vmatprep.subr.bf16.mxu0 %v6364_v55  ;;  %2898 = vmatprep.subr.bf16.mxu1 %v6370_v0  ;;  %7420 = vst [vmem:[#allocation53_spill] sm:$0xff] %v6378_v46  ;;  %v6384_v55 = vld [vmem:[%s6713_s2 + $0x28] ss:$16 sps:$4 sm:$0xff]   ;;  %v6390_v0 = vld [vmem:[%s6713_s2 + $0x44] ss:$16 sps:$4 sm:$0xff]   ;;  %7423 = vst [vmem:[#allocation56_spill] sm:$0xff] %v6396_v43 }
 0xceb   : > { %2887 = vmatprep.mubr.bf16.mxu0 %v7068_v62  ;;  %2928 = vmatprep.mubr.bf16.mxu1 %v7068_v62  ;;  %7421 = vst [vmem:[#allocation54_spill] sm:$0xff] %v6384_v55  ;;  %7422 = vst [vmem:[#allocation55_spill] sm:$0xff] %v6390_v0 }
 0xced   : > { %2858 = vmatpush1.bf16.msra.mxu0 %v6378_v46  ;;  %2899 = vmatpush1.bf16.msra.mxu1 %v6384_v55  ;;  %v6402_v46 = vld [vmem:[%s6713_s2 + $0x40] ss:$16 sps:$4 sm:$0xff]   ;;  %v6408_v55 = vld [vmem:[%s6713_s2 + $0x48] ss:$16 sps:$4 sm:$0xff]  }
 0xcee   : > { %2859 = vmatprep.subr.bf16.mxu0 %v6390_v0  ;;  %2900 = vmatprep.subr.bf16.mxu1 %v6396_v43  ;;  %7424 = vst [vmem:[#allocation57_spill] sm:$0xff] %v6402_v46  ;;  %7425 = vst [vmem:[#allocation58_spill] sm:$0xff] %v6408_v55  ;;  %v6414_v0 = vld [vmem:[%s6713_s2 + $0x64] ss:$16 sps:$4 sm:$0xff]   ;;  %v6420_v43 = vld [vmem:[%s6713_s2 + $0x6c] ss:$16 sps:$4 sm:$0xff]  }
 0xcef   : > { %7426 = vst [vmem:[#allocation59_spill] sm:$0xff] %v6414_v0  ;;  %7427 = vst [vmem:[#allocation60_spill] sm:$0xff] %v6420_v43 }
 0xcf1   : > { %2860 = vmatpush1.bf16.msra.mxu0 %v6402_v46  ;;  %2901 = vmatpush1.bf16.msra.mxu1 %v6408_v55  ;;  %v6426_v46 = vld [vmem:[%s6713_s2 + $0x60] ss:$16 sps:$4 sm:$0xff]   ;;  %v6432_v55 = vld [vmem:[%s6713_s2 + $0x68] ss:$16 sps:$4 sm:$0xff]  }
 0xcf2   : > { %2861 = vmatprep.subr.bf16.mxu0 %v6414_v0  ;;  %2902 = vmatprep.subr.bf16.mxu1 %v6420_v43  ;;  %7428 = vst [vmem:[#allocation61_spill] sm:$0xff] %v6426_v46  ;;  %7429 = vst [vmem:[#allocation62_spill] sm:$0xff] %v6432_v55  ;;  %v6438_v0 = vld [vmem:[%s6713_s2 + $0x84] ss:$16 sps:$4 sm:$0xff]   ;;  %v6444_v43 = vld [vmem:[%s6713_s2 + $0x8c] ss:$16 sps:$4 sm:$0xff]  }
 0xcf3   : > { %7430 = vst [vmem:[#allocation63_spill] sm:$0xff] %v6438_v0  ;;  %7431 = vst [vmem:[#allocation8_spill] sm:$0xff] %v6444_v43 }
 0xcf5   : > { %2862 = vmatpush1.bf16.msra.mxu0 %v6426_v46  ;;  %2903 = vmatpush1.bf16.msra.mxu1 %v6432_v55  ;;  %v6450_v46 = vld [vmem:[%s6713_s2 + $0x80] ss:$16 sps:$4 sm:$0xff]   ;;  %v6456_v55 = vld [vmem:[%s6713_s2 + $0x88] ss:$16 sps:$4 sm:$0xff]  }
 0xcf6   : > { %2863 = vmatprep.subr.bf16.mxu0 %v6438_v0  ;;  %2904 = vmatprep.subr.bf16.mxu1 %v6444_v43  ;;  %7432 = vst [vmem:[#allocation10_spill] sm:$0xff] %v6450_v46  ;;  %7433 = vst [vmem:[#allocation9_spill] sm:$0xff] %v6456_v55  ;;  %v6462_v0 = vld [vmem:[%s6713_s2 + $0xa4] ss:$16 sps:$4 sm:$0xff]   ;;  %v6468_v43 = vld [vmem:[%s6713_s2 + $0xac] ss:$16 sps:$4 sm:$0xff]  }
 0xcf7   : > { %7434 = vst [vmem:[#allocation13_spill] sm:$0xff] %v6462_v0  ;;  %7435 = vst [vmem:[#allocation11_spill] sm:$0xff] %v6468_v43 }
 0xcf9   : > { %2864 = vmatpush1.bf16.msra.mxu0 %v6450_v46  ;;  %2905 = vmatpush1.bf16.msra.mxu1 %v6456_v55  ;;  %v6474_v46 = vld [vmem:[%s6713_s2 + $0xa0] ss:$16 sps:$4 sm:$0xff]   ;;  %v6480_v55 = vld [vmem:[%s6713_s2 + $0xa8] ss:$16 sps:$4 sm:$0xff]  }
 0xcfa   : > { %2865 = vmatprep.subr.bf16.mxu0 %v6462_v0  ;;  %2906 = vmatprep.subr.bf16.mxu1 %v6468_v43  ;;  %7436 = vst [vmem:[#allocation64_spill] sm:$0xff] %v6474_v46  ;;  %7437 = vst [vmem:[#allocation65_spill] sm:$0xff] %v6480_v55  ;;  %v6486_v0 = vld [vmem:[%s6713_s2 + $0xc4] ss:$16 sps:$4 sm:$0xff]   ;;  %v6492_v43 = vld [vmem:[%s6713_s2 + $0xcc] ss:$16 sps:$4 sm:$0xff]  }
 0xcfb   : > { %7438 = vst [vmem:[#allocation66_spill] sm:$0xff] %v6486_v0  ;;  %7439 = vst [vmem:[#allocation67_spill] sm:$0xff] %v6492_v43 }
 0xcfd   : > { %2866 = vmatpush1.bf16.msra.mxu0 %v6474_v46  ;;  %2907 = vmatpush1.bf16.msra.mxu1 %v6480_v55  ;;  %v6498_v46 = vld [vmem:[%s6713_s2 + $0xc0] ss:$16 sps:$4 sm:$0xff]   ;;  %v6504_v55 = vld [vmem:[%s6713_s2 + $0xc8] ss:$16 sps:$4 sm:$0xff]  }
 0xcfe   : > { %2867 = vmatprep.subr.bf16.mxu0 %v6486_v0  ;;  %2908 = vmatprep.subr.bf16.mxu1 %v6492_v43  ;;  %7440 = vst [vmem:[#allocation68_spill] sm:$0xff] %v6498_v46  ;;  %7441 = vst [vmem:[#allocation69_spill] sm:$0xff] %v6504_v55  ;;  %v6510_v0 = vld [vmem:[%s6713_s2 + $0xe4] ss:$16 sps:$4 sm:$0xff]   ;;  %v6516_v43 = vld [vmem:[%s6713_s2 + $0xec] ss:$16 sps:$4 sm:$0xff]  }
 0xcff   : > { %7442 = vst [vmem:[#allocation70_spill] sm:$0xff] %v6510_v0  ;;  %7443 = vst [vmem:[#allocation17_spill] sm:$0xff] %v6516_v43 }
 0xd01   : > { %2868 = vmatpush1.bf16.msra.mxu0 %v6498_v46  ;;  %2909 = vmatpush1.bf16.msra.mxu1 %v6504_v55  ;;  %v6522_v55 = vld [vmem:[%s6713_s2 + $0xe0] ss:$16 sps:$4 sm:$0xff]  }
 0xd02   : > { %2869 = vmatprep.subr.bf16.mxu0 %v6510_v0  ;;  %2910 = vmatprep.subr.bf16.mxu1 %v6516_v43  ;;  %7444 = vst [vmem:[#allocation20_spill] sm:$0xff] %v6522_v55  ;;  %v6528_v0 = vld [vmem:[%s6713_s2 + $0xe8] ss:$16 sps:$4 sm:$0xff]  }
 0xd03   : > { %7445 = vst [vmem:[#allocation19_spill] sm:$0xff] %v6528_v0 }
 0xd05   : > { %2870 = vmatpush1.bf16.msra.mxu0 %v6522_v55  ;;  %2911 = vmatpush1.bf16.msra.mxu1 %v6528_v0 }
 0xd06   : > { %2960 = vmatprep.subr.bf16.mxu0 %v6048_v10  ;;  %3001 = vmatprep.subr.bf16.mxu1 %v6054_v18 }
 0xd9b   : > { %v6533_v43 = vpop.f32.mrb[72].mxu0  ;;  %v6535_v46 = vpop.f32.mrb[72].mxu1 }
 0xd9c   : > { %v6537_v4 = vpop.f32.mrb[73].mxu0  ;;  %v6539_v27 = vpop.f32.mrb[73].mxu1 }
 0xd9d   : > { %v2701_v55 = vpop.f32.mrb[74].mxu0  ;;  %v2742_v24 = vpop.f32.mrb[74].mxu1 }
 0xd9e   : > { %v2702_v26 = vpop.f32.mrb[75].mxu0  ;;  %v2743_v2 = vpop.f32.mrb[75].mxu1 }
 0xd9f   : > { %v3532_v2 = vld [vmem:[%s4161_s30 + $0xd8] sm:$0xff] }
 0xdbb   : > { %v2784_v0 = vpop.f32.mrb[76].mxu0  ;;  %v2825_v10 = vpop.f32.mrb[76].mxu1 }
 0xdbc   : > { %v2832_v35 = vadd.f32 %v3529_v48, %v2784_v0  ;;  %v2786_v18 = vpop.f32.mrb[77].mxu0  ;;  %v2827_v53 = vpop.f32.mrb[77].mxu1  ;;  %v2834_v24 = vadd.f32 %v3531_v59, %v2825_v10 }
 0xdbd   : > { %v2833_v39 = vadd.f32 %v3530_v40, %v2786_v18  ;;  %v2788_v21 = vpop.f32.mrb[78].mxu0  ;;  %v2829_v50 = vpop.f32.mrb[78].mxu1  ;;  %v2835_v26 = vadd.f32 %v3532_v2, %v2827_v53  ;;  %v7449_v18 = vld [vmem:[#allocation12_spill] sm:$0xff]  ;;  %v7452_v2 = vld [vmem:[#allocation6_spill] sm:$0xff] }
 0xdbe   : > { %v2836_v38 = vmul.f32 0.5, %v2832_v35  ;;  %v2789_v37 = vpop.f32.mrb[79].mxu0  ;;  %v2830_v11 = vpop.f32.mrb[79].mxu1 }
 0xdbf   : > { %v2840_v6 = vmul.f32 0.5, %v2833_v39  ;;  %v2845_v55 = vmul.f32 0.5, %v2835_v26  ;;  %v7453_v26 = vld [vmem:[#allocation16_spill] sm:$0xff] }
 0xdc0   : > { %3855 = vtanh.f32 %v2836_v38 }
 0xdc1   : > { %3857 = vtanh.f32 %v2840_v6 }
 0xdc2   : > { %3859 = vtanh.f32 %v2834_v24  ;;  %v7450_v24 = vld [vmem:[#allocation25_spill] sm:$0xff] }
 0xdc3   : > { %3861 = vtanh.f32 %v2845_v55  ;;  %v7454_v55 = vld [vmem:[#allocation7_spill] sm:$0xff] }
 0xdca   : > { %v3856_v41 = vpop.eup %3855 }
 0xdcb   : > { %v3858_v28 = vpop.eup %3857  ;;  %v2838_v48 = vmul.f32 0.5, %v3856_v41 }
 0xdcc   : > { %v2842_v0 = vmul.f32 0.5, %v3858_v28  ;;  %v3860_v40 = vpop.eup %3859 }
 0xdcd   : > { %v2839_v16 = vadd.f32 0.5, %v2838_v48  ;;  %v3862_v6 = vpop.eup %3861  ;;  %v7455_v48 = vld [vmem:[#allocation28_spill] sm:$0xff] }
 0xdce   : > { %v2843_v21 = vadd.f32 0.5, %v2842_v0  ;;  %v2847_v38 = vmul.f32 0.5, %v3862_v6  ;;  %v7458_v0 = vld [vmem:[#allocation29_spill] sm:$0xff]  ;;  %v7463_v6 = vld [vmem:[#allocation35_spill] sm:$0xff] }
 0xdcf   : > { %v2850_v50 = vmul.f32 %v3860_v40, %v2839_v16  ;;  %v7459_v40 = vld [vmem:[#allocation31_spill] sm:$0xff] }
 0xdd0   : > { %v2849_v37 = vmul.f32 %v2843_v21, %v6070_v5  ;;  %v2848_v39 = vadd.f32 0.5, %v2847_v38  ;;  %v7460_v21 = vld [vmem:[#allocation32_spill] sm:$0xff] }
 0xdd1   : > { %v7464_v38 = vld [vmem:[#allocation36_spill] sm:$0xff] }
 0xdd2   : > { %v6546_v11 = vadd.f32 %v2850_v50, %v2849_v37  ;;  %v7461_v50 = vld [vmem:[#allocation33_spill] sm:$0xff]  ;;  %v7462_v37 = vld [vmem:[#allocation34_spill] sm:$0xff] }
 0xdd4   : > { %3863 = vtanh.f32 %v6546_v11 }
 0xdde   : > { %v3864_v59 = vpop.eup %3863 }
 0xddf   : > { %v2853_v53 = vmul.f32 %v3864_v59, %v2848_v39  ;;  %v7465_v39 = vld [vmem:[#allocation37_spill] sm:$0xff]  ;;  %v7466_v59 = vld [vmem:[#allocation38_spill] sm:$0xff] }
 0xde1   : > { %v6549_v35 = vpack.c.bf16 %v2853_v53, %v2853_v53  ;;  %v7467_v53 = vld [vmem:[#allocation14_spill] sm:$0xff] }
 0xde3   : > { %2888 = vmatmul.mubr.bf16.vlgmr.msra.gmra.mrb[80].mxu0 %v6549_v35  ;;  %2929 = vmatmul.mubr.bf16.vlgmr.msra.gmra.mrb[80].mxu1 %v6549_v35 }
 0xde4   : > { %2961 = vmatpush1.bf16.msra.mxu0 %v5804_v57  ;;  %3002 = vmatpush1.bf16.msra.mxu1 %v5810_v47  ;;  %v7446_v57 = vld [vmem:[#allocation24_spill] sm:$0xff]  ;;  %v7447_v47 = vld [vmem:[#allocation23_spill] sm:$0xff] }
 0xde5   : > { %2962 = vmatprep.subr.bf16.mxu0 %v5816_v56  ;;  %3003 = vmatprep.subr.bf16.mxu1 %v5822_v51  ;;  %v7448_v56 = vld [vmem:[#allocation26_spill] sm:$0xff] }
 0xde6   : > { %2992 = vmatprep.mubr.bf16.mxu0 %v7068_v62  ;;  %3033 = vmatprep.mubr.bf16.mxu1 %v7068_v62 }
 0xde8   : > { %2963 = vmatpush1.bf16.msra.mxu0 %v5830_v17  ;;  %3004 = vmatpush1.bf16.msra.mxu1 %v5836_v15 }
 0xde9   : > { %2964 = vmatprep.subr.bf16.mxu0 %v5842_v8  ;;  %3005 = vmatprep.subr.bf16.mxu1 %v5848_v12 }
 0xdec   : > { %2965 = vmatpush1.bf16.msra.mxu0 %v5854_v63  ;;  %3006 = vmatpush1.bf16.msra.mxu1 %v5860_v61 }
 0xded   : > { %2966 = vmatprep.subr.bf16.mxu0 %v5866_v34  ;;  %3007 = vmatprep.subr.bf16.mxu1 %v5872_v45 }
 0xdf0   : > { %2967 = vmatpush1.bf16.msra.mxu0 %v5878_v36  ;;  %3008 = vmatpush1.bf16.msra.mxu1 %v5884_v1 }
 0xdf1   : > { %2968 = vmatprep.subr.bf16.mxu0 %v5890_v25  ;;  %3009 = vmatprep.subr.bf16.mxu1 %v5896_v20 }
 0xdf4   : > { %2969 = vmatpush1.bf16.msra.mxu0 %v7381_v60  ;;  %3010 = vmatpush1.bf16.msra.mxu1 %v7382_v7 }
 0xdf5   : > { %2970 = vmatprep.subr.bf16.mxu0 %v7383_v52  ;;  %3011 = vmatprep.subr.bf16.mxu1 %v6101_v58 }
 0xdf8   : > { %2971 = vmatpush1.bf16.msra.mxu0 %v7384_v32  ;;  %3012 = vmatpush1.bf16.msra.mxu1 %v6108_v29 }
 0xdf9   : > { %2972 = vmatprep.subr.bf16.mxu0 %v7385_v42  ;;  %3013 = vmatprep.subr.bf16.mxu1 %v6115_v19 }
 0xdfc   : > { %2973 = vmatpush1.bf16.msra.mxu0 %v6121_v33  ;;  %3014 = vmatpush1.bf16.msra.mxu1 %v6127_v22 }
 0xdfd   : > { %2974 = vmatprep.subr.bf16.mxu0 %v6133_v54  ;;  %3015 = vmatprep.subr.bf16.mxu1 %v6139_v30 }
 0xe00   : > { %2975 = vmatpush1.bf16.msra.mxu0 %v6145_v49  ;;  %3016 = vmatpush1.bf16.msra.mxu1 %v7446_v57  ;;  %v7468_v57 = vld [vmem:[#allocation18_spill] sm:$0xff] }
 0xe01   : > { %3047 = vmatprep.subr.bf16.mxu0 %v7447_v47  ;;  %3088 = vmatprep.subr.bf16.mxu1 %v7448_v56  ;;  %v7469_v47 = vld [vmem:[#allocation39_spill] sm:$0xff]  ;;  %v7470_v56 = vld [vmem:[#allocation40_spill] sm:$0xff] }
 0xeb6   : > { %v2889_v51 = vpop.f32.mrb[80].mxu0  ;;  %v2930_v17 = vpop.f32.mrb[80].mxu1 }
 0xeb7   : > { %v2890_v15 = vadd.f32 %v2889_v51, %v6533_v43  ;;  %v2931_v8 = vadd.f32 %v2930_v17, %v6535_v46  ;;  %v2891_v12 = vpop.f32.mrb[81].mxu0  ;;  %v2932_v63 = vpop.f32.mrb[81].mxu1  ;;  %v7471_v51 = vld [vmem:[#allocation41_spill] sm:$0xff]  ;;  %v7472_v17 = vld [vmem:[#allocation42_spill] sm:$0xff] }
 0xeb8   : > { %v2892_v61 = vadd.f32 %v2891_v12, %v6537_v4  ;;  %v2933_v34 = vadd.f32 %v2932_v63, %v6539_v27  ;;  %v2893_v45 = vpop.f32.mrb[82].mxu0  ;;  %v2934_v36 = vpop.f32.mrb[82].mxu1  ;;  %v7475_v12 = vld [vmem:[#allocation45_spill] sm:$0xff]  ;;  %v7476_v63 = vld [vmem:[#allocation46_spill] sm:$0xff] }
 0xeb9   : > { %v2937_v1 = vadd.f32 %v2890_v15, %v4804_v9  ;;  %v2894_v25 = vpop.f32.mrb[83].mxu0  ;;  %v2935_v20 = vpop.f32.mrb[83].mxu1  ;;  %v2939_v60 = vadd.f32 %v2931_v8, %v4813_v23  ;;  %v7473_v15 = vld [vmem:[#allocation43_spill] sm:$0xff]  ;;  %v7474_v8 = vld [vmem:[#allocation44_spill] sm:$0xff]  ;;  %v7479_v45 = vld [vmem:[#allocation49_spill] sm:$0xff] }
 0xeba   : > { %v2938_v16 = vadd.f32 %v2892_v61, %v4806_v13  ;;  %v2940_v7 = vadd.f32 %v2933_v34, %v4817_v3  ;;  %v7477_v61 = vld [vmem:[#allocation47_spill] sm:$0xff]  ;;  %v7478_v34 = vld [vmem:[#allocation48_spill] sm:$0xff]  ;;  %v7480_v36 = vld [vmem:[#allocation50_spill] sm:$0xff] }
 0xebb   : > { %v2941_v41 = vmul.f32 0.5, %v2937_v1  ;;  %v7481_v1 = vld [vmem:[#allocation51_spill] sm:$0xff]  ;;  %v7482_v25 = vld [vmem:[#allocation52_spill] sm:$0xff]  ;;  %v7483_v20 = vld [vmem:[#allocation53_spill] sm:$0xff] }
 0xebc   : > { %v2945_v5 = vmul.f32 0.5, %v2938_v16  ;;  %v2950_v52 = vmul.f32 0.5, %v2940_v7  ;;  %v7484_v16 = vld [vmem:[#allocation54_spill] sm:$0xff]  ;;  %v7489_v7 = vld [vmem:[#allocation59_spill] sm:$0xff] }
 0xebd   : > { %3865 = vtanh.f32 %v2941_v41  ;;  %v7485_v41 = vld [vmem:[#allocation55_spill] sm:$0xff] }
 0xebe   : > { %3867 = vtanh.f32 %v2945_v5  ;;  %v7486_v5 = vld [vmem:[#allocation56_spill] sm:$0xff] }
 0xebf   : > { %3869 = vtanh.f32 %v2939_v60  ;;  %v7488_v60 = vld [vmem:[#allocation58_spill] sm:$0xff] }
 0xec0   : > { %3871 = vtanh.f32 %v2950_v52  ;;  %v7490_v52 = vld [vmem:[#allocation60_spill] sm:$0xff] }
 0xec7   : > { %v3866_v58 = vpop.eup %3865 }
 0xec8   : > { %v3868_v32 = vpop.eup %3867  ;;  %v2943_v29 = vmul.f32 0.5, %v3866_v58  ;;  %v7491_v58 = vld [vmem:[#allocation61_spill] sm:$0xff] }
 0xec9   : > { %v2947_v42 = vmul.f32 0.5, %v3868_v32  ;;  %v3870_v33 = vpop.eup %3869  ;;  %v7492_v32 = vld [vmem:[#allocation62_spill] sm:$0xff] }
 0xeca   : > { %v2944_v19 = vadd.f32 0.5, %v2943_v29  ;;  %v3872_v28 = vpop.eup %3871  ;;  %v7494_v29 = vld [vmem:[#allocation8_spill] sm:$0xff] }
 0xecb   : > { %v2948_v22 = vadd.f32 0.5, %v2947_v42  ;;  %v2952_v27 = vmul.f32 0.5, %v3872_v28  ;;  %v7495_v42 = vld [vmem:[#allocation10_spill] sm:$0xff] }
 0xecc   : > { %v2955_v54 = vmul.f32 %v3870_v33, %v2944_v19  ;;  %v7496_v19 = vld [vmem:[#allocation9_spill] sm:$0xff]  ;;  %v7501_v28 = vld [vmem:[#allocation66_spill] sm:$0xff] }
 0xecd   : > { %v2954_v30 = vmul.f32 %v2948_v22, %v6175_v14  ;;  %v2953_v43 = vadd.f32 0.5, %v2952_v27  ;;  %v7451_v14 = vld [vmem:[#allocation21_spill] sm:$0xff]  ;;  %v7498_v22 = vld [vmem:[#allocation11_spill] sm:$0xff] }
 0xece   : > { %v7497_v33 = vld [vmem:[#allocation13_spill] sm:$0xff]  ;;  %v7502_v27 = vld [vmem:[#allocation67_spill] sm:$0xff] }
 0xecf   : > { %v6596_v49 = vadd.f32 %v2955_v54, %v2954_v30  ;;  %v7499_v54 = vld [vmem:[#allocation64_spill] sm:$0xff]  ;;  %v7500_v30 = vld [vmem:[#allocation65_spill] sm:$0xff] }
 0xed1   : > { %3873 = vtanh.f32 %v6596_v49 }
 0xedb   : > { %v3874_v46 = vpop.eup %3873 }
 0xedc   : > { %v2958_v4 = vmul.f32 %v3874_v46, %v2953_v43  ;;  %v7503_v43 = vld [vmem:[#allocation68_spill] sm:$0xff]  ;;  %v7504_v46 = vld [vmem:[#allocation69_spill] sm:$0xff] }
 0xede   : > { %v2959_v10 = vpack.c.bf16 %v2958_v4, %v2958_v4  ;;  %v7505_v4 = vld [vmem:[#allocation70_spill] sm:$0xff] }
 0xee0   : > { %2993 = vmatmul.mubr.bf16.vlgmr.msra.gmra.mrb[84].mxu0 %v2959_v10  ;;  %3034 = vmatmul.mubr.bf16.vlgmr.msra.gmra.mrb[84].mxu1 %v2959_v10  ;;  %v7506_v10 = vld [vmem:[#allocation17_spill] sm:$0xff] }
 0xee1   : > { %3048 = vmatpush1.bf16.msra.mxu0 %v5955_v44  ;;  %3089 = vmatpush1.bf16.msra.mxu1 %v5961_v31  ;;  %v7456_v44 = vld [vmem:[#allocation27_spill] sm:$0xff]  ;;  %v7457_v31 = vld [vmem:[#allocation30_spill] sm:$0xff] }
 0xee2   : > { %3049 = vmatprep.subr.bf16.mxu0 %v7449_v18  ;;  %3090 = vmatprep.subr.bf16.mxu1 %v7450_v24  ;;  %v7507_v18 = vld [vmem:[#allocation20_spill] sm:$0xff]  ;;  %v7508_v24 = vld [vmem:[#allocation19_spill] sm:$0xff] }
 0xee3   : > { %3079 = vmatprep.mubr.bf16.mxu0 %v7068_v62  ;;  %3120 = vmatprep.mubr.bf16.mxu1 %v7068_v62 }
 0xee5   : > { %3050 = vmatpush1.bf16.msra.mxu0 %v7451_v14  ;;  %3091 = vmatpush1.bf16.msra.mxu1 %v7452_v2 }
 0xee6   : > { %3051 = vmatprep.subr.bf16.mxu0 %v7453_v26  ;;  %3092 = vmatprep.subr.bf16.mxu1 %v7454_v55 }
 0xee9   : > { %3052 = vmatpush1.bf16.msra.mxu0 %v7455_v48  ;;  %3093 = vmatpush1.bf16.msra.mxu1 %v7456_v44 }
 0xeea   : > { %3053 = vmatprep.subr.bf16.mxu0 %v7457_v31  ;;  %3094 = vmatprep.subr.bf16.mxu1 %v7458_v0 }
 0xeed   : > { %3054 = vmatpush1.bf16.msra.mxu0 %v7459_v40  ;;  %3095 = vmatpush1.bf16.msra.mxu1 %v7460_v21  ;;  %v3533_v40 = vld [vmem:[%s4161_s30 + $0xe0] sm:$0xff]  ;;  %v3534_v21 = vld [vmem:[%s4161_s30 + $0xe8] sm:$0xff] }
 0xeee   : > { %3055 = vmatprep.subr.bf16.mxu0 %v7461_v50  ;;  %3096 = vmatprep.subr.bf16.mxu1 %v7462_v37 }
 0xef1   : > { %3056 = vmatpush1.bf16.msra.mxu0 %v7463_v6  ;;  %3097 = vmatpush1.bf16.msra.mxu1 %v7464_v38 }
 0xef2   : > { %3057 = vmatprep.subr.bf16.mxu0 %v7465_v39  ;;  %3098 = vmatprep.subr.bf16.mxu1 %v7466_v59  ;;  %v3535_v59 = vld [vmem:[%s4161_s30 + $0xf0] sm:$0xff] }
 0xef5   : > { %3058 = vmatpush1.bf16.msra.mxu0 %v7467_v53  ;;  %3099 = vmatpush1.bf16.msra.mxu1 %v7468_v57 }
 0xef6   : > { %3059 = vmatprep.subr.bf16.mxu0 %v7469_v47  ;;  %3100 = vmatprep.subr.bf16.mxu1 %v7470_v56 }
 0xef9   : > { %3060 = vmatpush1.bf16.msra.mxu0 %v7471_v51  ;;  %3101 = vmatpush1.bf16.msra.mxu1 %v7472_v17 }
 0xefa   : > { %3061 = vmatprep.subr.bf16.mxu0 %v7473_v15  ;;  %3102 = vmatprep.subr.bf16.mxu1 %v7474_v8 }
 0xefd   : > { %3062 = vmatpush1.bf16.msra.mxu0 %v7475_v12  ;;  %3103 = vmatpush1.bf16.msra.mxu1 %v7476_v63  ;;  %v3536_v12 = vld [vmem:[%s4161_s30 + $0xf8] sm:$0xff] }
 0xefe   : > { %3152 = vmatprep.subr.bf16.mxu0 %v7477_v61  ;;  %3193 = vmatprep.subr.bf16.mxu1 %v7478_v34 }
 0xf00   : > { %3080 = vmatmul.mubr.bf16.vlgmr.msra.gmra.mrb[88].mxu0 %v6549_v35  ;;  %3121 = vmatmul.mubr.bf16.vlgmr.msra.gmra.mrb[88].mxu1 %v6549_v35  ;;  %v7487_v35 = vld [vmem:[#allocation57_spill] sm:$0xff] }
 0xf01   : > { %3153 = vmatpush1.bf16.msra.mxu0 %v7479_v45  ;;  %3194 = vmatpush1.bf16.msra.mxu1 %v7480_v36 }
 0xf02   : > { %3154 = vmatprep.subr.bf16.mxu0 %v7481_v1  ;;  %3195 = vmatprep.subr.bf16.mxu1 %v7482_v25 }
 0xf03   : > { %3184 = vmatprep.mubr.bf16.mxu0 %v7068_v62  ;;  %3225 = vmatprep.mubr.bf16.mxu1 %v7068_v62  ;;  %v7493_v62 = vld [vmem:[#allocation63_spill] sm:$0xff] }
 0xf05   : > { %3155 = vmatpush1.bf16.msra.mxu0 %v7483_v20  ;;  %3196 = vmatpush1.bf16.msra.mxu1 %v7484_v16 }
 0xf06   : > { %3156 = vmatprep.subr.bf16.mxu0 %v7485_v41  ;;  %3197 = vmatprep.subr.bf16.mxu1 %v7486_v5 }
 0xf09   : > { %3157 = vmatpush1.bf16.msra.mxu0 %v7487_v35  ;;  %3198 = vmatpush1.bf16.msra.mxu1 %v7488_v60 }
 0xf0a   : > { %3158 = vmatprep.subr.bf16.mxu0 %v7489_v7  ;;  %3199 = vmatprep.subr.bf16.mxu1 %v7490_v52 }
 0xf0d   : > { %3159 = vmatpush1.bf16.msra.mxu0 %v7491_v58  ;;  %3200 = vmatpush1.bf16.msra.mxu1 %v7492_v32 }
 0xf0e   : > { %3160 = vmatprep.subr.bf16.mxu0 %v7493_v62  ;;  %3201 = vmatprep.subr.bf16.mxu1 %v7494_v29 }
 0xf11   : > { %3161 = vmatpush1.bf16.msra.mxu0 %v7495_v42  ;;  %3202 = vmatpush1.bf16.msra.mxu1 %v7496_v19 }
 0xf12   : > { %3162 = vmatprep.subr.bf16.mxu0 %v7497_v33  ;;  %3203 = vmatprep.subr.bf16.mxu1 %v7498_v22 }
 0xf15   : > { %3163 = vmatpush1.bf16.msra.mxu0 %v7499_v54  ;;  %3204 = vmatpush1.bf16.msra.mxu1 %v7500_v30 }
 0xf16   : > { %3164 = vmatprep.subr.bf16.mxu0 %v7501_v28  ;;  %3205 = vmatprep.subr.bf16.mxu1 %v7502_v27 }
 0xf19   : > { %3165 = vmatpush1.bf16.msra.mxu0 %v7503_v43  ;;  %3206 = vmatpush1.bf16.msra.mxu1 %v7504_v46 }
 0xf1a   : > { %3166 = vmatprep.subr.bf16.mxu0 %v7505_v4  ;;  %3207 = vmatprep.subr.bf16.mxu1 %v7506_v10 }
 0xf1d   : > { %3167 = vmatpush1.bf16.msra.mxu0 %v7507_v18  ;;  %3208 = vmatpush1.bf16.msra.mxu1 %v7508_v24 }
 0xfb3   : > { %v2994_v14 = vpop.f32.mrb[84].mxu0  ;;  %v3035_v2 = vpop.f32.mrb[84].mxu1 }
 0xfb4   : > { %v2996_v26 = vpop.f32.mrb[85].mxu0  ;;  %v3037_v55 = vpop.f32.mrb[85].mxu1 }
 0xfb5   : > { %v2998_v48 = vpop.f32.mrb[86].mxu0  ;;  %v3039_v44 = vpop.f32.mrb[86].mxu1 }
 0xfb6   : > { %v2999_v31 = vpop.f32.mrb[87].mxu0  ;;  %v3040_v0 = vpop.f32.mrb[87].mxu1 }
 0xfd3   : > { %v3081_v50 = vpop.f32.mrb[88].mxu0  ;;  %v3122_v37 = vpop.f32.mrb[88].mxu1 }
 0xfd4   : > { %v3129_v6 = vadd.f32 %v3533_v40, %v3081_v50  ;;  %v3083_v38 = vpop.f32.mrb[89].mxu0  ;;  %v3124_v39 = vpop.f32.mrb[89].mxu1  ;;  %v3131_v8 = vadd.f32 %v3535_v59, %v3122_v37  ;;  %v4105_v59 = vmov (!%p3537_p5), 0.0  }
 0xfd5   : > { %v3130_v53 = vadd.f32 %v3534_v21, %v3083_v38  ;;  %v3085_v57 = vpop.f32.mrb[90].mxu0  ;;  %v3126_v47 = vpop.f32.mrb[90].mxu1  ;;  %v3132_v63 = vadd.f32 %v3536_v12, %v3124_v39  ;;  %v4087_v39 = vld [vmem:[%s6716_s5] sm:$0xff] (!%p3537_p5)   ;;  %3559 = vmatprep.subr.bf16.mxu0 (!%p3537_p5), %v4105_v59 }
 0xfd6   : > { %v3133_v56 = vmul.f32 0.5, %v3129_v6  ;;  %v3086_v51 = vpop.f32.mrb[91].mxu0  ;;  %v3127_v17 = vpop.f32.mrb[91].mxu1  ;;  %v4090_v57 = vld [vmem:[%s6716_s5 + $0x18] sm:$0xff] (!%p3537_p5)   ;;  %v4091_v47 = vld [vmem:[%s6716_s5 + $0x20] sm:$0xff] (!%p3537_p5)  }
 0xfd7   : > { %v3137_v15 = vmul.f32 0.5, %v3130_v53  ;;  %v3142_v61 = vmul.f32 0.5, %v3132_v63  ;;  %v4089_v53 = vld [vmem:[%s6716_s5 + $0x10] sm:$0xff] (!%p3537_p5)   ;;  %v4094_v17 = vld [vmem:[%s6716_s5 + $0x38] sm:$0xff] (!%p3537_p5)  }
 0xfd8   : > { %3875 = vtanh.f32 %v3133_v56  ;;  %v4092_v56 = vld [vmem:[%s6716_s5 + $0x28] sm:$0xff] (!%p3537_p5)   ;;  %v4093_v51 = vld [vmem:[%s6716_s5 + $0x30] sm:$0xff] (!%p3537_p5)  }
 0xfd9   : > { %3877 = vtanh.f32 %v3137_v15 }
 0xfda   : > { %3879 = vtanh.f32 %v3131_v8  ;;  %v3538_v8 = vld [vmem:[%s6717_s6] ss:$0 sm:$0xff] (!%p3537_p5) }
 0xfdb   : > { %3881 = vtanh.f32 %v3142_v61 }
 0xfe2   : > { %v3876_v34 = vpop.eup %3875 }
 0xfe3   : > { %v3878_v45 = vpop.eup %3877  ;;  %v3135_v36 = vmul.f32 0.5, %v3876_v34 }
 0xfe4   : > { %v3139_v1 = vmul.f32 0.5, %v3878_v45  ;;  %v3880_v20 = vpop.eup %3879 }
 0xfe5   : > { %v3136_v25 = vadd.f32 0.5, %v3135_v36  ;;  %v3882_v60 = vpop.eup %3881 }
 0xfe6   : > { %v3140_v16 = vadd.f32 0.5, %v3139_v1  ;;  %v3144_v7 = vmul.f32 0.5, %v3882_v60 }
 0xfe7   : > { %v3147_v41 = vmul.f32 %v3880_v20, %v3136_v25 }
 0xfe8   : > { %v3146_v5 = vmul.f32 %v3140_v16, %v6546_v11  ;;  %v3145_v52 = vadd.f32 0.5, %v3144_v7 }
 0xfea   : > { %v3148_v35 = vadd.f32 %v3147_v41, %v3146_v5 }
 0xfec   : > { %3883 = vtanh.f32 %v3148_v35  ;;  %3257 = vst [vmem:[#allocation3] sm:$0xff] %v3148_v35 }
 0xff6   : > { %v3884_v58 = vpop.eup %3883 }
 0xff7   : > { %v3150_v32 = vmul.f32 %v3884_v58, %v3145_v52 }
 0xff9   : > { %3256 = vst [vmem:[#allocation2] sm:$0xff] %v3150_v32  ;;  %v3151_v62 = vpack.c.bf16 %v3150_v32, %v3150_v32 }
 0xffb   : > { %3185 = vmatmul.mubr.bf16.vlgmr.msra.gmra.mrb[92].mxu0 %v3151_v62  ;;  %3226 = vmatmul.mubr.bf16.vlgmr.msra.gmra.mrb[92].mxu1 %v3151_v62 }
 0xffc   : > { %3560 = vmatpush3.bf16.msra.mxu0 (!%p3537_p5), %v4087_v39  ;;  %3575 = vmatprep.mubr.msk.bf16.mxu0 (!%p3537_p5), %vm4106_vm0, %v4105_v59 }
 0xffd   : > { %3561 = vmatprep.subr.bf16.mxu0 (!%p3537_p5), %v4105_v59 }
0x10ce   : > { %v3186_v29 = vpop.f32.mrb[92].mxu0  ;;  %v3227_v42 = vpop.f32.mrb[92].mxu1 }
0x10cf   : > { %v3187_v19 = vadd.f32 %v3186_v29, %v2994_v14  ;;  %v3228_v33 = vadd.f32 %v3227_v42, %v3035_v2  ;;  %v3188_v22 = vpop.f32.mrb[93].mxu0  ;;  %v3229_v54 = vpop.f32.mrb[93].mxu1 }
0x10d0   : > { %v3189_v30 = vadd.f32 %v3188_v22, %v2996_v26  ;;  %v3230_v11 = vadd.f32 %v3229_v54, %v3037_v55  ;;  %v3190_v28 = vpop.f32.mrb[94].mxu0  ;;  %v3231_v27 = vpop.f32.mrb[94].mxu1 }
0x10d1   : > { %v3234_v43 = vadd.f32 %v3187_v19, %v4804_v9  ;;  %v3191_v46 = vpop.f32.mrb[95].mxu0  ;;  %v3232_v4 = vpop.f32.mrb[95].mxu1  ;;  %v3236_v48 = vadd.f32 %v3228_v33, %v4813_v23 }
0x10d2   : > { %v3235_v10 = vadd.f32 %v3189_v30, %v4806_v13  ;;  %v3237_v14 = vadd.f32 %v3230_v11, %v4817_v3 }
0x10d3   : > { %v3238_v18 = vmul.f32 0.5, %v3234_v43 }
0x10d4   : > { %v3242_v24 = vmul.f32 0.5, %v3235_v10  ;;  %v3247_v2 = vmul.f32 0.5, %v3237_v14 }
0x10d5   : > { %3885 = vtanh.f32 %v3238_v18 }
0x10d6   : > { %3887 = vtanh.f32 %v3242_v24 }
0x10d7   : > { %3889 = vtanh.f32 %v3236_v48 }
0x10d8   : > { %3891 = vtanh.f32 %v3247_v2 }
0x10df   : > { %v3886_v26 = vpop.eup %3885 }
0x10e0   : > { %v3888_v55 = vpop.eup %3887  ;;  %v3240_v44 = vmul.f32 0.5, %v3886_v26 }
0x10e1   : > { %v3244_v31 = vmul.f32 0.5, %v3888_v55  ;;  %v3890_v0 = vpop.eup %3889 }
0x10e2   : > { %v3241_v9 = vadd.f32 0.5, %v3240_v44  ;;  %v3892_v23 = vpop.eup %3891 }
0x10e3   : > { %v3245_v40 = vadd.f32 0.5, %v3244_v31  ;;  %v3249_v37 = vmul.f32 0.5, %v3892_v23 }
0x10e4   : > { %v3252_v21 = vmul.f32 %v3890_v0, %v3241_v9 }
0x10e5   : > { %v3251_v13 = vmul.f32 %v3245_v40, %v6596_v49  ;;  %v3250_v6 = vadd.f32 0.5, %v3249_v37  ;;  %v4088_v49 = vld [vmem:[%s6716_s5 + $0x8] sm:$0xff] (!%p3537_p5)  }
0x10e6   : > { %3562 = vmatpush3.bf16.msra.mxu0 (!%p3537_p5), %v4088_v49 }
0x10e7   : > { %v3253_v50 = vadd.f32 %v3252_v21, %v3251_v13  ;;  %3563 = vmatprep.subr.bf16.mxu0 (!%p3537_p5), %v4105_v59 }
0x10e9   : > { %3893 = vtanh.f32 %v3253_v50  ;;  %3259 = vst [vmem:[#allocation5] sm:$0xff] %v3253_v50 }
0x10ea   : > { %3564 = vmatpush3.bf16.msra.mxu0 (!%p3537_p5), %v4089_v53 }
0x10eb   : > { %3565 = vmatprep.subr.bf16.mxu0 (!%p3537_p5), %v4105_v59 }
0x10ee   : > { %3566 = vmatpush3.bf16.msra.mxu0 (!%p3537_p5), %v4090_v57 }
0x10ef   : > { %3567 = vmatprep.subr.bf16.mxu0 (!%p3537_p5), %v4105_v59 }
0x10f0   : > { %3263 = sbr.rel (%p3537_p5) target bundleno = 4568 (0x11d8), region = 56 }
0x10f2   : > { %3568 = vmatpush3.bf16.msra.mxu0 (!%p3537_p5), %v4091_v47 }
0x10f3   : > { %v3894_v38 = vpop.eup %3893  ;;  %3569 = vmatprep.subr.bf16.mxu0 (!%p3537_p5), %v4105_v59 }
0x10f4   : > { %v3255_v3 = vmul.f32 %v3894_v38, %v3250_v6 }
0x10f6   : > { %3258 = vst [vmem:[#allocation4] sm:$0xff] %v3255_v3  ;;  %3570 = vmatpush3.bf16.msra.mxu0 (!%p3537_p5), %v4092_v56  ;;  %v3264_v15 = vpack.c.bf16 (!%p3537_p5), %v3255_v3, %v3255_v3 }
0x10f7   : > { %3571 = vmatprep.subr.bf16.mxu0 %v4105_v59 }
0x10fa   : > { %3572 = vmatpush3.bf16.msra.mxu0 %v4093_v51 }
0x10fb   : > { %3573 = vmatprep.subr.bf16.mxu0 %v4105_v59 }
0x10fe   : > { %3574 = vmatpush3.bf16.msra.mxu0 %v4094_v17 }
0x1101   : > { %3576 = vmatmul.mubr.bf16.vlgmr.msra.gmra.mrb[0].mxu0 %v3264_v15 }
0x11d4   : > { %v3370_v12 = vpop.f32.mrb[0].mxu0 }
0x11d5   : > { %v3371_v63 = vadd.f32 %v3538_v8, %v3370_v12  ;;  %v3577_v61 = vpop.f32.mrb[1].mxu0 }
0x11d6   : > { %v3373_v34 = vpop.f32.mrb[2].mxu0 }
0x11d7   : > { %3376 = vst [vmem:[%s6718_s7] sm:$0xff] %v3371_v63  ;;  %v3578_v45 = vpop.f32.mrb[3].mxu0 }
0x11d8 PF: > { %s17_s24 = sadd.s32 1, %s4101_s24  }
0x11d9   : > { %p14_p6 = scmp.ge.s32.totalorder %s17_s24, 4  }
0x11db   :  { %16 = sbr.rel (!%p14_p6) target bundleno = 1 (0x1), region = 89 }

</bundles_post_ra>
